<compile_context>
chip_gen: v7x
topology: tpu7x:2x2x1
jax: 0.10.0
libtpu: 0.0.40
codegen_flags: <defaults>
</compile_context>

<pallas_src>
import math
from functools import partial

import jax
import jax.numpy as jnp
from jax import lax
from jax.experimental import pallas as pl
from jax.experimental.pallas import tpu as pltpu


# ----------------------------- in-kernel helpers -----------------------------

def _layernorm(x, gamma, beta, eps=1e-5):
    mu = jnp.mean(x, axis=-1, keepdims=True)
    var = jnp.mean((x - mu) ** 2, axis=-1, keepdims=True)
    return (x - mu) * lax.rsqrt(var + eps) * gamma + beta


def _mm(a, w_bf16):
    """a (f32) @ w (bf16, already (K, N)) with f32 accumulation on the MXU."""
    return jnp.dot(a.astype(jnp.bfloat16), w_bf16,
                   preferred_element_type=jnp.float32)


# ------------------------------- fused kernel --------------------------------

def fused_transformer_kernel(
        x_ref, pe_ref, pw_ref, pb_ref,
        wqkv_ref, bqkv_ref, wo_ref, bo_ref,
        g1_ref, be1_ref, w1_ref, b1_ref, w2_ref, b2_ref, g2_ref, be2_ref,
        cg_ref, cbe_ref, cw1_ref, cb1_ref, cw2_ref, cb2_ref,
        o_ref, *, nhead, num_layers):
    """Entire forward pass for one batch item (grid axis = batch)."""
    x = x_ref[0]                                                  # (S, in_dim) f32

    # ---- input projection + positional encoding ----
    h = _mm(x, pw_ref[...]) + pb_ref[...] + pe_ref[...]           # (S, D) f32
    S, D = h.shape
    hd = D // nhead
    scale = 1.0 / math.sqrt(hd)

    # ---- encoder layers (post-norm, relu FFN) ----
    for l in range(num_layers):
        qkv = _mm(h, wqkv_ref[l]) + bqkv_ref[l]                   # (S, 3D) f32

        q = (qkv[:, :D] * scale).reshape(S, nhead, hd)
        k = qkv[:, D:2 * D].reshape(S, nhead, hd)
        v = qkv[:, 2 * D:].reshape(S, nhead, hd)
        qh = jnp.transpose(q, (1, 0, 2)).astype(jnp.bfloat16)     # (H, S, hd)
        kh = jnp.transpose(k, (1, 0, 2)).astype(jnp.bfloat16)
        vh = jnp.transpose(v, (1, 0, 2)).astype(jnp.bfloat16)

        s = jnp.einsum('hqd,hkd->hqk', qh, kh,
                       preferred_element_type=jnp.float32)        # (H, S, S) f32
        s = s - jnp.max(s, axis=-1, keepdims=True)
        p = jnp.exp(s)
        p = p * pl.reciprocal(jnp.sum(p, axis=-1, keepdims=True), approx=True)

        ctx = jnp.einsum('hqk,hkd->hqd', p.astype(jnp.bfloat16), vh,
                         preferred_element_type=jnp.float32)      # (H, S, hd)
        attn = jnp.transpose(ctx, (1, 0, 2)).reshape(S, D)        # (S, D)
        attn = _mm(attn, wo_ref[l]) + bo_ref[l]

        h = _layernorm(h + attn, g1_ref[l], be1_ref[l])

        ff = jnp.maximum(_mm(h, w1_ref[l]) + b1_ref[l], 0.0)
        ff = _mm(ff, w2_ref[l]) + b2_ref[l]
        h = _layernorm(h + ff, g2_ref[l], be2_ref[l])

    # ---- mean pool over sequence + classifier head ----
    pooled = jnp.mean(h, axis=0, keepdims=True)                   # (1, D)
    y = _layernorm(pooled, cg_ref[...], cbe_ref[...])
    z = jnp.maximum(_mm(y, cw1_ref[...]) + cb1_ref[...], 0.0)
    o_ref[0] = _mm(z, cw2_ref[...]) + cb2_ref[...]                # (1, Cpad)


# --------------------------------- wrapper ------------------------------------

def transformer_forward(x, prep, *, nhead, num_layers, num_classes):
    B, S, in_dim = x.shape
    Cpad = prep["cls_w2"].shape[1]

    def const_spec(a):
        if a.ndim == 2:
            return pl.BlockSpec(a.shape, lambda i: (0, 0))
        return pl.BlockSpec(a.shape, lambda i: (0, 0, 0))

    operands = (x, prep["pe"], prep["proj_w"], prep["proj_b"],
                prep["wqkv"], prep["bqkv"], prep["wo"], prep["bo"],
                prep["g1"], prep["be1"], prep["w1"], prep["b1"],
                prep["w2"], prep["b2"], prep["g2"], prep["be2"],
                prep["cls_g"], prep["cls_be"], prep["cls_w1"], prep["cls_b1"],
                prep["cls_w2"], prep["cls_b2"])

    in_specs = ([pl.BlockSpec((1, S, in_dim), lambda i: (i, 0, 0))]
                + [const_spec(a) for a in operands[1:]])

    out = pl.pallas_call(
        partial(fused_transformer_kernel, nhead=nhead, num_layers=num_layers),
        out_shape=jax.ShapeDtypeStruct((B, 1, Cpad), jnp.float32),
        grid=(B,),
        in_specs=in_specs,
        out_specs=pl.BlockSpec((1, 1, Cpad), lambda i: (i, 0, 0)),
        compiler_params=pltpu.CompilerParams(
            dimension_semantics=("parallel",),
            vmem_limit_bytes=64 * 1024 * 1024),
    )(*operands)
    return out[:, 0, :num_classes]


# ---------------------- parameter prep (one-time, host side) ------------------

def prepare_params(params, lane_pad=128):
    """Pre-transpose all Linear weights to (in, out), cast matmul weights to
    bf16, stack per-layer weights along a leading layer axis, and pad the
    classifier output dim up to a lane-dense multiple of 128."""
    prep = {}
    prep["pe"] = params["pe"]                                       # (S, D) f32
    prep["proj_w"] = params["proj_w"].T.astype(jnp.bfloat16)        # (in, D)
    prep["proj_b"] = params["proj_b"]                               # (1, D)

    def stack_T_bf16(name):
        return jnp.stack([lp[name].T for lp in params["layers"]]).astype(jnp.bfloat16)

    def stack_f32(name):
        return jnp.stack([lp[name] for lp in params["layers"]])

    prep["wqkv"] = stack_T_bf16("wqkv")   # (L, D, 3D)
    prep["bqkv"] = stack_f32("bqkv")      # (L, 1, 3D)
    prep["wo"] = stack_T_bf16("wo")       # (L, D, D)
    prep["bo"] = stack_f32("bo")
    prep["g1"] = stack_f32("g1")
    prep["be1"] = stack_f32("be1")
    prep["w1"] = stack_T_bf16("w1")       # (L, D, 4D)
    prep["b1"] = stack_f32("b1")
    prep["w2"] = stack_T_bf16("w2")       # (L, 4D, D)
    prep["b2"] = stack_f32("b2")
    prep["g2"] = stack_f32("g2")
    prep["be2"] = stack_f32("be2")

    prep["cls_g"] = params["cls_g"]
    prep["cls_be"] = params["cls_be"]
    prep["cls_w1"] = params["cls_w1"].T.astype(jnp.bfloat16)        # (D, H)
    prep["cls_b1"] = params["cls_b1"]                               # (1, H)

    C = params["cls_w2"].shape[0]
    Cpad = ((C + lane_pad - 1) // lane_pad) * lane_pad
    w2t = params["cls_w2"].T                                        # (H, C)
    prep["cls_w2"] = jnp.pad(w2t, ((0, 0), (0, Cpad - C))).astype(jnp.bfloat16)
    prep["cls_b2"] = jnp.pad(params["cls_b2"], ((0, 0), (0, Cpad - C)))
    return prep


# -------------------------- deterministic parameter init ----------------------

def make_pe(seq_len, d_model):
    position = jnp.arange(seq_len, dtype=jnp.float32)[:, None]
    div_term = jnp.exp(jnp.arange(0, d_model, 2, dtype=jnp.float32)
                       * (-math.log(10000.0) / d_model))
    pe = jnp.zeros((seq_len, d_model), jnp.float32)
    pe = pe.at[:, 0::2].set(jnp.sin(position * div_term))
    pe = pe.at[:, 1::2].set(jnp.cos(position * div_term))
    return pe


def init_params(key, input_dim, d_model, nhead, num_layers, num_classes, seq_len):
    def dense(k, out_f, in_f):
        kw, kb = jax.random.split(k)
        w = jax.random.normal(kw, (out_f, in_f), jnp.float32) * 0.02
        b = jax.random.normal(kb, (1, out_f), jnp.float32) * 0.02
        return w, b

    keys = jax.random.split(key, num_layers + 2)
    params = {}
    params["proj_w"], params["proj_b"] = dense(keys[0], d_model, input_dim)
    params["pe"] = make_pe(seq_len, d_model)

    layers = []
    for l in range(num_layers):
        kl = jax.random.split(keys[1 + l], 4)
        wqkv, bqkv = dense(kl[0], 3 * d_model, d_model)
        wo, bo = dense(kl[1], d_model, d_model)
        w1, b1 = dense(kl[2], 4 * d_model, d_model)
        w2, b2 = dense(kl[3], d_model, 4 * d_model)
        layers.append(dict(
            wqkv=wqkv, bqkv=bqkv, wo=wo, bo=bo,
            g1=jnp.ones((1, d_model), jnp.float32),
            be1=jnp.zeros((1, d_model), jnp.float32),
            w1=w1, b1=b1, w2=w2, b2=b2,
            g2=jnp.ones((1, d_model), jnp.float32),
            be2=jnp.zeros((1, d_model), jnp.float32),
        ))
    params["layers"] = layers

    kc = jax.random.split(keys[-1], 2)
    params["cls_g"] = jnp.ones((1, d_model), jnp.float32)
    params["cls_be"] = jnp.zeros((1, d_model), jnp.float32)
    params["cls_w1"], params["cls_b1"] = dense(kc[0], d_model // 2, d_model)
    params["cls_w2"], params["cls_b2"] = dense(kc[1], num_classes, d_model // 2)
    return params


# ------------------------------------ main -------------------------------------

if __name__ == "__main__":
    B, S = 2, 8
    input_dim, d_model, nhead, num_layers, num_classes = 16, 32, 4, 2, 10

    key = jax.random.PRNGKey(0)
    kp, kx = jax.random.split(key)
    params = init_params(kp, input_dim, d_model, nhead, num_layers, num_classes, S)
    prep = prepare_params(params)
    x = jax.random.normal(kx, (B, S, input_dim), jnp.float32)

    fwd = jax.jit(partial(transformer_forward, nhead=nhead,
                          num_layers=num_layers, num_classes=num_classes))
    out = jax.block_until_ready(fwd(x, prep))

    assert out.shape == (B, num_classes)
    assert bool(jnp.all(jnp.isfinite(out)))
    print("KERNEL_OK")
</pallas_src>

<mosaic_0001>
module attributes {stable_mosaic.version = 11 : i64} {
  func.func @fused_transformer_kernel(%arg0: i32, %arg1: memref<1x8x16xf32, #tpu.memory_space<vmem>>, %arg2: memref<8x32xf32, #tpu.memory_space<vmem>>, %arg3: memref<16x32xbf16, #tpu.memory_space<vmem>>, %arg4: memref<1x32xf32, #tpu.memory_space<vmem>>, %arg5: memref<2x32x96xbf16, #tpu.memory_space<vmem>>, %arg6: memref<2x1x96xf32, #tpu.memory_space<vmem>>, %arg7: memref<2x32x32xbf16, #tpu.memory_space<vmem>>, %arg8: memref<2x1x32xf32, #tpu.memory_space<vmem>>, %arg9: memref<2x1x32xf32, #tpu.memory_space<vmem>>, %arg10: memref<2x1x32xf32, #tpu.memory_space<vmem>>, %arg11: memref<2x32x128xbf16, #tpu.memory_space<vmem>>, %arg12: memref<2x1x128xf32, #tpu.memory_space<vmem>>, %arg13: memref<2x128x32xbf16, #tpu.memory_space<vmem>>, %arg14: memref<2x1x32xf32, #tpu.memory_space<vmem>>, %arg15: memref<2x1x32xf32, #tpu.memory_space<vmem>>, %arg16: memref<2x1x32xf32, #tpu.memory_space<vmem>>, %arg17: memref<1x32xf32, #tpu.memory_space<vmem>>, %arg18: memref<1x32xf32, #tpu.memory_space<vmem>>, %arg19: memref<32x16xbf16, #tpu.memory_space<vmem>>, %arg20: memref<1x16xf32, #tpu.memory_space<vmem>>, %arg21: memref<16x128xbf16, #tpu.memory_space<vmem>>, %arg22: memref<1x128xf32, #tpu.memory_space<vmem>>, %arg23: memref<1x1x128xf32, #tpu.memory_space<vmem>>) attributes {dimension_semantics = [#tpu.dimension_semantics<parallel>], iteration_bounds = array<i64: 2>, scalar_prefetch = 0 : i64, scratch_operands = 0 : i64, tpu.core_type = #tpu.core_type<tc>, window_params = [{transform_indices = @transform_0, window_bounds = array<i64: 1, 8, 16>}, {pipeline_mode = #tpu.pipeline_mode<synchronous>, transform_indices = @transform_1, window_bounds = array<i64: 8, 32>}, {pipeline_mode = #tpu.pipeline_mode<synchronous>, transform_indices = @transform_2, window_bounds = array<i64: 16, 32>}, {pipeline_mode = #tpu.pipeline_mode<synchronous>, transform_indices = @transform_3, window_bounds = array<i64: 1, 32>}, {pipeline_mode = #tpu.pipeline_mode<synchronous>, transform_indices = @transform_4, window_bounds = array<i64: 2, 32, 96>}, {pipeline_mode = #tpu.pipeline_mode<synchronous>, transform_indices = @transform_5, window_bounds = array<i64: 2, 1, 96>}, {pipeline_mode = #tpu.pipeline_mode<synchronous>, transform_indices = @transform_6, window_bounds = array<i64: 2, 32, 32>}, {pipeline_mode = #tpu.pipeline_mode<synchronous>, transform_indices = @transform_7, window_bounds = array<i64: 2, 1, 32>}, {pipeline_mode = #tpu.pipeline_mode<synchronous>, transform_indices = @transform_8, window_bounds = array<i64: 2, 1, 32>}, {pipeline_mode = #tpu.pipeline_mode<synchronous>, transform_indices = @transform_9, window_bounds = array<i64: 2, 1, 32>}, {pipeline_mode = #tpu.pipeline_mode<synchronous>, transform_indices = @transform_10, window_bounds = array<i64: 2, 32, 128>}, {pipeline_mode = #tpu.pipeline_mode<synchronous>, transform_indices = @transform_11, window_bounds = array<i64: 2, 1, 128>}, {pipeline_mode = #tpu.pipeline_mode<synchronous>, transform_indices = @transform_12, window_bounds = array<i64: 2, 128, 32>}, {pipeline_mode = #tpu.pipeline_mode<synchronous>, transform_indices = @transform_13, window_bounds = array<i64: 2, 1, 32>}, {pipeline_mode = #tpu.pipeline_mode<synchronous>, transform_indices = @transform_14, window_bounds = array<i64: 2, 1, 32>}, {pipeline_mode = #tpu.pipeline_mode<synchronous>, transform_indices = @transform_15, window_bounds = array<i64: 2, 1, 32>}, {pipeline_mode = #tpu.pipeline_mode<synchronous>, transform_indices = @transform_16, window_bounds = array<i64: 1, 32>}, {pipeline_mode = #tpu.pipeline_mode<synchronous>, transform_indices = @transform_17, window_bounds = array<i64: 1, 32>}, {pipeline_mode = #tpu.pipeline_mode<synchronous>, transform_indices = @transform_18, window_bounds = array<i64: 32, 16>}, {pipeline_mode = #tpu.pipeline_mode<synchronous>, transform_indices = @transform_19, window_bounds = array<i64: 1, 16>}, {pipeline_mode = #tpu.pipeline_mode<synchronous>, transform_indices = @transform_20, window_bounds = array<i64: 16, 128>}, {pipeline_mode = #tpu.pipeline_mode<synchronous>, transform_indices = @transform_21, window_bounds = array<i64: 1, 128>}, {transform_indices = @transform_22, window_bounds = array<i64: 1, 1, 128>}]} {
    %c0 = arith.constant 0 : index
    %c0_0 = arith.constant 0 : index
    %c0_1 = arith.constant 0 : index
    %0 = vector.load %arg1[%c0, %c0_0, %c0_1] : memref<1x8x16xf32, #tpu.memory_space<vmem>>, vector<1x8x16xf32>
    %1 = vector.shape_cast %0 : vector<1x8x16xf32> to vector<8x16xf32>
    %c0_2 = arith.constant 0 : index
    %c0_3 = arith.constant 0 : index
    %2 = vector.load %arg3[%c0_2, %c0_3] : memref<16x32xbf16, #tpu.memory_space<vmem>>, vector<16x32xbf16>
    %3 = arith.truncf %1 : vector<8x16xf32> to vector<8x16xbf16>
    %cst = arith.constant dense<0.000000e+00> : vector<8x32xf32>
    %4 = tpu.matmul %3, %2, %cst {dimension_numbers = #tpu.dot_dimension_numbers<[1], [0], [0], [1], [0, 0, 1, 1], [], []>} : vector<8x16xbf16>, vector<16x32xbf16>, vector<8x32xf32> -> vector<8x32xf32>
    %c0_4 = arith.constant 0 : index
    %c0_5 = arith.constant 0 : index
    %5 = vector.load %arg4[%c0_4, %c0_5] : memref<1x32xf32, #tpu.memory_space<vmem>>, vector<1x32xf32>
    %6 = vector.broadcast %5 : vector<1x32xf32> to vector<8x32xf32>
    %7 = arith.addf %4, %6 : vector<8x32xf32>
    %c0_6 = arith.constant 0 : index
    %c0_7 = arith.constant 0 : index
    %8 = vector.load %arg2[%c0_6, %c0_7] : memref<8x32xf32, #tpu.memory_space<vmem>>, vector<8x32xf32>
    %9 = arith.addf %7, %8 : vector<8x32xf32>
    %c0_8 = arith.constant 0 : index
    %c0_9 = arith.constant 0 : index
    %c0_10 = arith.constant 0 : index
    %10 = vector.load %arg5[%c0_8, %c0_9, %c0_10] : memref<2x32x96xbf16, #tpu.memory_space<vmem>>, vector<1x32x96xbf16>
    %11 = vector.shape_cast %10 : vector<1x32x96xbf16> to vector<32x96xbf16>
    %12 = arith.truncf %9 : vector<8x32xf32> to vector<8x32xbf16>
    %cst_11 = arith.constant dense<0.000000e+00> : vector<8x96xf32>
    %13 = tpu.matmul %12, %11, %cst_11 {dimension_numbers = #tpu.dot_dimension_numbers<[1], [0], [0], [1], [0, 0, 1, 1], [], []>} : vector<8x32xbf16>, vector<32x96xbf16>, vector<8x96xf32> -> vector<8x96xf32>
    %c0_12 = arith.constant 0 : index
    %c0_13 = arith.constant 0 : index
    %c0_14 = arith.constant 0 : index
    %14 = vector.load %arg6[%c0_12, %c0_13, %c0_14] : memref<2x1x96xf32, #tpu.memory_space<vmem>>, vector<1x1x96xf32>
    %15 = vector.shape_cast %14 : vector<1x1x96xf32> to vector<1x96xf32>
    %16 = vector.broadcast %15 : vector<1x96xf32> to vector<8x96xf32>
    %17 = arith.addf %13, %16 : vector<8x96xf32>
    %18 = vector.extract_strided_slice %17 {offsets = [0, 0], sizes = [8, 32], strides = [1, 1]} : vector<8x96xf32> to vector<8x32xf32>
    %cst_15 = arith.constant 0.353553385 : f32
    %19 = vector.broadcast %cst_15 : f32 to vector<8x32xf32>
    %20 = arith.mulf %18, %19 : vector<8x32xf32>
    %21 = vector.shape_cast %20 : vector<8x32xf32> to vector<8x4x8xf32>
    %22 = vector.extract_strided_slice %17 {offsets = [0, 32], sizes = [8, 32], strides = [1, 1]} : vector<8x96xf32> to vector<8x32xf32>
    %23 = vector.shape_cast %22 : vector<8x32xf32> to vector<8x4x8xf32>
    %24 = vector.extract_strided_slice %17 {offsets = [0, 64], sizes = [8, 32], strides = [1, 1]} : vector<8x96xf32> to vector<8x32xf32>
    %25 = vector.shape_cast %24 : vector<8x32xf32> to vector<8x4x8xf32>
    %26 = tpu.transpose %21, [1, 0, 2] : vector<8x4x8xf32> -> vector<4x8x8xf32>
    %27 = arith.truncf %26 : vector<4x8x8xf32> to vector<4x8x8xbf16>
    %28 = tpu.transpose %23, [1, 0, 2] : vector<8x4x8xf32> -> vector<4x8x8xf32>
    %29 = arith.truncf %28 : vector<4x8x8xf32> to vector<4x8x8xbf16>
    %30 = tpu.transpose %25, [1, 0, 2] : vector<8x4x8xf32> -> vector<4x8x8xf32>
    %31 = arith.truncf %30 : vector<4x8x8xf32> to vector<4x8x8xbf16>
    "tpu.trace_start"() <{level = 10 : i32, message = "hqd,hkd->hqk"}> : () -> ()
    %cst_16 = arith.constant dense<0.000000e+00> : vector<4x8x8xf32>
    %32 = tpu.matmul %27, %29, %cst_16 {dimension_numbers = #tpu.dot_dimension_numbers<[2], [2], [1], [1], [0, 0, 0, 1, 1, 1], [0], [0]>} : vector<4x8x8xbf16>, vector<4x8x8xbf16>, vector<4x8x8xf32> -> vector<4x8x8xf32>
    "tpu.trace_stop"() : () -> ()
    %cst_17 = arith.constant dense<0xFF800000> : vector<4x8xf32>
    %33 = vector.multi_reduction <maximumf>, %32, %cst_17 [2] : vector<4x8x8xf32> to vector<4x8xf32>
    %34 = vector.shape_cast %33 : vector<4x8xf32> to vector<4x8x1xf32>
    %35 = vector.broadcast %34 : vector<4x8x1xf32> to vector<4x8x8xf32>
    %36 = arith.subf %32, %35 : vector<4x8x8xf32>
    %37 = math.exp %36 : vector<4x8x8xf32>
    %cst_18 = arith.constant dense<0.000000e+00> : vector<4x8xf32>
    %38 = vector.multi_reduction <add>, %37, %cst_18 [2] : vector<4x8x8xf32> to vector<4x8xf32>
    %39 = vector.shape_cast %38 : vector<4x8xf32> to vector<4x8x1xf32>
    %40 = tpu.reciprocal %39 {approx = true} : vector<4x8x1xf32> -> vector<4x8x1xf32>
    %41 = vector.broadcast %40 : vector<4x8x1xf32> to vector<4x8x8xf32>
    %42 = arith.mulf %37, %41 : vector<4x8x8xf32>
    %43 = arith.truncf %42 : vector<4x8x8xf32> to vector<4x8x8xbf16>
    "tpu.trace_start"() <{level = 10 : i32, message = "hqk,hkd->hqd"}> : () -> ()
    %cst_19 = arith.constant dense<0.000000e+00> : vector<4x8x8xf32>
    %44 = tpu.matmul %43, %31, %cst_19 {dimension_numbers = #tpu.dot_dimension_numbers<[2], [1], [1], [2], [0, 0, 0, 1, 1, 2], [0], [0]>} : vector<4x8x8xbf16>, vector<4x8x8xbf16>, vector<4x8x8xf32> -> vector<4x8x8xf32>
    "tpu.trace_stop"() : () -> ()
    %45 = tpu.transpose %44, [1, 0, 2] : vector<4x8x8xf32> -> vector<8x4x8xf32>
    %46 = vector.shape_cast %45 : vector<8x4x8xf32> to vector<8x32xf32>
    %c0_20 = arith.constant 0 : index
    %c0_21 = arith.constant 0 : index
    %c0_22 = arith.constant 0 : index
    %47 = vector.load %arg7[%c0_20, %c0_21, %c0_22] : memref<2x32x32xbf16, #tpu.memory_space<vmem>>, vector<1x32x32xbf16>
    %48 = vector.shape_cast %47 : vector<1x32x32xbf16> to vector<32x32xbf16>
    %49 = arith.truncf %46 : vector<8x32xf32> to vector<8x32xbf16>
    %cst_23 = arith.constant dense<0.000000e+00> : vector<8x32xf32>
    %50 = tpu.matmul %49, %48, %cst_23 {dimension_numbers = #tpu.dot_dimension_numbers<[1], [0], [0], [1], [0, 0, 1, 1], [], []>} : vector<8x32xbf16>, vector<32x32xbf16>, vector<8x32xf32> -> vector<8x32xf32>
    %c0_24 = arith.constant 0 : index
    %c0_25 = arith.constant 0 : index
    %c0_26 = arith.constant 0 : index
    %51 = vector.load %arg8[%c0_24, %c0_25, %c0_26] : memref<2x1x32xf32, #tpu.memory_space<vmem>>, vector<1x1x32xf32>
    %52 = vector.shape_cast %51 : vector<1x1x32xf32> to vector<1x32xf32>
    %53 = vector.broadcast %52 : vector<1x32xf32> to vector<8x32xf32>
    %54 = arith.addf %50, %53 : vector<8x32xf32>
    %55 = arith.addf %9, %54 : vector<8x32xf32>
    %c0_27 = arith.constant 0 : index
    %c0_28 = arith.constant 0 : index
    %c0_29 = arith.constant 0 : index
    %56 = vector.load %arg9[%c0_27, %c0_28, %c0_29] : memref<2x1x32xf32, #tpu.memory_space<vmem>>, vector<1x1x32xf32>
    %57 = vector.shape_cast %56 : vector<1x1x32xf32> to vector<1x32xf32>
    %c0_30 = arith.constant 0 : index
    %c0_31 = arith.constant 0 : index
    %c0_32 = arith.constant 0 : index
    %58 = vector.load %arg10[%c0_30, %c0_31, %c0_32] : memref<2x1x32xf32, #tpu.memory_space<vmem>>, vector<1x1x32xf32>
    %59 = vector.shape_cast %58 : vector<1x1x32xf32> to vector<1x32xf32>
    %cst_33 = arith.constant dense<0.000000e+00> : vector<8xf32>
    %60 = vector.multi_reduction <add>, %55, %cst_33 [1] : vector<8x32xf32> to vector<8xf32>
    %61 = vector.shape_cast %60 : vector<8xf32> to vector<8x1xf32>
    %cst_34 = arith.constant 3.200000e+01 : f32
    %62 = vector.broadcast %cst_34 : f32 to vector<8x1xf32>
    %63 = arith.divf %61, %62 : vector<8x1xf32>
    %64 = vector.broadcast %63 : vector<8x1xf32> to vector<8x32xf32>
    %65 = arith.subf %55, %64 : vector<8x32xf32>
    %66 = arith.mulf %65, %65 : vector<8x32xf32>
    %cst_35 = arith.constant dense<0.000000e+00> : vector<8xf32>
    %67 = vector.multi_reduction <add>, %66, %cst_35 [1] : vector<8x32xf32> to vector<8xf32>
    %68 = vector.shape_cast %67 : vector<8xf32> to vector<8x1xf32>
    %cst_36 = arith.constant 3.200000e+01 : f32
    %69 = vector.broadcast %cst_36 : f32 to vector<8x1xf32>
    %70 = arith.divf %68, %69 : vector<8x1xf32>
    %71 = vector.broadcast %63 : vector<8x1xf32> to vector<8x32xf32>
    %72 = arith.subf %55, %71 : vector<8x32xf32>
    %cst_37 = arith.constant 9.99999974E-6 : f32
    %73 = vector.broadcast %cst_37 : f32 to vector<8x1xf32>
    %74 = arith.addf %70, %73 : vector<8x1xf32>
    %75 = math.rsqrt %74 : vector<8x1xf32>
    %76 = vector.broadcast %75 : vector<8x1xf32> to vector<8x32xf32>
    %77 = arith.mulf %72, %76 : vector<8x32xf32>
    %78 = vector.broadcast %57 : vector<1x32xf32> to vector<8x32xf32>
    %79 = arith.mulf %77, %78 : vector<8x32xf32>
    %80 = vector.broadcast %59 : vector<1x32xf32> to vector<8x32xf32>
    %81 = arith.addf %79, %80 : vector<8x32xf32>
    %c0_38 = arith.constant 0 : index
    %c0_39 = arith.constant 0 : index
    %c0_40 = arith.constant 0 : index
    %82 = vector.load %arg11[%c0_38, %c0_39, %c0_40] : memref<2x32x128xbf16, #tpu.memory_space<vmem>>, vector<1x32x128xbf16>
    %83 = vector.shape_cast %82 : vector<1x32x128xbf16> to vector<32x128xbf16>
    %84 = arith.truncf %81 : vector<8x32xf32> to vector<8x32xbf16>
    %cst_41 = arith.constant dense<0.000000e+00> : vector<8x128xf32>
    %85 = tpu.matmul %84, %83, %cst_41 {dimension_numbers = #tpu.dot_dimension_numbers<[1], [0], [0], [1], [0, 0, 1, 1], [], []>} : vector<8x32xbf16>, vector<32x128xbf16>, vector<8x128xf32> -> vector<8x128xf32>
    %c0_42 = arith.constant 0 : index
    %c0_43 = arith.constant 0 : index
    %c0_44 = arith.constant 0 : index
    %86 = vector.load %arg12[%c0_42, %c0_43, %c0_44] : memref<2x1x128xf32, #tpu.memory_space<vmem>>, vector<1x1x128xf32>
    %87 = vector.shape_cast %86 : vector<1x1x128xf32> to vector<1x128xf32>
    %88 = vector.broadcast %87 : vector<1x128xf32> to vector<8x128xf32>
    %89 = arith.addf %85, %88 : vector<8x128xf32>
    %cst_45 = arith.constant 0.000000e+00 : f32
    %90 = vector.broadcast %cst_45 : f32 to vector<8x128xf32>
    %91 = arith.maximumf %89, %90 : vector<8x128xf32>
    %c0_46 = arith.constant 0 : index
    %c0_47 = arith.constant 0 : index
    %c0_48 = arith.constant 0 : index
    %92 = vector.load %arg13[%c0_46, %c0_47, %c0_48] : memref<2x128x32xbf16, #tpu.memory_space<vmem>>, vector<1x128x32xbf16>
    %93 = vector.shape_cast %92 : vector<1x128x32xbf16> to vector<128x32xbf16>
    %94 = arith.truncf %91 : vector<8x128xf32> to vector<8x128xbf16>
    %cst_49 = arith.constant dense<0.000000e+00> : vector<8x32xf32>
    %95 = tpu.matmul %94, %93, %cst_49 {dimension_numbers = #tpu.dot_dimension_numbers<[1], [0], [0], [1], [0, 0, 1, 1], [], []>} : vector<8x128xbf16>, vector<128x32xbf16>, vector<8x32xf32> -> vector<8x32xf32>
    %c0_50 = arith.constant 0 : index
    %c0_51 = arith.constant 0 : index
    %c0_52 = arith.constant 0 : index
    %96 = vector.load %arg14[%c0_50, %c0_51, %c0_52] : memref<2x1x32xf32, #tpu.memory_space<vmem>>, vector<1x1x32xf32>
    %97 = vector.shape_cast %96 : vector<1x1x32xf32> to vector<1x32xf32>
    %98 = vector.broadcast %97 : vector<1x32xf32> to vector<8x32xf32>
    %99 = arith.addf %95, %98 : vector<8x32xf32>
    %100 = arith.addf %81, %99 : vector<8x32xf32>
    %c0_53 = arith.constant 0 : index
    %c0_54 = arith.constant 0 : index
    %c0_55 = arith.constant 0 : index
    %101 = vector.load %arg15[%c0_53, %c0_54, %c0_55] : memref<2x1x32xf32, #tpu.memory_space<vmem>>, vector<1x1x32xf32>
    %102 = vector.shape_cast %101 : vector<1x1x32xf32> to vector<1x32xf32>
    %c0_56 = arith.constant 0 : index
    %c0_57 = arith.constant 0 : index
    %c0_58 = arith.constant 0 : index
    %103 = vector.load %arg16[%c0_56, %c0_57, %c0_58] : memref<2x1x32xf32, #tpu.memory_space<vmem>>, vector<1x1x32xf32>
    %104 = vector.shape_cast %103 : vector<1x1x32xf32> to vector<1x32xf32>
    %cst_59 = arith.constant dense<0.000000e+00> : vector<8xf32>
    %105 = vector.multi_reduction <add>, %100, %cst_59 [1] : vector<8x32xf32> to vector<8xf32>
    %106 = vector.shape_cast %105 : vector<8xf32> to vector<8x1xf32>
    %cst_60 = arith.constant 3.200000e+01 : f32
    %107 = vector.broadcast %cst_60 : f32 to vector<8x1xf32>
    %108 = arith.divf %106, %107 : vector<8x1xf32>
    %109 = vector.broadcast %108 : vector<8x1xf32> to vector<8x32xf32>
    %110 = arith.subf %100, %109 : vector<8x32xf32>
    %111 = arith.mulf %110, %110 : vector<8x32xf32>
    %cst_61 = arith.constant dense<0.000000e+00> : vector<8xf32>
    %112 = vector.multi_reduction <add>, %111, %cst_61 [1] : vector<8x32xf32> to vector<8xf32>
    %113 = vector.shape_cast %112 : vector<8xf32> to vector<8x1xf32>
    %cst_62 = arith.constant 3.200000e+01 : f32
    %114 = vector.broadcast %cst_62 : f32 to vector<8x1xf32>
    %115 = arith.divf %113, %114 : vector<8x1xf32>
    %116 = vector.broadcast %108 : vector<8x1xf32> to vector<8x32xf32>
    %117 = arith.subf %100, %116 : vector<8x32xf32>
    %cst_63 = arith.constant 9.99999974E-6 : f32
    %118 = vector.broadcast %cst_63 : f32 to vector<8x1xf32>
    %119 = arith.addf %115, %118 : vector<8x1xf32>
    %120 = math.rsqrt %119 : vector<8x1xf32>
    %121 = vector.broadcast %120 : vector<8x1xf32> to vector<8x32xf32>
    %122 = arith.mulf %117, %121 : vector<8x32xf32>
    %123 = vector.broadcast %102 : vector<1x32xf32> to vector<8x32xf32>
    %124 = arith.mulf %122, %123 : vector<8x32xf32>
    %125 = vector.broadcast %104 : vector<1x32xf32> to vector<8x32xf32>
    %126 = arith.addf %124, %125 : vector<8x32xf32>
    %c1 = arith.constant 1 : index
    %c0_64 = arith.constant 0 : index
    %c0_65 = arith.constant 0 : index
    %127 = vector.load %arg5[%c1, %c0_64, %c0_65] : memref<2x32x96xbf16, #tpu.memory_space<vmem>>, vector<1x32x96xbf16>
    %128 = vector.shape_cast %127 : vector<1x32x96xbf16> to vector<32x96xbf16>
    %129 = arith.truncf %126 : vector<8x32xf32> to vector<8x32xbf16>
    %cst_66 = arith.constant dense<0.000000e+00> : vector<8x96xf32>
    %130 = tpu.matmul %129, %128, %cst_66 {dimension_numbers = #tpu.dot_dimension_numbers<[1], [0], [0], [1], [0, 0, 1, 1], [], []>} : vector<8x32xbf16>, vector<32x96xbf16>, vector<8x96xf32> -> vector<8x96xf32>
    %c1_67 = arith.constant 1 : index
    %c0_68 = arith.constant 0 : index
    %c0_69 = arith.constant 0 : index
    %131 = vector.load %arg6[%c1_67, %c0_68, %c0_69] : memref<2x1x96xf32, #tpu.memory_space<vmem>>, vector<1x1x96xf32>
    %132 = vector.shape_cast %131 : vector<1x1x96xf32> to vector<1x96xf32>
    %133 = vector.broadcast %132 : vector<1x96xf32> to vector<8x96xf32>
    %134 = arith.addf %130, %133 : vector<8x96xf32>
    %135 = vector.extract_strided_slice %134 {offsets = [0, 0], sizes = [8, 32], strides = [1, 1]} : vector<8x96xf32> to vector<8x32xf32>
    %cst_70 = arith.constant 0.353553385 : f32
    %136 = vector.broadcast %cst_70 : f32 to vector<8x32xf32>
    %137 = arith.mulf %135, %136 : vector<8x32xf32>
    %138 = vector.shape_cast %137 : vector<8x32xf32> to vector<8x4x8xf32>
    %139 = vector.extract_strided_slice %134 {offsets = [0, 32], sizes = [8, 32], strides = [1, 1]} : vector<8x96xf32> to vector<8x32xf32>
    %140 = vector.shape_cast %139 : vector<8x32xf32> to vector<8x4x8xf32>
    %141 = vector.extract_strided_slice %134 {offsets = [0, 64], sizes = [8, 32], strides = [1, 1]} : vector<8x96xf32> to vector<8x32xf32>
    %142 = vector.shape_cast %141 : vector<8x32xf32> to vector<8x4x8xf32>
    %143 = tpu.transpose %138, [1, 0, 2] : vector<8x4x8xf32> -> vector<4x8x8xf32>
    %144 = arith.truncf %143 : vector<4x8x8xf32> to vector<4x8x8xbf16>
    %145 = tpu.transpose %140, [1, 0, 2] : vector<8x4x8xf32> -> vector<4x8x8xf32>
    %146 = arith.truncf %145 : vector<4x8x8xf32> to vector<4x8x8xbf16>
    %147 = tpu.transpose %142, [1, 0, 2] : vector<8x4x8xf32> -> vector<4x8x8xf32>
    %148 = arith.truncf %147 : vector<4x8x8xf32> to vector<4x8x8xbf16>
    "tpu.trace_start"() <{level = 10 : i32, message = "hqd,hkd->hqk"}> : () -> ()
    %cst_71 = arith.constant dense<0.000000e+00> : vector<4x8x8xf32>
    %149 = tpu.matmul %144, %146, %cst_71 {dimension_numbers = #tpu.dot_dimension_numbers<[2], [2], [1], [1], [0, 0, 0, 1, 1, 1], [0], [0]>} : vector<4x8x8xbf16>, vector<4x8x8xbf16>, vector<4x8x8xf32> -> vector<4x8x8xf32>
    "tpu.trace_stop"() : () -> ()
    %cst_72 = arith.constant dense<0xFF800000> : vector<4x8xf32>
    %150 = vector.multi_reduction <maximumf>, %149, %cst_72 [2] : vector<4x8x8xf32> to vector<4x8xf32>
    %151 = vector.shape_cast %150 : vector<4x8xf32> to vector<4x8x1xf32>
    %152 = vector.broadcast %151 : vector<4x8x1xf32> to vector<4x8x8xf32>
    %153 = arith.subf %149, %152 : vector<4x8x8xf32>
    %154 = math.exp %153 : vector<4x8x8xf32>
    %cst_73 = arith.constant dense<0.000000e+00> : vector<4x8xf32>
    %155 = vector.multi_reduction <add>, %154, %cst_73 [2] : vector<4x8x8xf32> to vector<4x8xf32>
    %156 = vector.shape_cast %155 : vector<4x8xf32> to vector<4x8x1xf32>
    %157 = tpu.reciprocal %156 {approx = true} : vector<4x8x1xf32> -> vector<4x8x1xf32>
    %158 = vector.broadcast %157 : vector<4x8x1xf32> to vector<4x8x8xf32>
    %159 = arith.mulf %154, %158 : vector<4x8x8xf32>
    %160 = arith.truncf %159 : vector<4x8x8xf32> to vector<4x8x8xbf16>
    "tpu.trace_start"() <{level = 10 : i32, message = "hqk,hkd->hqd"}> : () -> ()
    %cst_74 = arith.constant dense<0.000000e+00> : vector<4x8x8xf32>
    %161 = tpu.matmul %160, %148, %cst_74 {dimension_numbers = #tpu.dot_dimension_numbers<[2], [1], [1], [2], [0, 0, 0, 1, 1, 2], [0], [0]>} : vector<4x8x8xbf16>, vector<4x8x8xbf16>, vector<4x8x8xf32> -> vector<4x8x8xf32>
    "tpu.trace_stop"() : () -> ()
    %162 = tpu.transpose %161, [1, 0, 2] : vector<4x8x8xf32> -> vector<8x4x8xf32>
    %163 = vector.shape_cast %162 : vector<8x4x8xf32> to vector<8x32xf32>
    %c1_75 = arith.constant 1 : index
    %c0_76 = arith.constant 0 : index
    %c0_77 = arith.constant 0 : index
    %164 = vector.load %arg7[%c1_75, %c0_76, %c0_77] : memref<2x32x32xbf16, #tpu.memory_space<vmem>>, vector<1x32x32xbf16>
    %165 = vector.shape_cast %164 : vector<1x32x32xbf16> to vector<32x32xbf16>
    %166 = arith.truncf %163 : vector<8x32xf32> to vector<8x32xbf16>
    %cst_78 = arith.constant dense<0.000000e+00> : vector<8x32xf32>
    %167 = tpu.matmul %166, %165, %cst_78 {dimension_numbers = #tpu.dot_dimension_numbers<[1], [0], [0], [1], [0, 0, 1, 1], [], []>} : vector<8x32xbf16>, vector<32x32xbf16>, vector<8x32xf32> -> vector<8x32xf32>
    %c1_79 = arith.constant 1 : index
    %c0_80 = arith.constant 0 : index
    %c0_81 = arith.constant 0 : index
    %168 = vector.load %arg8[%c1_79, %c0_80, %c0_81] : memref<2x1x32xf32, #tpu.memory_space<vmem>>, vector<1x1x32xf32>
    %169 = vector.shape_cast %168 : vector<1x1x32xf32> to vector<1x32xf32>
    %170 = vector.broadcast %169 : vector<1x32xf32> to vector<8x32xf32>
    %171 = arith.addf %167, %170 : vector<8x32xf32>
    %172 = arith.addf %126, %171 : vector<8x32xf32>
    %c1_82 = arith.constant 1 : index
    %c0_83 = arith.constant 0 : index
    %c0_84 = arith.constant 0 : index
    %173 = vector.load %arg9[%c1_82, %c0_83, %c0_84] : memref<2x1x32xf32, #tpu.memory_space<vmem>>, vector<1x1x32xf32>
    %174 = vector.shape_cast %173 : vector<1x1x32xf32> to vector<1x32xf32>
    %c1_85 = arith.constant 1 : index
    %c0_86 = arith.constant 0 : index
    %c0_87 = arith.constant 0 : index
    %175 = vector.load %arg10[%c1_85, %c0_86, %c0_87] : memref<2x1x32xf32, #tpu.memory_space<vmem>>, vector<1x1x32xf32>
    %176 = vector.shape_cast %175 : vector<1x1x32xf32> to vector<1x32xf32>
    %cst_88 = arith.constant dense<0.000000e+00> : vector<8xf32>
    %177 = vector.multi_reduction <add>, %172, %cst_88 [1] : vector<8x32xf32> to vector<8xf32>
    %178 = vector.shape_cast %177 : vector<8xf32> to vector<8x1xf32>
    %cst_89 = arith.constant 3.200000e+01 : f32
    %179 = vector.broadcast %cst_89 : f32 to vector<8x1xf32>
    %180 = arith.divf %178, %179 : vector<8x1xf32>
    %181 = vector.broadcast %180 : vector<8x1xf32> to vector<8x32xf32>
    %182 = arith.subf %172, %181 : vector<8x32xf32>
    %183 = arith.mulf %182, %182 : vector<8x32xf32>
    %cst_90 = arith.constant dense<0.000000e+00> : vector<8xf32>
    %184 = vector.multi_reduction <add>, %183, %cst_90 [1] : vector<8x32xf32> to vector<8xf32>
    %185 = vector.shape_cast %184 : vector<8xf32> to vector<8x1xf32>
    %cst_91 = arith.constant 3.200000e+01 : f32
    %186 = vector.broadcast %cst_91 : f32 to vector<8x1xf32>
    %187 = arith.divf %185, %186 : vector<8x1xf32>
    %188 = vector.broadcast %180 : vector<8x1xf32> to vector<8x32xf32>
    %189 = arith.subf %172, %188 : vector<8x32xf32>
    %cst_92 = arith.constant 9.99999974E-6 : f32
    %190 = vector.broadcast %cst_92 : f32 to vector<8x1xf32>
    %191 = arith.addf %187, %190 : vector<8x1xf32>
    %192 = math.rsqrt %191 : vector<8x1xf32>
    %193 = vector.broadcast %192 : vector<8x1xf32> to vector<8x32xf32>
    %194 = arith.mulf %189, %193 : vector<8x32xf32>
    %195 = vector.broadcast %174 : vector<1x32xf32> to vector<8x32xf32>
    %196 = arith.mulf %194, %195 : vector<8x32xf32>
    %197 = vector.broadcast %176 : vector<1x32xf32> to vector<8x32xf32>
    %198 = arith.addf %196, %197 : vector<8x32xf32>
    %c1_93 = arith.constant 1 : index
    %c0_94 = arith.constant 0 : index
    %c0_95 = arith.constant 0 : index
    %199 = vector.load %arg11[%c1_93, %c0_94, %c0_95] : memref<2x32x128xbf16, #tpu.memory_space<vmem>>, vector<1x32x128xbf16>
    %200 = vector.shape_cast %199 : vector<1x32x128xbf16> to vector<32x128xbf16>
    %201 = arith.truncf %198 : vector<8x32xf32> to vector<8x32xbf16>
    %cst_96 = arith.constant dense<0.000000e+00> : vector<8x128xf32>
    %202 = tpu.matmul %201, %200, %cst_96 {dimension_numbers = #tpu.dot_dimension_numbers<[1], [0], [0], [1], [0, 0, 1, 1], [], []>} : vector<8x32xbf16>, vector<32x128xbf16>, vector<8x128xf32> -> vector<8x128xf32>
    %c1_97 = arith.constant 1 : index
    %c0_98 = arith.constant 0 : index
    %c0_99 = arith.constant 0 : index
    %203 = vector.load %arg12[%c1_97, %c0_98, %c0_99] : memref<2x1x128xf32, #tpu.memory_space<vmem>>, vector<1x1x128xf32>
    %204 = vector.shape_cast %203 : vector<1x1x128xf32> to vector<1x128xf32>
    %205 = vector.broadcast %204 : vector<1x128xf32> to vector<8x128xf32>
    %206 = arith.addf %202, %205 : vector<8x128xf32>
    %cst_100 = arith.constant 0.000000e+00 : f32
    %207 = vector.broadcast %cst_100 : f32 to vector<8x128xf32>
    %208 = arith.maximumf %206, %207 : vector<8x128xf32>
    %c1_101 = arith.constant 1 : index
    %c0_102 = arith.constant 0 : index
    %c0_103 = arith.constant 0 : index
    %209 = vector.load %arg13[%c1_101, %c0_102, %c0_103] : memref<2x128x32xbf16, #tpu.memory_space<vmem>>, vector<1x128x32xbf16>
    %210 = vector.shape_cast %209 : vector<1x128x32xbf16> to vector<128x32xbf16>
    %211 = arith.truncf %208 : vector<8x128xf32> to vector<8x128xbf16>
    %cst_104 = arith.constant dense<0.000000e+00> : vector<8x32xf32>
    %212 = tpu.matmul %211, %210, %cst_104 {dimension_numbers = #tpu.dot_dimension_numbers<[1], [0], [0], [1], [0, 0, 1, 1], [], []>} : vector<8x128xbf16>, vector<128x32xbf16>, vector<8x32xf32> -> vector<8x32xf32>
    %c1_105 = arith.constant 1 : index
    %c0_106 = arith.constant 0 : index
    %c0_107 = arith.constant 0 : index
    %213 = vector.load %arg14[%c1_105, %c0_106, %c0_107] : memref<2x1x32xf32, #tpu.memory_space<vmem>>, vector<1x1x32xf32>
    %214 = vector.shape_cast %213 : vector<1x1x32xf32> to vector<1x32xf32>
    %215 = vector.broadcast %214 : vector<1x32xf32> to vector<8x32xf32>
    %216 = arith.addf %212, %215 : vector<8x32xf32>
    %217 = arith.addf %198, %216 : vector<8x32xf32>
    %c1_108 = arith.constant 1 : index
    %c0_109 = arith.constant 0 : index
    %c0_110 = arith.constant 0 : index
    %218 = vector.load %arg15[%c1_108, %c0_109, %c0_110] : memref<2x1x32xf32, #tpu.memory_space<vmem>>, vector<1x1x32xf32>
    %219 = vector.shape_cast %218 : vector<1x1x32xf32> to vector<1x32xf32>
    %c1_111 = arith.constant 1 : index
    %c0_112 = arith.constant 0 : index
    %c0_113 = arith.constant 0 : index
    %220 = vector.load %arg16[%c1_111, %c0_112, %c0_113] : memref<2x1x32xf32, #tpu.memory_space<vmem>>, vector<1x1x32xf32>
    %221 = vector.shape_cast %220 : vector<1x1x32xf32> to vector<1x32xf32>
    %cst_114 = arith.constant dense<0.000000e+00> : vector<8xf32>
    %222 = vector.multi_reduction <add>, %217, %cst_114 [1] : vector<8x32xf32> to vector<8xf32>
    %223 = vector.shape_cast %222 : vector<8xf32> to vector<8x1xf32>
    %cst_115 = arith.constant 3.200000e+01 : f32
    %224 = vector.broadcast %cst_115 : f32 to vector<8x1xf32>
    %225 = arith.divf %223, %224 : vector<8x1xf32>
    %226 = vector.broadcast %225 : vector<8x1xf32> to vector<8x32xf32>
    %227 = arith.subf %217, %226 : vector<8x32xf32>
    %228 = arith.mulf %227, %227 : vector<8x32xf32>
    %cst_116 = arith.constant dense<0.000000e+00> : vector<8xf32>
    %229 = vector.multi_reduction <add>, %228, %cst_116 [1] : vector<8x32xf32> to vector<8xf32>
    %230 = vector.shape_cast %229 : vector<8xf32> to vector<8x1xf32>
    %cst_117 = arith.constant 3.200000e+01 : f32
    %231 = vector.broadcast %cst_117 : f32 to vector<8x1xf32>
    %232 = arith.divf %230, %231 : vector<8x1xf32>
    %233 = vector.broadcast %225 : vector<8x1xf32> to vector<8x32xf32>
    %234 = arith.subf %217, %233 : vector<8x32xf32>
    %cst_118 = arith.constant 9.99999974E-6 : f32
    %235 = vector.broadcast %cst_118 : f32 to vector<8x1xf32>
    %236 = arith.addf %232, %235 : vector<8x1xf32>
    %237 = math.rsqrt %236 : vector<8x1xf32>
    %238 = vector.broadcast %237 : vector<8x1xf32> to vector<8x32xf32>
    %239 = arith.mulf %234, %238 : vector<8x32xf32>
    %240 = vector.broadcast %219 : vector<1x32xf32> to vector<8x32xf32>
    %241 = arith.mulf %239, %240 : vector<8x32xf32>
    %242 = vector.broadcast %221 : vector<1x32xf32> to vector<8x32xf32>
    %243 = arith.addf %241, %242 : vector<8x32xf32>
    %cst_119 = arith.constant dense<0.000000e+00> : vector<32xf32>
    %244 = vector.multi_reduction <add>, %243, %cst_119 [0] : vector<8x32xf32> to vector<32xf32>
    %245 = vector.shape_cast %244 : vector<32xf32> to vector<1x32xf32>
    %cst_120 = arith.constant 8.000000e+00 : f32
    %246 = vector.broadcast %cst_120 : f32 to vector<1x32xf32>
    %247 = arith.divf %245, %246 : vector<1x32xf32>
    %c0_121 = arith.constant 0 : index
    %c0_122 = arith.constant 0 : index
    %248 = vector.load %arg17[%c0_121, %c0_122] : memref<1x32xf32, #tpu.memory_space<vmem>>, vector<1x32xf32>
    %c0_123 = arith.constant 0 : index
    %c0_124 = arith.constant 0 : index
    %249 = vector.load %arg18[%c0_123, %c0_124] : memref<1x32xf32, #tpu.memory_space<vmem>>, vector<1x32xf32>
    %cst_125 = arith.constant dense<0.000000e+00> : vector<1xf32>
    %250 = vector.multi_reduction <add>, %247, %cst_125 [1] : vector<1x32xf32> to vector<1xf32>
    %251 = vector.shape_cast %250 : vector<1xf32> to vector<1x1xf32>
    %cst_126 = arith.constant 3.200000e+01 : f32
    %252 = vector.broadcast %cst_126 : f32 to vector<1x1xf32>
    %253 = arith.divf %251, %252 : vector<1x1xf32>
    %254 = vector.broadcast %253 : vector<1x1xf32> to vector<1x32xf32>
    %255 = arith.subf %247, %254 : vector<1x32xf32>
    %256 = arith.mulf %255, %255 : vector<1x32xf32>
    %cst_127 = arith.constant dense<0.000000e+00> : vector<1xf32>
    %257 = vector.multi_reduction <add>, %256, %cst_127 [1] : vector<1x32xf32> to vector<1xf32>
    %258 = vector.shape_cast %257 : vector<1xf32> to vector<1x1xf32>
    %cst_128 = arith.constant 3.200000e+01 : f32
    %259 = vector.broadcast %cst_128 : f32 to vector<1x1xf32>
    %260 = arith.divf %258, %259 : vector<1x1xf32>
    %261 = vector.broadcast %253 : vector<1x1xf32> to vector<1x32xf32>
    %262 = arith.subf %247, %261 : vector<1x32xf32>
    %cst_129 = arith.constant 9.99999974E-6 : f32
    %263 = vector.broadcast %cst_129 : f32 to vector<1x1xf32>
    %264 = arith.addf %260, %263 : vector<1x1xf32>
    %265 = math.rsqrt %264 : vector<1x1xf32>
    %266 = vector.broadcast %265 : vector<1x1xf32> to vector<1x32xf32>
    %267 = arith.mulf %262, %266 : vector<1x32xf32>
    %268 = arith.mulf %267, %248 : vector<1x32xf32>
    %269 = arith.addf %268, %249 : vector<1x32xf32>
    %c0_130 = arith.constant 0 : index
    %c0_131 = arith.constant 0 : index
    %270 = vector.load %arg19[%c0_130, %c0_131] : memref<32x16xbf16, #tpu.memory_space<vmem>>, vector<32x16xbf16>
    %271 = arith.truncf %269 : vector<1x32xf32> to vector<1x32xbf16>
    %cst_132 = arith.constant dense<0.000000e+00> : vector<1x16xf32>
    %272 = tpu.matmul %271, %270, %cst_132 {dimension_numbers = #tpu.dot_dimension_numbers<[1], [0], [0], [1], [0, 0, 1, 1], [], []>} : vector<1x32xbf16>, vector<32x16xbf16>, vector<1x16xf32> -> vector<1x16xf32>
    %c0_133 = arith.constant 0 : index
    %c0_134 = arith.constant 0 : index
    %273 = vector.load %arg20[%c0_133, %c0_134] : memref<1x16xf32, #tpu.memory_space<vmem>>, vector<1x16xf32>
    %274 = arith.addf %272, %273 : vector<1x16xf32>
    %cst_135 = arith.constant 0.000000e+00 : f32
    %275 = vector.broadcast %cst_135 : f32 to vector<1x16xf32>
    %276 = arith.maximumf %274, %275 : vector<1x16xf32>
    %c0_136 = arith.constant 0 : index
    %c0_137 = arith.constant 0 : index
    %277 = vector.load %arg21[%c0_136, %c0_137] : memref<16x128xbf16, #tpu.memory_space<vmem>>, vector<16x128xbf16>
    %278 = arith.truncf %276 : vector<1x16xf32> to vector<1x16xbf16>
    %cst_138 = arith.constant dense<0.000000e+00> : vector<1x128xf32>
    %279 = tpu.matmul %278, %277, %cst_138 {dimension_numbers = #tpu.dot_dimension_numbers<[1], [0], [0], [1], [0, 0, 1, 1], [], []>} : vector<1x16xbf16>, vector<16x128xbf16>, vector<1x128xf32> -> vector<1x128xf32>
    %c0_139 = arith.constant 0 : index
    %c0_140 = arith.constant 0 : index
    %280 = vector.load %arg22[%c0_139, %c0_140] : memref<1x128xf32, #tpu.memory_space<vmem>>, vector<1x128xf32>
    %281 = arith.addf %279, %280 : vector<1x128xf32>
    %c0_141 = arith.constant 0 : index
    %c0_142 = arith.constant 0 : index
    %c0_143 = arith.constant 0 : index
    %282 = vector.load %arg23[%c0_141, %c0_142, %c0_143] : memref<1x1x128xf32, #tpu.memory_space<vmem>>, vector<1x1x128xf32>
    %283 = vector.shape_cast %282 : vector<1x1x128xf32> to vector<1x128xf32>
    %284 = vector.shape_cast %281 : vector<1x128xf32> to vector<1x1x128xf32>
    tpu.vector_store %arg23[%c0_141, %c0_142, %c0_143], %284 {strides = array<i32>} : memref<1x1x128xf32, #tpu.memory_space<vmem>>, vector<1x1x128xf32>,
    return
  }
  func.func @transform_0(%arg0: i32) -> (i32, i32, i32) {
    %c0_i32 = arith.constant 0 : i32
    %c0_i32_0 = arith.constant 0 : i32
    %c0_i32_1 = arith.constant 0 : i32
    return %arg0, %c0_i32, %c0_i32_0 : i32, i32, i32
  }
  func.func @transform_1(%arg0: i32) -> (i32, i32) {
    %c0_i32 = arith.constant 0 : i32
    %c0_i32_0 = arith.constant 0 : i32
    %c0_i32_1 = arith.constant 0 : i32
    return %c0_i32, %c0_i32_0 : i32, i32
  }
  func.func @transform_2(%arg0: i32) -> (i32, i32) {
    %c0_i32 = arith.constant 0 : i32
    %c0_i32_0 = arith.constant 0 : i32
    %c0_i32_1 = arith.constant 0 : i32
    return %c0_i32, %c0_i32_0 : i32, i32
  }
  func.func @transform_3(%arg0: i32) -> (i32, i32) {
    %c0_i32 = arith.constant 0 : i32
    %c0_i32_0 = arith.constant 0 : i32
    %c0_i32_1 = arith.constant 0 : i32
    return %c0_i32, %c0_i32_0 : i32, i32
  }
  func.func @transform_4(%arg0: i32) -> (i32, i32, i32) {
    %c0_i32 = arith.constant 0 : i32
    %c0_i32_0 = arith.constant 0 : i32
    %c0_i32_1 = arith.constant 0 : i32
    %c0_i32_2 = arith.constant 0 : i32
    return %c0_i32, %c0_i32_0, %c0_i32_1 : i32, i32, i32
  }
  func.func @transform_5(%arg0: i32) -> (i32, i32, i32) {
    %c0_i32 = arith.constant 0 : i32
    %c0_i32_0 = arith.constant 0 : i32
    %c0_i32_1 = arith.constant 0 : i32
    %c0_i32_2 = arith.constant 0 : i32
    return %c0_i32, %c0_i32_0, %c0_i32_1 : i32, i32, i32
  }
  func.func @transform_6(%arg0: i32) -> (i32, i32, i32) {
    %c0_i32 = arith.constant 0 : i32
    %c0_i32_0 = arith.constant 0 : i32
    %c0_i32_1 = arith.constant 0 : i32
    %c0_i32_2 = arith.constant 0 : i32
    return %c0_i32, %c0_i32_0, %c0_i32_1 : i32, i32, i32
  }
  func.func @transform_7(%arg0: i32) -> (i32, i32, i32) {
    %c0_i32 = arith.constant 0 : i32
    %c0_i32_0 = arith.constant 0 : i32
    %c0_i32_1 = arith.constant 0 : i32
    %c0_i32_2 = arith.constant 0 : i32
    return %c0_i32, %c0_i32_0, %c0_i32_1 : i32, i32, i32
  }
  func.func @transform_8(%arg0: i32) -> (i32, i32, i32) {
    %c0_i32 = arith.constant 0 : i32
    %c0_i32_0 = arith.constant 0 : i32
    %c0_i32_1 = arith.constant 0 : i32
    %c0_i32_2 = arith.constant 0 : i32
    return %c0_i32, %c0_i32_0, %c0_i32_1 : i32, i32, i32
  }
  func.func @transform_9(%arg0: i32) -> (i32, i32, i32) {
    %c0_i32 = arith.constant 0 : i32
    %c0_i32_0 = arith.constant 0 : i32
    %c0_i32_1 = arith.constant 0 : i32
    %c0_i32_2 = arith.constant 0 : i32
    return %c0_i32, %c0_i32_0, %c0_i32_1 : i32, i32, i32
  }
  func.func @transform_10(%arg0: i32) -> (i32, i32, i32) {
    %c0_i32 = arith.constant 0 : i32
    %c0_i32_0 = arith.constant 0 : i32
    %c0_i32_1 = arith.constant 0 : i32
    %c0_i32_2 = arith.constant 0 : i32
    return %c0_i32, %c0_i32_0, %c0_i32_1 : i32, i32, i32
  }
  func.func @transform_11(%arg0: i32) -> (i32, i32, i32) {
    %c0_i32 = arith.constant 0 : i32
    %c0_i32_0 = arith.constant 0 : i32
    %c0_i32_1 = arith.constant 0 : i32
    %c0_i32_2 = arith.constant 0 : i32
    return %c0_i32, %c0_i32_0, %c0_i32_1 : i32, i32, i32
  }
  func.func @transform_12(%arg0: i32) -> (i32, i32, i32) {
    %c0_i32 = arith.constant 0 : i32
    %c0_i32_0 = arith.constant 0 : i32
    %c0_i32_1 = arith.constant 0 : i32
    %c0_i32_2 = arith.constant 0 : i32
    return %c0_i32, %c0_i32_0, %c0_i32_1 : i32, i32, i32
  }
  func.func @transform_13(%arg0: i32) -> (i32, i32, i32) {
    %c0_i32 = arith.constant 0 : i32
    %c0_i32_0 = arith.constant 0 : i32
    %c0_i32_1 = arith.constant 0 : i32
    %c0_i32_2 = arith.constant 0 : i32
    return %c0_i32, %c0_i32_0, %c0_i32_1 : i32, i32, i32
  }
  func.func @transform_14(%arg0: i32) -> (i32, i32, i32) {
    %c0_i32 = arith.constant 0 : i32
    %c0_i32_0 = arith.constant 0 : i32
    %c0_i32_1 = arith.constant 0 : i32
    %c0_i32_2 = arith.constant 0 : i32
    return %c0_i32, %c0_i32_0, %c0_i32_1 : i32, i32, i32
  }
  func.func @transform_15(%arg0: i32) -> (i32, i32, i32) {
    %c0_i32 = arith.constant 0 : i32
    %c0_i32_0 = arith.constant 0 : i32
    %c0_i32_1 = arith.constant 0 : i32
    %c0_i32_2 = arith.constant 0 : i32
    return %c0_i32, %c0_i32_0, %c0_i32_1 : i32, i32, i32
  }
  func.func @transform_16(%arg0: i32) -> (i32, i32) {
    %c0_i32 = arith.constant 0 : i32
    %c0_i32_0 = arith.constant 0 : i32
    %c0_i32_1 = arith.constant 0 : i32
    return %c0_i32, %c0_i32_0 : i32, i32
  }
  func.func @transform_17(%arg0: i32) -> (i32, i32) {
    %c0_i32 = arith.constant 0 : i32
    %c0_i32_0 = arith.constant 0 : i32
    %c0_i32_1 = arith.constant 0 : i32
    return %c0_i32, %c0_i32_0 : i32, i32
  }
  func.func @transform_18(%arg0: i32) -> (i32, i32) {
    %c0_i32 = arith.constant 0 : i32
    %c0_i32_0 = arith.constant 0 : i32
    %c0_i32_1 = arith.constant 0 : i32
    return %c0_i32, %c0_i32_0 : i32, i32
  }
  func.func @transform_19(%arg0: i32) -> (i32, i32) {
    %c0_i32 = arith.constant 0 : i32
    %c0_i32_0 = arith.constant 0 : i32
    %c0_i32_1 = arith.constant 0 : i32
    return %c0_i32, %c0_i32_0 : i32, i32
  }
  func.func @transform_20(%arg0: i32) -> (i32, i32) {
    %c0_i32 = arith.constant 0 : i32
    %c0_i32_0 = arith.constant 0 : i32
    %c0_i32_1 = arith.constant 0 : i32
    return %c0_i32, %c0_i32_0 : i32, i32
  }
  func.func @transform_21(%arg0: i32) -> (i32, i32) {
    %c0_i32 = arith.constant 0 : i32
    %c0_i32_0 = arith.constant 0 : i32
    %c0_i32_1 = arith.constant 0 : i32
    return %c0_i32, %c0_i32_0 : i32, i32
  }
  func.func @transform_22(%arg0: i32) -> (i32, i32, i32) {
    %c0_i32 = arith.constant 0 : i32
    %c0_i32_0 = arith.constant 0 : i32
    %c0_i32_1 = arith.constant 0 : i32
    return %arg0, %c0_i32, %c0_i32_0 : i32, i32, i32
  }
}

</mosaic_0001>

<bundles_post_ra>
// kernel: transformer_forward.1
= control target key start
LH: loop header
LB: loop body
LE: loop exit
PB: predicated region body
PF: predicated region fallthrough
CT: control target
= control target key end

     0   :  { %s7034_s0 = inlined_call_operand.hbm [shape: f32[2,8,16], index: 0, kind: input, shape index: {}]   ;;  %s7035_s1 = inlined_call_operand.hbm [shape: f32[8,32], index: 1, kind: input, shape index: {}]   ;;  %s7036_s2 = inlined_call_operand.hbm [shape: bf16[16,32], index: 2, kind: input, shape index: {}]   ;;  %s7037_s3 = inlined_call_operand.hbm [shape: f32[1,32], index: 3, kind: input, shape index: {}]   ;;  %s7038_s4 = inlined_call_operand.hbm [shape: bf16[2,32,96], index: 4, kind: input, shape index: {}]   ;;  %s7039_s5 = inlined_call_operand.hbm [shape: f32[2,1,96], index: 5, kind: input, shape index: {}]   ;;  %s7040_s6 = inlined_call_operand.hbm [shape: bf16[2,32,32], index: 6, kind: input, shape index: {}]   ;;  %s7041_s7 = inlined_call_operand.hbm [shape: f32[2,1,32], index: 7, kind: input, shape index: {}]   ;;  %s7042_s8 = inlined_call_operand.hbm [shape: f32[2,1,32], index: 8, kind: input, shape index: {}]   ;;  %s7043_s9 = inlined_call_operand.hbm [shape: f32[2,1,32], index: 9, kind: input, shape index: {}]   ;;  %s7044_s10 = inlined_call_operand.hbm [shape: bf16[2,32,128], index: 10, kind: input, shape index: {}]   ;;  %s7045_s11 = inlined_call_operand.hbm [shape: f32[2,1,128], index: 11, kind: input, shape index: {}]   ;;  %s7046_s12 = inlined_call_operand.hbm [shape: bf16[2,128,32], index: 12, kind: input, shape index: {}]   ;;  %s7047_s13 = inlined_call_operand.hbm [shape: f32[2,1,32], index: 13, kind: input, shape index: {}]   ;;  %s7048_s14 = inlined_call_operand.hbm [shape: f32[2,1,32], index: 14, kind: input, shape index: {}]   ;;  %s7049_s15 = inlined_call_operand.hbm [shape: f32[2,1,32], index: 15, kind: input, shape index: {}]   ;;  %s7050_s16 = inlined_call_operand.hbm [shape: f32[1,32], index: 16, kind: input, shape index: {}]   ;;  %s7051_s17 = inlined_call_operand.hbm [shape: f32[1,32], index: 17, kind: input, shape index: {}]   ;;  %s7052_s18 = inlined_call_operand.hbm [shape: bf16[32,16], index: 18, kind: input, shape index: {}]   ;;  %s7053_s19 = inlined_call_operand.hbm [shape: f32[1,16], index: 19, kind: input, shape index: {}]   ;;  %s7054_s20 = inlined_call_operand.hbm [shape: bf16[16,128], index: 20, kind: input, shape index: {}]   ;;  %s7055_s21 = inlined_call_operand.hbm [shape: f32[1,128], index: 21, kind: input, shape index: {}]   ;;  %s7056_s22 = inlined_call_operand.hbm [shape: f32[2,1,128], index: 22, kind: output, shape index: {}]  }
   0x1   :  { %7088 = sst [smem:[#allocation57_spill]] %s7034_s0 }
   0x2   :  { %7089 = sst [smem:[#allocation58_spill]] %s7035_s1 }
   0x3   :  { %7090 = sst [smem:[#allocation59_spill]] %s7036_s2 }
   0x4   :  { %7091 = sst [smem:[#allocation60_spill]] %s7037_s3 }
   0x5   :  { %7092 = sst [smem:[#allocation61_spill]] %s7038_s4 }
   0x6   :  { %7093 = sst [smem:[#allocation62_spill]] %s7039_s5 }
   0x7   :  { %7094 = sst [smem:[#allocation63_spill]] %s7040_s6 }
   0x8   :  { %7095 = sst [smem:[#allocation64_spill]] %s7041_s7 }
   0x9   :  { %7096 = sst [smem:[#allocation65_spill]] %s7043_s9 }
   0xa   :  { %7097 = sst [smem:[#allocation66_spill]] %s7052_s18 }
   0xb   :  { %7098 = sst [smem:[#allocation67_spill]] %s7054_s20 }
   0xc   :  { %7099 = sst [smem:[#allocation68_spill]] %s7055_s21 }
   0xd   :  { %7100 = sst [smem:[#allocation69_spill]] %s7056_s22 }
   0xe   :  { %27 = vsyncpa [#allocation3], 0 }
   0xf   :  { %29 = vsyncpa [#allocation3 + $0x1], 0 }
  0x10   :  { %30 = vsyncpa [#allocation6], 0 }
  0x11   :  { %31 = vsyncpa [#allocation9], 0 }
  0x12   :  { %32 = vsyncpa [#allocation12], 0 }
  0x13   :  { %33 = vsyncpa [#allocation15], 0 }
  0x14   :  { %34 = vsyncpa [#allocation18], 0 }
  0x15   :  { %35 = vsyncpa [#allocation21], 0 }
  0x16   :  { %36 = vsyncpa [#allocation24], 0 }
  0x17   :  { %37 = vsyncpa [#allocation27], 0 }
  0x18   :  { %38 = vsyncpa [#allocation30], 0 }
  0x19   :  { %39 = vsyncpa [#allocation33], 0 }
  0x1a   :  { %40 = vsyncpa [#allocation36], 0 }
  0x1b   :  { %41 = vsyncpa [#allocation4], 0 }
  0x1c   :  { %43 = vsyncpa [#allocation4 + $0x1], 0  ;;  %s5951_s3 = smov 0   ;;  %s5953_s28 = smov 0  }
  0x1d   :  { %s5955_s29 = smov 0   ;;  %s5957_s30 = smov 0  }
  0x1e LB: > { %7101 = sst [smem:[#allocation51_spill]] %s5783_s3  ;;  %s5797_s4 = smov [#allocation5]   ;;  %s5795_s30 = sphi %s5957_s30, %s7168_s30   ;;  %s5791_s29 = sphi %s5955_s29, %s7167_s29   ;;  %s5787_s28 = sphi %s5953_s28, %s7166_s28   ;;  %s5783_s3 = sphi %s5951_s3, %s7165_s3  }
  0x1f   : > { %7102 = sst [smem:[#allocation52_spill]] %s5787_s28  ;;  %s560_s0 = sshll.u32 %s5797_s4, 4  ;;  %s561_s0 = int_to_ptr.vmem [resolvable:$true] %s560_s0 }
  0x20   : > { %7103 = sst [smem:[#allocation53_spill]] %s5791_s29  ;;  %s5972_s23 = sadd.s32 4294967295, %s5795_s30  }
  0x21   : > { %7104 = sst [smem:[#allocation54_spill]] %s5795_s30  ;;  %p4300_p0 = scmp.ge.s32.totalorder %s5795_s30, 1 }
  0x22   : > { %7105 = sst [smem:[#allocation55_spill]] %s5972_s23  ;;  %p7069_p1 = scmp.eq.s32.totalorder %s5972_s23, 0 }
  0x23   : > { %p547_p2 = scmp.lt.s32.totalorder %s5795_s30, 3  ;;  %s5798_s5 = smov [#allocation8]  }
  0x24   : > { %s584_s24 = sshll.u32 %s5798_s5, 4  ;;  %s5799_s6 = smov [#allocation11]   ;;  %s5984_s24 = int_to_ptr.vmem [resolvable:$true] %s584_s24 }
  0x25   : > { %p5977_p3 = pnand %p4300_p0, %p547_p2  ;;  %s607_s25 = sshll.u32 %s5799_s6, 4  ;;  %s5992_s25 = int_to_ptr.vmem [resolvable:$true] %s607_s25 }
  0x26   : > { %s7109_s4 = sld [smem:[#allocation58_spill]] }
  0x27   : > { %s7106_s1 = scalar_select %p5977_p3, 1, 0 }
  0x28   : > { %p4808_p5 = pneg %p5977_p3 }
  0x29   : > { %7107 = sst [smem:[#allocation56_spill]] %s7106_s1 }
  0x2a   : > { %p5988_p6 = pnand %p4808_p5, %p7069_p1 }
  0x2c   : > { %s5067_s22 = scalar_lea.hbm %s7109_s4, 128  ;;  %p6002_p8 = pneg %p5988_p6 }
  0x2d   : > { %p5068_p7 = scmp.ne.s32.totalorder %s7109_s4, %s5067_s22  ;;  %p5074_p11 = scmp.lt.u32.totalorder %s5067_s22, %s7109_s4 }
  0x2f   : > { %p5070_p9 = pnand %p6002_p8, %p5068_p7 }
  0x31   : > { %p5071_p10 = pneg %p5070_p9 }
  0x33   : > { %p5076_p12 = pnand %p5074_p11, %p5071_p10 }
  0x35   : > { %5079 = shalt.err (!%p5076_p12)
}
  0x36   : > { %s5080_s2 = scalar_lea.vmem %s561_s0, 128  ;;  %p5088_p5 = scmp.lt.s32.totalorder %s561_s0, %s561_s0 }
  0x37   : > { %p5081_p13 = scmp.ne.s32.totalorder %s561_s0, %s5080_s2  ;;  %p5089_p4 = scmp.lt.s32.totalorder %s5080_s2, %s5080_s2 }
  0x39   : > { %p5083_p0 = pnand %p5081_p13, %p6002_p8  ;;  %p5090_p1 = por %p5089_p4, %p5088_p5 }
  0x3b   : > { %p5084_p2 = pneg %p5083_p0 }
  0x3d   : > { %p5091_p3 = pnand %p5090_p1, %p5084_p2 }
  0x3f   : > { %5094 = shalt.err (!%p5091_p3)
}
  0x40   : > { %4811 = dma.hbm_to_vmem [thread:$0]  (!%p5988_p6), %s7109_s4, 128, %s561_s0, [#allocation6]  }
  0x41   : > { %s7111_s27 = sld [smem:[#allocation60_spill]] }
  0x47   : > { %s5095_s6 = scalar_lea.hbm %s7111_s27, 16 }
  0x48   : > { %p5096_p7 = scmp.ne.s32.totalorder %s7111_s27, %s5095_s6  ;;  %p5102_p1 = scmp.lt.u32.totalorder %s5095_s6, %s7111_s27 }
  0x4a   : > { %p5098_p9 = pnand %p5096_p7, %p6002_p8 }
  0x4c   : > { %p5099_p4 = pneg %p5098_p9 }
  0x4e   : > { %p5104_p3 = pnand %p5102_p1, %p5099_p4 }
  0x50   : > { %5107 = shalt.err (!%p5104_p3)
}
  0x51   : > { %s5108_s0 = scalar_lea.vmem %s5984_s24, 16  ;;  %s5115_s28 = scalar_lea.vmem %s5984_s24, 32 }
  0x52   : > { %p5109_p10 = scmp.ne.s32.totalorder %s5984_s24, %s5108_s0  ;;  %p5116_p13 = scmp.lt.s32.totalorder %s5984_s24, %s5984_s24 }
  0x53   : > { %p5117_p0 = scmp.lt.s32.totalorder %s5115_s28, %s5108_s0 }
  0x54   : > { %p5111_p11 = pnand %p5109_p10, %p6002_p8 }
  0x55   : > { %p5118_p2 = por %p5117_p0, %p5116_p13 }
  0x56   : > { %p5112_p12 = pneg %p5111_p11 }
  0x58   : > { %p5119_p5 = pnand %p5118_p2, %p5112_p12 }
  0x5a   : > { %5122 = shalt.err (!%p5119_p5)
}
  0x5b   : > { %4817 = dma.hbm_to_vmem [thread:$0]  (!%p5988_p6), %s7111_s27, 16, %s5984_s24, [#allocation9]  }
  0x5c   : > { %s7112_s22 = sld [smem:[#allocation62_spill]] }
  0x62   : > { %s5123_s23 = scalar_lea.hbm %s7112_s22, 32 }
  0x63   : > { %p5124_p7 = scmp.ne.s32.totalorder %s7112_s22, %s5123_s23  ;;  %p5130_p1 = scmp.lt.u32.totalorder %s5123_s23, %s7112_s22 }
  0x65   : > { %p5126_p9 = pnand %p5124_p7, %p6002_p8 }
  0x67   : > { %p5127_p4 = pneg %p5126_p9 }
  0x69   : > { %p5132_p3 = pnand %p5130_p1, %p5127_p4 }
  0x6b   : > { %5135 = shalt.err (!%p5132_p3)
}
  0x6c   : > { %s5136_s24 = scalar_lea.vmem %s5992_s25, 32  ;;  %p5144_p13 = scmp.lt.s32.totalorder %s5992_s25, %s5992_s25 }
  0x6d   : > { %p5137_p10 = scmp.ne.s32.totalorder %s5992_s25, %s5136_s24  ;;  %p5145_p0 = scmp.lt.s32.totalorder %s5136_s24, %s5136_s24 }
  0x6f   : > { %p5139_p11 = pnand %p5137_p10, %p6002_p8  ;;  %p5146_p2 = por %p5145_p0, %p5144_p13 }
  0x71   : > { %p5140_p12 = pneg %p5139_p11 }
  0x73   : > { %p5147_p5 = pnand %p5146_p2, %p5140_p12 }
  0x75   : > { %5150 = shalt.err (!%p5147_p5)
}
  0x76   : > { %s7080_s29 = smov 16   ;;  %s7082_s30 = smov 1  }
  0x77   : > { %4823 = dma.hbm_to_vmem [thread:$0]  (!%p5988_p6), %s7112_s22, 32, %s5992_s25, [#allocation12], %s7080_s29, %s7080_s29, %s7082_s30  }
  0x78   : > { %s5802_s23 = smov [#allocation14]   ;;  %s5803_s2 = smov [#allocation17]  }
  0x79   : > { %s633_s6 = sshll.u32 %s5802_s23, 4  ;;  %s659_s0 = sshll.u32 %s5803_s2, 4  ;;  %s634_s6 = int_to_ptr.vmem [resolvable:$true] %s633_s6  ;;  %s660_s0 = int_to_ptr.vmem [resolvable:$true] %s659_s0 }
  0x7a   : > { %s7113_s7 = sld [smem:[#allocation64_spill]] }
  0x80   : > { %s5151_s4 = scalar_lea.hbm %s7113_s7, 32 }
  0x81   : > { %p5152_p7 = scmp.ne.s32.totalorder %s7113_s7, %s5151_s4  ;;  %p5158_p1 = scmp.lt.u32.totalorder %s5151_s4, %s7113_s7 }
  0x83   : > { %p5154_p9 = pnand %p5152_p7, %p6002_p8 }
  0x85   : > { %p5155_p4 = pneg %p5154_p9 }
  0x87   : > { %p5160_p3 = pnand %p5158_p1, %p5155_p4 }
  0x89   : > { %5163 = shalt.err (!%p5160_p3)
}
  0x8a   : > { %s5164_s25 = scalar_lea.vmem %s634_s6, 32  ;;  %p5172_p13 = scmp.lt.s32.totalorder %s634_s6, %s634_s6 }
  0x8b   : > { %p5165_p10 = scmp.ne.s32.totalorder %s634_s6, %s5164_s25  ;;  %p5173_p0 = scmp.lt.s32.totalorder %s5164_s25, %s5164_s25 }
  0x8d   : > { %p5167_p11 = pnand %p5165_p10, %p6002_p8  ;;  %p5174_p2 = por %p5173_p0, %p5172_p13 }
  0x8f   : > { %p5168_p12 = pneg %p5167_p11 }
  0x91   : > { %p5175_p5 = pnand %p5174_p2, %p5168_p12 }
  0x93   : > { %5178 = shalt.err (!%p5175_p5)
}
  0x94   : > { %4829 = dma.hbm_to_vmem [thread:$0]  (!%p5988_p6), %s7113_s7, 32, %s634_s6, [#allocation15], %s7080_s29, %s7080_s29, %s7082_s30  }
  0x95   : > { %s7114_s9 = sld [smem:[#allocation65_spill]] }
  0x9b   : > { %s5179_s27 = scalar_lea.hbm %s7114_s9, 32 }
  0x9c   : > { %p5180_p7 = scmp.ne.s32.totalorder %s7114_s9, %s5179_s27  ;;  %p5186_p1 = scmp.lt.u32.totalorder %s5179_s27, %s7114_s9 }
  0x9e   : > { %p5182_p9 = pnand %p5180_p7, %p6002_p8 }
  0xa0   : > { %p5183_p4 = pneg %p5182_p9 }
  0xa2   : > { %p5188_p3 = pnand %p5186_p1, %p5183_p4 }
  0xa4   : > { %5191 = shalt.err (!%p5188_p3)
}
  0xa5   : > { %s5192_s28 = scalar_lea.vmem %s660_s0, 32  ;;  %p5200_p13 = scmp.lt.s32.totalorder %s660_s0, %s660_s0 }
  0xa6   : > { %p5193_p10 = scmp.ne.s32.totalorder %s660_s0, %s5192_s28  ;;  %p5201_p0 = scmp.lt.s32.totalorder %s5192_s28, %s5192_s28 }
  0xa8   : > { %p5195_p11 = pnand %p5193_p10, %p6002_p8  ;;  %p5202_p2 = por %p5201_p0, %p5200_p13 }
  0xaa   : > { %p5196_p12 = pneg %p5195_p11 }
  0xac   : > { %p5203_p5 = pnand %p5202_p2, %p5196_p12 }
  0xae   : > { %5206 = shalt.err (!%p5203_p5)
}
  0xaf   : > { %4835 = dma.hbm_to_vmem [thread:$0]  (!%p5988_p6), %s7114_s9, 32, %s660_s0, [#allocation18], %s7080_s29, %s7080_s29, %s7082_s30  }
  0xb0   : > { %s5804_s25 = smov [#allocation20]   ;;  %s5805_s20 = smov [#allocation23]  }
  0xb1   : > { %s685_s18 = sshll.u32 %s5804_s25, 4  ;;  %s711_s21 = sshll.u32 %s5805_s20, 4  ;;  %s686_s18 = int_to_ptr.vmem [resolvable:$true] %s685_s18  ;;  %s712_s21 = int_to_ptr.vmem [resolvable:$true] %s711_s21 }
  0xb2   : > { %s5207_s3 = scalar_lea.hbm %s7045_s11, 32 }
  0xb3   : > { %p5208_p7 = scmp.ne.s32.totalorder %s7045_s11, %s5207_s3  ;;  %p5214_p1 = scmp.lt.u32.totalorder %s5207_s3, %s7045_s11 }
  0xb5   : > { %p5210_p9 = pnand %p5208_p7, %p6002_p8 }
  0xb7   : > { %p5211_p4 = pneg %p5210_p9 }
  0xb9   : > { %p5216_p3 = pnand %p5214_p1, %p5211_p4 }
  0xbb   : > { %5219 = shalt.err (!%p5216_p3)
}
  0xbc   : > { %s5220_s0 = scalar_lea.vmem %s686_s18, 32  ;;  %p5228_p13 = scmp.lt.s32.totalorder %s686_s18, %s686_s18 }
  0xbd   : > { %p5221_p10 = scmp.ne.s32.totalorder %s686_s18, %s5220_s0  ;;  %p5229_p0 = scmp.lt.s32.totalorder %s5220_s0, %s5220_s0 }
  0xbf   : > { %p5223_p11 = pnand %p5221_p10, %p6002_p8  ;;  %p5230_p2 = por %p5229_p0, %p5228_p13 }
  0xc1   : > { %p5224_p12 = pneg %p5223_p11 }
  0xc3   : > { %p5231_p5 = pnand %p5230_p2, %p5224_p12 }
  0xc5   : > { %5234 = shalt.err (!%p5231_p5)
}
  0xc6   : > { %4841 = dma.hbm_to_vmem [thread:$0]  (!%p5988_p6), %s7045_s11, 32, %s686_s18, [#allocation21], %s7080_s29, %s7080_s29, %s7082_s30  }
  0xc7   : > { %s5235_s4 = scalar_lea.hbm %s7047_s13, 32 }
  0xc8   : > { %p5236_p7 = scmp.ne.s32.totalorder %s7047_s13, %s5235_s4  ;;  %p5242_p1 = scmp.lt.u32.totalorder %s5235_s4, %s7047_s13 }
  0xca   : > { %p5238_p9 = pnand %p5236_p7, %p6002_p8 }
  0xcc   : > { %p5239_p4 = pneg %p5238_p9 }
  0xce   : > { %p5244_p3 = pnand %p5242_p1, %p5239_p4 }
  0xd0   : > { %5247 = shalt.err (!%p5244_p3)
}
  0xd1   : > { %s5248_s2 = scalar_lea.vmem %s712_s21, 32  ;;  %p5256_p13 = scmp.lt.s32.totalorder %s712_s21, %s712_s21 }
  0xd2   : > { %p5249_p10 = scmp.ne.s32.totalorder %s712_s21, %s5248_s2  ;;  %p5257_p0 = scmp.lt.s32.totalorder %s5248_s2, %s5248_s2 }
  0xd4   : > { %p5251_p11 = pnand %p5249_p10, %p6002_p8  ;;  %p5258_p2 = por %p5257_p0, %p5256_p13 }
  0xd6   : > { %p5252_p12 = pneg %p5251_p11 }
  0xd8   : > { %p5259_p5 = pnand %p5258_p2, %p5252_p12 }
  0xda   : > { %5262 = shalt.err (!%p5259_p5)
}
  0xdb   : > { %4847 = dma.hbm_to_vmem [thread:$0]  (!%p5988_p6), %s7047_s13, 32, %s712_s21, [#allocation24], %s7080_s29, %s7080_s29, %s7082_s30  }
  0xdc   : > { %s5806_s0 = smov [#allocation26]   ;;  %s5807_s24 = smov [#allocation29]  }
  0xdd   : > { %s737_s6 = sshll.u32 %s5806_s0, 4  ;;  %s762_s25 = sshll.u32 %s5807_s24, 4  ;;  %s738_s6 = int_to_ptr.vmem [resolvable:$true] %s737_s6  ;;  %s763_s25 = int_to_ptr.vmem [resolvable:$true] %s762_s25 }
  0xde   : > { %s5263_s27 = scalar_lea.hbm %s7049_s15, 32 }
  0xdf   : > { %p5264_p7 = scmp.ne.s32.totalorder %s7049_s15, %s5263_s27  ;;  %p5270_p1 = scmp.lt.u32.totalorder %s5263_s27, %s7049_s15 }
  0xe1   : > { %p5266_p9 = pnand %p5264_p7, %p6002_p8 }
  0xe3   : > { %p5267_p4 = pneg %p5266_p9 }
  0xe5   : > { %p5272_p3 = pnand %p5270_p1, %p5267_p4 }
  0xe7   : > { %5275 = shalt.err (!%p5272_p3)
}
  0xe8   : > { %s5276_s21 = scalar_lea.vmem %s738_s6, 32  ;;  %p5284_p13 = scmp.lt.s32.totalorder %s738_s6, %s738_s6 }
  0xe9   : > { %p5277_p10 = scmp.ne.s32.totalorder %s738_s6, %s5276_s21  ;;  %p5285_p0 = scmp.lt.s32.totalorder %s5276_s21, %s5276_s21 }
  0xeb   : > { %p5279_p11 = pnand %p5277_p10, %p6002_p8  ;;  %p5286_p2 = por %p5285_p0, %p5284_p13 }
  0xed   : > { %p5280_p12 = pneg %p5279_p11 }
  0xef   : > { %p5287_p5 = pnand %p5286_p2, %p5280_p12 }
  0xf1   : > { %5290 = shalt.err (!%p5287_p5)
}
  0xf2   : > { %4853 = dma.hbm_to_vmem [thread:$0]  (!%p5988_p6), %s7049_s15, 32, %s738_s6, [#allocation27], %s7080_s29, %s7080_s29, %s7082_s30  }
  0xf3   : > { %s5291_s20 = scalar_lea.hbm %s7051_s17, 16 }
  0xf4   : > { %p5292_p7 = scmp.ne.s32.totalorder %s7051_s17, %s5291_s20  ;;  %p5298_p1 = scmp.lt.u32.totalorder %s5291_s20, %s7051_s17 }
  0xf6   : > { %p5294_p9 = pnand %p5292_p7, %p6002_p8 }
  0xf8   : > { %p5295_p4 = pneg %p5294_p9 }
  0xfa   : > { %p5300_p3 = pnand %p5298_p1, %p5295_p4 }
  0xfc   : > { %5303 = shalt.err (!%p5300_p3)
}
  0xfd   : > { %s5304_s23 = scalar_lea.vmem %s763_s25, 16  ;;  %s5311_s6 = scalar_lea.vmem %s763_s25, 32 }
  0xfe   : > { %p5305_p10 = scmp.ne.s32.totalorder %s763_s25, %s5304_s23  ;;  %p5312_p13 = scmp.lt.s32.totalorder %s763_s25, %s763_s25 }
  0xff   : > { %p5313_p0 = scmp.lt.s32.totalorder %s5311_s6, %s5304_s23 }
 0x100   : > { %p5307_p11 = pnand %p5305_p10, %p6002_p8 }
 0x101   : > { %p5314_p2 = por %p5313_p0, %p5312_p13 }
 0x102   : > { %p5308_p12 = pneg %p5307_p11 }
 0x104   : > { %p5315_p5 = pnand %p5314_p2, %p5308_p12 }
 0x106   : > { %5318 = shalt.err (!%p5315_p5)
}
 0x107   : > { %4859 = dma.hbm_to_vmem [thread:$0]  (!%p5988_p6), %s7051_s17, 16, %s763_s25, [#allocation30]  }
 0x108   : > { %s5808_s18 = smov [#allocation32]   ;;  %s5809_s0 = smov [#allocation7]  }
 0x109   : > { %s786_s28 = sshll.u32 %s5808_s18, 4  ;;  %s570_s24 = sshll.u32 %s5809_s0, 4  ;;  %s787_s28 = int_to_ptr.vmem [resolvable:$true] %s786_s28  ;;  %s571_s24 = int_to_ptr.vmem [resolvable:$true] %s570_s24 }
 0x10a   : > { %s5319_s27 = scalar_lea.hbm %s7053_s19, 16 }
 0x10b   : > { %p5320_p7 = scmp.ne.s32.totalorder %s7053_s19, %s5319_s27  ;;  %p5326_p1 = scmp.lt.u32.totalorder %s5319_s27, %s7053_s19 }
 0x10d   : > { %p5322_p9 = pnand %p5320_p7, %p6002_p8 }
 0x10f   : > { %p5323_p4 = pneg %p5322_p9 }
 0x111   : > { %p5328_p3 = pnand %p5326_p1, %p5323_p4 }
 0x113   : > { %5331 = shalt.err (!%p5328_p3)
}
 0x114   : > { %s5332_s25 = scalar_lea.vmem %s787_s28, 16  ;;  %s5339_s2 = scalar_lea.vmem %s787_s28, 32 }
 0x115   : > { %p5333_p10 = scmp.ne.s32.totalorder %s787_s28, %s5332_s25  ;;  %p5340_p13 = scmp.lt.s32.totalorder %s787_s28, %s787_s28 }
 0x116   : > { %p5341_p0 = scmp.lt.s32.totalorder %s5339_s2, %s5332_s25 }
 0x117   : > { %p5335_p11 = pnand %p5333_p10, %p6002_p8 }
 0x118   : > { %p5342_p2 = por %p5341_p0, %p5340_p13 }
 0x119   : > { %p5336_p12 = pneg %p5335_p11 }
 0x11b   : > { %p5343_p5 = pnand %p5342_p2, %p5336_p12 }
 0x11d   : > { %5346 = shalt.err (!%p5343_p5)
}
 0x11e   : > { %4865 = dma.hbm_to_vmem [thread:$0]  (!%p5988_p6), %s7053_s19, 16, %s787_s28, [#allocation33]  }
 0x11f   : > { %s7115_s4 = sld [smem:[#allocation59_spill]] }
 0x125   : > { %s5347_s27 = scalar_lea.hbm %s7115_s4, 128 }
 0x126   : > { %p5348_p7 = scmp.ne.s32.totalorder %s7115_s4, %s5347_s27  ;;  %p5354_p1 = scmp.lt.u32.totalorder %s5347_s27, %s7115_s4 }
 0x128   : > { %p5350_p9 = pnand %p5348_p7, %p6002_p8 }
 0x12a   : > { %p5351_p4 = pneg %p5350_p9 }
 0x12c   : > { %p5356_p3 = pnand %p5354_p1, %p5351_p4 }
 0x12e   : > { %5359 = shalt.err (!%p5356_p3)
}
 0x12f   : > { %s5360_s25 = scalar_lea.vmem %s571_s24, 128  ;;  %p5368_p13 = scmp.lt.s32.totalorder %s571_s24, %s571_s24 }
 0x130   : > { %p5361_p10 = scmp.ne.s32.totalorder %s571_s24, %s5360_s25  ;;  %p5369_p0 = scmp.lt.s32.totalorder %s5360_s25, %s5360_s25 }
 0x132   : > { %p5363_p11 = pnand %p5361_p10, %p6002_p8  ;;  %p5370_p2 = por %p5369_p0, %p5368_p13 }
 0x134   : > { %p5364_p12 = pneg %p5363_p11 }
 0x136   : > { %p5371_p5 = pnand %p5370_p2, %p5364_p12 }
 0x138   : > { %5374 = shalt.err (!%p5371_p5)
}
 0x139   : > { %s5810_s28 = smov 64   ;;  %s5811_s2 = smov 4  }
 0x13a   : > { %4814 = dma.hbm_to_vmem [thread:$0]  (!%p5988_p6), %s7115_s4, 128, %s571_s24, [#allocation6], %s5810_s28, %s5810_s28, %s5811_s2  }
 0x13b   : > { %s5812_s0 = smov [#allocation10]   ;;  %s5813_s27 = smov [#allocation13]  }
 0x13c   : > { %s594_s20 = sshll.u32 %s5812_s0, 4  ;;  %s620_s3 = sshll.u32 %s5813_s27, 4  ;;  %s595_s20 = int_to_ptr.vmem [resolvable:$true] %s594_s20  ;;  %s621_s3 = int_to_ptr.vmem [resolvable:$true] %s620_s3 }
 0x13d   : > { %s7116_s6 = sld [smem:[#allocation61_spill]] }
 0x143   : > { %s5375_s25 = scalar_lea.hbm %s7116_s6, 512 }
 0x144   : > { %p5376_p7 = scmp.ne.s32.totalorder %s7116_s6, %s5375_s25  ;;  %p5382_p1 = scmp.lt.u32.totalorder %s5375_s25, %s7116_s6 }
 0x146   : > { %p5378_p9 = pnand %p5376_p7, %p6002_p8 }
 0x148   : > { %p5379_p4 = pneg %p5378_p9 }
 0x14a   : > { %p5384_p3 = pnand %p5382_p1, %p5379_p4 }
 0x14c   : > { %5387 = shalt.err (!%p5384_p3)
}
 0x14d   : > { %s5388_s24 = scalar_lea.vmem %s595_s20, 512  ;;  %p5396_p13 = scmp.lt.s32.totalorder %s595_s20, %s595_s20 }
 0x14e   : > { %p5389_p10 = scmp.ne.s32.totalorder %s595_s20, %s5388_s24  ;;  %p5397_p0 = scmp.lt.s32.totalorder %s5388_s24, %s5388_s24 }
 0x150   : > { %p5391_p11 = pnand %p5389_p10, %p6002_p8  ;;  %p5398_p2 = por %p5397_p0, %p5396_p13 }
 0x152   : > { %p5392_p12 = pneg %p5391_p11 }
 0x154   : > { %p5399_p5 = pnand %p5398_p2, %p5392_p12 }
 0x156   : > { %5402 = shalt.err (!%p5399_p5)
}
 0x157   : > { %4820 = dma.hbm_to_vmem [thread:$0]  (!%p5988_p6), %s7116_s6, 512, %s595_s20, [#allocation9], %s5810_s28, %s5810_s28, %s5811_s2  }
 0x158   : > { %s7117_s21 = sld [smem:[#allocation63_spill]] }
 0x15e   : > { %s5403_s18 = scalar_lea.hbm %s7117_s21, 512 }
 0x15f   : > { %p5404_p7 = scmp.ne.s32.totalorder %s7117_s21, %s5403_s18  ;;  %p5410_p1 = scmp.lt.u32.totalorder %s5403_s18, %s7117_s21 }
 0x161   : > { %p5406_p9 = pnand %p5404_p7, %p6002_p8 }
 0x163   : > { %p5407_p4 = pneg %p5406_p9 }
 0x165   : > { %p5412_p3 = pnand %p5410_p1, %p5407_p4 }
 0x167   : > { %5415 = shalt.err (!%p5412_p3)
}
 0x168   : > { %s5416_s25 = scalar_lea.vmem %s621_s3, 512  ;;  %p5424_p13 = scmp.lt.s32.totalorder %s621_s3, %s621_s3 }
 0x169   : > { %p5417_p10 = scmp.ne.s32.totalorder %s621_s3, %s5416_s25  ;;  %p5425_p0 = scmp.lt.s32.totalorder %s5416_s25, %s5416_s25 }
 0x16b   : > { %p5419_p11 = pnand %p5417_p10, %p6002_p8  ;;  %p5426_p2 = por %p5425_p0, %p5424_p13 }
 0x16d   : > { %p5420_p12 = pneg %p5419_p11 }
 0x16f   : > { %p5427_p5 = pnand %p5426_p2, %p5420_p12 }
 0x171   : > { %5430 = shalt.err (!%p5427_p5)
}
 0x172   : > { %4826 = dma.hbm_to_vmem [thread:$0]  (!%p5988_p6), %s7117_s21, 512, %s621_s3, [#allocation12], %s5810_s28, %s5810_s28, %s5811_s2  }
 0x173   : > { %s5814_s7 = smov [#allocation16]   ;;  %s5815_s29 = smov [#allocation19]  }
 0x174   : > { %s646_s9 = sshll.u32 %s5814_s7, 4  ;;  %s672_s30 = sshll.u32 %s5815_s29, 4  ;;  %s647_s9 = int_to_ptr.vmem [resolvable:$true] %s646_s9  ;;  %s673_s30 = int_to_ptr.vmem [resolvable:$true] %s672_s30 }
 0x175   : > { %s5431_s27 = scalar_lea.hbm %s7042_s8, 32 }
 0x176   : > { %p5432_p7 = scmp.ne.s32.totalorder %s7042_s8, %s5431_s27  ;;  %p5438_p1 = scmp.lt.u32.totalorder %s5431_s27, %s7042_s8 }
 0x178   : > { %p5434_p9 = pnand %p5432_p7, %p6002_p8 }
 0x17a   : > { %p5435_p4 = pneg %p5434_p9 }
 0x17c   : > { %p5440_p3 = pnand %p5438_p1, %p5435_p4 }
 0x17e   : > { %5443 = shalt.err (!%p5440_p3)
}
 0x17f   : > { %s5444_s3 = scalar_lea.vmem %s647_s9, 32  ;;  %p5452_p13 = scmp.lt.s32.totalorder %s647_s9, %s647_s9 }
 0x180   : > { %p5445_p10 = scmp.ne.s32.totalorder %s647_s9, %s5444_s3  ;;  %p5453_p0 = scmp.lt.s32.totalorder %s5444_s3, %s5444_s3 }
 0x182   : > { %p5447_p11 = pnand %p5445_p10, %p6002_p8  ;;  %p5454_p2 = por %p5453_p0, %p5452_p13 }
 0x184   : > { %p5448_p12 = pneg %p5447_p11 }
 0x186   : > { %p5455_p5 = pnand %p5454_p2, %p5448_p12 }
 0x188   : > { %5458 = shalt.err (!%p5455_p5)
}
 0x189   : > { %s7118_s24 = smov 1   ;;  %s7119_s7 = smov 16  }
 0x18a   : > { %4832 = dma.hbm_to_vmem [thread:$0]  (!%p5988_p6), %s7042_s8, 32, %s647_s9, [#allocation15], %s7119_s7, %s7119_s7, %s7118_s24  }
 0x18b   : > { %s5459_s1 = scalar_lea.hbm %s7044_s10, 512 }
 0x18c   : > { %p5460_p7 = scmp.ne.s32.totalorder %s7044_s10, %s5459_s1  ;;  %p5466_p1 = scmp.lt.u32.totalorder %s5459_s1, %s7044_s10 }
 0x18e   : > { %p5462_p9 = pnand %p5460_p7, %p6002_p8 }
 0x190   : > { %p5463_p4 = pneg %p5462_p9 }
 0x192   : > { %p5468_p3 = pnand %p5466_p1, %p5463_p4 }
 0x194   : > { %5471 = shalt.err (!%p5468_p3)
}
 0x195   : > { %s5472_s29 = scalar_lea.vmem %s673_s30, 512  ;;  %p5480_p13 = scmp.lt.s32.totalorder %s673_s30, %s673_s30 }
 0x196   : > { %p5473_p10 = scmp.ne.s32.totalorder %s673_s30, %s5472_s29  ;;  %p5481_p0 = scmp.lt.s32.totalorder %s5472_s29, %s5472_s29 }
 0x198   : > { %p5475_p11 = pnand %p5473_p10, %p6002_p8  ;;  %p5482_p2 = por %p5481_p0, %p5480_p13 }
 0x19a   : > { %p5476_p12 = pneg %p5475_p11 }
 0x19c   : > { %p5483_p5 = pnand %p5482_p2, %p5476_p12 }
 0x19e   : > { %5486 = shalt.err (!%p5483_p5)
}
 0x19f   : > { %4838 = dma.hbm_to_vmem [thread:$0]  (!%p5988_p6), %s7044_s10, 512, %s673_s30, [#allocation18], %s5810_s28, %s5810_s28, %s5811_s2  }
 0x1a0   : > { %s5816_s0 = smov [#allocation22]   ;;  %s5817_s1 = smov [#allocation25]  }
 0x1a1   : > { %s698_s27 = sshll.u32 %s5816_s0, 4  ;;  %s724_s23 = sshll.u32 %s5817_s1, 4  ;;  %s699_s27 = int_to_ptr.vmem [resolvable:$true] %s698_s27  ;;  %s725_s23 = int_to_ptr.vmem [resolvable:$true] %s724_s23 }
 0x1a2   : > { %s5487_s3 = scalar_lea.hbm %s7046_s12, 2048 }
 0x1a3   : > { %p5488_p7 = scmp.ne.s32.totalorder %s7046_s12, %s5487_s3  ;;  %p5494_p1 = scmp.lt.u32.totalorder %s5487_s3, %s7046_s12 }
 0x1a5   : > { %p5490_p9 = pnand %p5488_p7, %p6002_p8 }
 0x1a7   : > { %p5491_p4 = pneg %p5490_p9 }
 0x1a9   : > { %p5496_p3 = pnand %p5494_p1, %p5491_p4 }
 0x1ab   : > { %5499 = shalt.err (!%p5496_p3)
}
 0x1ac   : > { %s5500_s30 = scalar_lea.vmem %s699_s27, 2048  ;;  %p5508_p13 = scmp.lt.s32.totalorder %s699_s27, %s699_s27 }
 0x1ad   : > { %p5501_p10 = scmp.ne.s32.totalorder %s699_s27, %s5500_s30  ;;  %p5509_p0 = scmp.lt.s32.totalorder %s5500_s30, %s5500_s30 }
 0x1af   : > { %p5503_p11 = pnand %p5501_p10, %p6002_p8  ;;  %p5510_p2 = por %p5509_p0, %p5508_p13 }
 0x1b1   : > { %p5504_p12 = pneg %p5503_p11 }
 0x1b3   : > { %p5511_p5 = pnand %p5510_p2, %p5504_p12 }
 0x1b5   : > { %5514 = shalt.err (!%p5511_p5)
}
 0x1b6   : > { %4844 = dma.hbm_to_vmem [thread:$0]  (!%p5988_p6), %s7046_s12, 2048, %s699_s27, [#allocation21], %s5810_s28, %s5810_s28, %s5811_s2  }
 0x1b7   : > { %s5515_s1 = scalar_lea.hbm %s7048_s14, 32 }
 0x1b8   : > { %p5516_p7 = scmp.ne.s32.totalorder %s7048_s14, %s5515_s1  ;;  %p5522_p1 = scmp.lt.u32.totalorder %s5515_s1, %s7048_s14 }
 0x1ba   : > { %p5518_p9 = pnand %p5516_p7, %p6002_p8 }
 0x1bc   : > { %p5519_p4 = pneg %p5518_p9 }
 0x1be   : > { %p5524_p3 = pnand %p5522_p1, %p5519_p4 }
 0x1c0   : > { %5527 = shalt.err (!%p5524_p3)
}
 0x1c1   : > { %s5528_s9 = scalar_lea.vmem %s725_s23, 32  ;;  %p5536_p13 = scmp.lt.s32.totalorder %s725_s23, %s725_s23 }
 0x1c2   : > { %p5529_p10 = scmp.ne.s32.totalorder %s725_s23, %s5528_s9  ;;  %p5537_p0 = scmp.lt.s32.totalorder %s5528_s9, %s5528_s9 }
 0x1c4   : > { %p5531_p11 = pnand %p5529_p10, %p6002_p8  ;;  %p5538_p2 = por %p5537_p0, %p5536_p13 }
 0x1c6   : > { %p5532_p12 = pneg %p5531_p11 }
 0x1c8   : > { %p5539_p5 = pnand %p5538_p2, %p5532_p12 }
 0x1ca   : > { %5542 = shalt.err (!%p5539_p5)
}
 0x1cb   : > { %4850 = dma.hbm_to_vmem [thread:$0]  (!%p5988_p6), %s7048_s14, 32, %s725_s23, [#allocation24], %s7119_s7, %s7119_s7, %s7118_s24  }
 0x1cc   : > { %s5818_s4 = smov [#allocation28]   ;;  %s5819_s18 = smov [#allocation31]  }
 0x1cd   : > { %s751_s6 = sshll.u32 %s5818_s4, 4  ;;  %s772_s0 = sshll.u32 %s5819_s18, 4  ;;  %s752_s6 = int_to_ptr.vmem [resolvable:$true] %s751_s6  ;;  %s773_s0 = int_to_ptr.vmem [resolvable:$true] %s772_s0 }
 0x1ce   : > { %s5543_s20 = scalar_lea.hbm %s7050_s16, 16 }
 0x1cf   : > { %p5544_p7 = scmp.ne.s32.totalorder %s7050_s16, %s5543_s20  ;;  %p5550_p1 = scmp.lt.u32.totalorder %s5543_s20, %s7050_s16 }
 0x1d1   : > { %p5546_p9 = pnand %p5544_p7, %p6002_p8 }
 0x1d3   : > { %p5547_p4 = pneg %p5546_p9 }
 0x1d5   : > { %p5552_p3 = pnand %p5550_p1, %p5547_p4 }
 0x1d7   : > { %5555 = shalt.err (!%p5552_p3)
}
 0x1d8   : > { %s5556_s24 = scalar_lea.vmem %s752_s6, 16  ;;  %s5563_s7 = scalar_lea.vmem %s752_s6, 32 }
 0x1d9   : > { %p5557_p10 = scmp.ne.s32.totalorder %s752_s6, %s5556_s24  ;;  %p5564_p13 = scmp.lt.s32.totalorder %s752_s6, %s752_s6 }
 0x1da   : > { %p5565_p0 = scmp.lt.s32.totalorder %s5563_s7, %s5556_s24 }
 0x1db   : > { %p5559_p11 = pnand %p5557_p10, %p6002_p8 }
 0x1dc   : > { %p5566_p2 = por %p5565_p0, %p5564_p13 }
 0x1dd   : > { %p5560_p12 = pneg %p5559_p11 }
 0x1df   : > { %p5567_p5 = pnand %p5566_p2, %p5560_p12 }
 0x1e1   : > { %5570 = shalt.err (!%p5567_p5)
}
 0x1e2   : > { %4856 = dma.hbm_to_vmem [thread:$0]  (!%p5988_p6), %s7050_s16, 16, %s752_s6, [#allocation27]  }
 0x1e3   : > { %s7120_s1 = sld [smem:[#allocation66_spill]] }
 0x1e9   : > { %s5571_s25 = scalar_lea.hbm %s7120_s1, 256 }
 0x1ea   : > { %p5572_p7 = scmp.ne.s32.totalorder %s7120_s1, %s5571_s25  ;;  %p5578_p1 = scmp.lt.u32.totalorder %s5571_s25, %s7120_s1 }
 0x1ec   : > { %p5574_p9 = pnand %p5572_p7, %p6002_p8 }
 0x1ee   : > { %p5575_p4 = pneg %p5574_p9 }
 0x1f0   : > { %p5580_p3 = pnand %p5578_p1, %p5575_p4 }
 0x1f2   : > { %5583 = shalt.err (!%p5580_p3)
}
 0x1f3   : > { %s5584_s27 = scalar_lea.vmem %s773_s0, 256  ;;  %p5592_p13 = scmp.lt.s32.totalorder %s773_s0, %s773_s0 }
 0x1f4   : > { %p5585_p10 = scmp.ne.s32.totalorder %s773_s0, %s5584_s27  ;;  %p5593_p0 = scmp.lt.s32.totalorder %s5584_s27, %s5584_s27 }
 0x1f6   : > { %p5587_p11 = pnand %p5585_p10, %p6002_p8  ;;  %p5594_p2 = por %p5593_p0, %p5592_p13 }
 0x1f8   : > { %p5588_p12 = pneg %p5587_p11 }
 0x1fa   : > { %p5595_p5 = pnand %p5594_p2, %p5588_p12 }
 0x1fc   : > { %5598 = shalt.err (!%p5595_p5)
}
 0x1fd   : > { %4862 = dma.hbm_to_vmem [thread:$0]  (!%p5988_p6), %s7120_s1, 256, %s773_s0, [#allocation30], %s5810_s28, %s5810_s28, %s5811_s2  }
 0x1fe   : > { %s5820_s7 = smov [#allocation34]   ;;  %s5821_s30 = smov [#allocation35]  }
 0x1ff   : > { %s796_s23 = sshll.u32 %s5820_s7, 4  ;;  %s810_s4 = sshll.u32 %s5821_s30, 4  ;;  %s797_s23 = int_to_ptr.vmem [resolvable:$true] %s796_s23  ;;  %s811_s4 = int_to_ptr.vmem [resolvable:$true] %s810_s4 }
 0x200   : > { %s7121_s20 = sld [smem:[#allocation67_spill]] }
 0x206   : > { %s5599_s3 = scalar_lea.hbm %s7121_s20, 128 }
 0x207   : > { %p5600_p7 = scmp.ne.s32.totalorder %s7121_s20, %s5599_s3  ;;  %p5606_p1 = scmp.lt.u32.totalorder %s5599_s3, %s7121_s20 }
 0x209   : > { %p5602_p9 = pnand %p5600_p7, %p6002_p8 }
 0x20b   : > { %p5603_p4 = pneg %p5602_p9 }
 0x20d   : > { %p5608_p3 = pnand %p5606_p1, %p5603_p4 }
 0x20f   : > { %5611 = shalt.err (!%p5608_p3)
}
 0x210   : > { %s5612_s0 = scalar_lea.vmem %s797_s23, 128  ;;  %p5620_p13 = scmp.lt.s32.totalorder %s797_s23, %s797_s23 }
 0x211   : > { %p5613_p10 = scmp.ne.s32.totalorder %s797_s23, %s5612_s0  ;;  %p5621_p0 = scmp.lt.s32.totalorder %s5612_s0, %s5612_s0 }
 0x213   : > { %p5615_p11 = pnand %p5613_p10, %p6002_p8  ;;  %p5622_p2 = por %p5621_p0, %p5620_p13 }
 0x215   : > { %p5616_p12 = pneg %p5615_p11 }
 0x217   : > { %p5623_p5 = pnand %p5622_p2, %p5616_p12 }
 0x219   : > { %5626 = shalt.err (!%p5623_p5)
}
 0x21a   : > { %4868 = dma.hbm_to_vmem [thread:$0]  (!%p5988_p6), %s7121_s20, 128, %s797_s23, [#allocation33], %s5810_s28, %s5810_s28, %s5811_s2  }
 0x21b   : > { %s7122_s25 = sld [smem:[#allocation68_spill]] }
 0x221   : > { %s5627_s3 = scalar_lea.hbm %s7122_s25, 16 }
 0x222   : > { %p5628_p7 = scmp.ne.s32.totalorder %s7122_s25, %s5627_s3  ;;  %p5634_p1 = scmp.lt.u32.totalorder %s5627_s3, %s7122_s25 }
 0x224   : > { %p5630_p9 = pnand %p5628_p7, %p6002_p8 }
 0x226   : > { %p5631_p4 = pneg %p5630_p9 }
 0x228   : > { %p5636_p3 = pnand %p5634_p1, %p5631_p4 }
 0x22a   : > { %5639 = shalt.err (!%p5636_p3)
}
 0x22b   : > { %s5640_s0 = scalar_lea.vmem %s811_s4, 16  ;;  %s5647_s28 = scalar_lea.vmem %s811_s4, 32 }
 0x22c   : > { %p5641_p10 = scmp.ne.s32.totalorder %s811_s4, %s5640_s0  ;;  %p5648_p13 = scmp.lt.s32.totalorder %s811_s4, %s811_s4 }
 0x22d   : > { %p5649_p0 = scmp.lt.s32.totalorder %s5647_s28, %s5640_s0 }
 0x22e   : > { %p5643_p11 = pnand %p5641_p10, %p6002_p8 }
 0x22f   : > { %p5650_p2 = por %p5649_p0, %p5648_p13 }
 0x230   : > { %p5644_p12 = pneg %p5643_p11 }
 0x232   : > { %p5651_p5 = pnand %p5650_p2, %p5644_p12 }
 0x234   : > { %5654 = shalt.err (!%p5651_p5)
}
 0x235   : > { %s7123_s24 = sld [smem:[#allocation54_spill]]  ;;  %s7124_s7 = sld [smem:[#allocation53_spill]] }
 0x236   : > { %s7125_s30 = sld [smem:[#allocation52_spill]]  ;;  %s7126_s5 = sld [smem:[#allocation51_spill]] }
 0x237   : > { %s7127_s18 = sld [smem:[#allocation55_spill]] }
 0x238   : > { %4871 = dma.hbm_to_vmem [thread:$0]  (!%p5988_p6), %s7122_s25, 16, %s811_s4, [#allocation36]  }
 0x23b   : > { %s4299_s3 = sadd.s32 4294967294, %s7123_s24   ;;  %s6436_s26 = sadd.s32 1, %s7123_s24  }
 0x23c   : > { %s56_s29 = sadd.s32 1, %s7124_s7  ;;  %s53_s9 = ssub.s32 %s7123_s24, %s6436_s26 }
 0x23d   : > { %p63_p8 = scmp.ne.s32.totalorder %s7124_s7, %s7125_s30  ;;  %p54_p7 = scmp.eq.s32.totalorder %s53_s9, 0 }
 0x23e   : > { %p64_p9 = scmp.eq.s32.totalorder %s7123_s24, 0  ;;  %p69_p4 = scmp.ne.s32.totalorder %s7125_s30, %s7126_s5 }
 0x23f   : > { %p534_p1 = scmp.eq.s32.totalorder %s7127_s18, 1  ;;  %p7128_p10 = scmp.eq.s32.totalorder %s7127_s18, 0 }
 0x240   : > { %s6448_s27 = scalar_select %p54_p7, %s7124_s7, %s56_s29  }
 0x241   : > { %p65_p3 = por %p64_p9, %p63_p8  ;;  %p6452_p11 = por %p7128_p10, %p69_p4 }
 0x242   : > { %p6456_p6 = por %p534_p1, %p63_p8  ;;  %p540_p12 = scmp.eq.s32.totalorder %s4299_s3, 1 }
 0x243   : > { %p4901_p13 = scmp.lt.s32.totalorder %s7123_s24, 2  ;;  %s821_s0 = sand.u32 1, %s7124_s7  }
 0x244   : > { %s7130_s4 = scalar_select %p6456_p6, 1, 0 }
 0x245   : > { %p6462_p0 = por %p540_p12, %p69_p4  ;;  %s4323_s2 = sshll.u32 %s821_s0, 3 }
 0x246   : > { %s4324_s23 = sshll.u32 %s7123_s24, 7  ;;  %s7132_s18 = sld [smem:[#allocation57_spill]] }
 0x247   : > { %s7131_s28 = scalar_select %p6462_p0, 1, 0 }
 0x248   : > { %s825_s9 = scalar_lea.vmem [#allocation2], %s4323_s2  ;;  %p6472_p2 = pnand %p4901_p13, %p65_p3 }
 0x249   : > { %s832_s1 = sshll.u32 %s825_s9, 4  ;;  %s822_s24 = scalar_lea.sflag [#allocation3], %s821_s0  ;;  %s6476_s1 = int_to_ptr.vmem [resolvable:$true] %s832_s1 }
 0x24a   : > { %p5657_p8 = pneg %p6472_p2 }
 0x24c   : > { %s6470_s29 = scalar_lea.hbm %s7132_s18, %s4324_s23  ;;  %s5660_s30 = scalar_lea.hbm %s7132_s18, 256 }
 0x24d   : > { %s5655_s7 = scalar_lea.hbm %s6470_s29, 128  ;;  %p5661_p4 = scmp.lt.u32.totalorder %s6470_s29, %s7132_s18 }
 0x24e   : > { %p5656_p5 = scmp.ne.s32.totalorder %s6470_s29, %s5655_s7  ;;  %p5662_p1 = scmp.lt.u32.totalorder %s5660_s30, %s5655_s7 }
 0x24f   : > { %p5664_p10 = scmp.lt.u32.totalorder %s5655_s7, %s6470_s29 }
 0x250   : > { %p5658_p7 = pnand %p5657_p8, %p5656_p5  ;;  %p5663_p3 = por %p5662_p1, %p5661_p4 }
 0x252   : > { %p5659_p9 = pneg %p5658_p7  ;;  %p5665_p12 = por %p5664_p10, %p5663_p3 }
 0x254   : > { %p5666_p13 = pnand %p5665_p12, %p5659_p9 }
 0x256   : > { %5669 = shalt.err (!%p5666_p13)
}
 0x257   : > { %s5670_s0 = scalar_lea.vmem %s6476_s1, 128  ;;  %s5822_s23 = smov [#allocation2]  }
 0x258   : > { %p5671_p5 = scmp.ne.s32.totalorder %s6476_s1, %s5670_s0  ;;  %s5675_s2 = sshll.u32 %s5822_s23, 4  ;;  %s5676_s2 = int_to_ptr.vmem [resolvable:$false] %s5675_s2 }
 0x259   : > { %s5677_s5 = scalar_lea.vmem %s5676_s2, 256  ;;  %p5678_p6 = scmp.lt.s32.totalorder %s6476_s1, %s5676_s2 }
 0x25a   : > { %p5673_p7 = pnand %p5671_p5, %p5657_p8  ;;  %p5679_p4 = scmp.lt.s32.totalorder %s5677_s5, %s5670_s0 }
 0x25c   : > { %p5674_p0 = pneg %p5673_p7  ;;  %p5680_p1 = por %p5679_p4, %p5678_p6 }
 0x25e   : > { %p5681_p3 = pnand %p5680_p1, %p5674_p0 }
 0x260   : > { %5684 = shalt.err (!%p5681_p3)
}
 0x261   : > { %4875 = dma.hbm_to_vmem [thread:$0]  (!%p6472_p2), %s6470_s29, 128, %s6476_s1, %s822_s24  }
 0x262   : > { %s7134_s7 = sld [smem:[#allocation56_spill]] }
 0x268   : > { %p7135_p9 = scmp.ne.s32.totalorder %s7134_s7, 0 }
 0x269   : > { %s7136_s30 = sld [smem:[#allocation52_spill]] (!%p7135_p9) }
 0x26a   : > { %841 = sbr.rel (%p7135_p9) target bundleno = 7057 (0x1b91), region = 108 }
 0x26f   : > { %s6506_s9 = sand.u32 (!%p7135_p9), 1, %s7136_s30  }
 0x270   : > { %s4326_s23 = sshll.u32 (!%p7135_p9), %s6506_s9, 3  ;;  %s844_s2 = scalar_lea.sflag (!%p7135_p9), [#allocation3], %s6506_s9 }
 0x271   : > { %s6510_s0 = scalar_lea.vmem [#allocation2], %s4326_s23 }
 0x272   : > { %5730 = dma.done.wait (%p6452_p11), %s844_s2, 128  }
 0x273   : > { %5732 = vsyncadd (%p6452_p11), %s844_s2, 4294967168  ;;  %s7137_s3 = sld [smem:[#allocation55_spill]] }
 0x279   : > { %p7138_p6 = scmp.eq.s32.totalorder %s7137_s3, 0 }
 0x27b   : > { %5734 = dma.done.wait (%p7138_p6), [#allocation6], 256   ;;  %p7139_p0 = pmov %p7138_p6 }
 0x27d   : > { %5736 = vsyncadd (%p7139_p0), [#allocation6], 4294967040  ;;  %p7140_p2 = pmov %p7139_p0 }
 0x27e   : > { %p7141_p8 = pmov %p7139_p0 }
 0x27f   : > { %5738 = dma.done.wait (%p7140_p2), [#allocation9], 528  }
 0x280   : > { %5740 = vsyncadd (%p7141_p8), [#allocation9], 4294966768  ;;  %p7142_p10 = pmov %p7139_p0 }
 0x281   : > { %p7143_p12 = pmov %p7139_p0 }
 0x282   : > { %5742 = dma.done.wait (%p7142_p10), [#allocation12], 544  }
 0x283   : > { %5744 = vsyncadd (%p7143_p12), [#allocation12], 4294966752  ;;  %p7144_p11 = pmov %p7139_p0 }
 0x284   : > { %p7145_p13 = pmov %p7139_p0 }
 0x285   : > { %5746 = dma.done.wait (%p7144_p11), [#allocation15], 64  }
 0x286   : > { %5748 = vsyncadd (%p7145_p13), [#allocation15], 4294967232  ;;  %p7146_p5 = pmov %p7139_p0 }
 0x287   : > { %p7147_p7 = pmov %p7139_p0 }
 0x288   : > { %5750 = dma.done.wait (%p7146_p5), [#allocation18], 544  }
 0x289   : > { %5752 = vsyncadd (%p7147_p7), [#allocation18], 4294966752  ;;  %p7148_p4 = pmov %p7139_p0 }
 0x28a   : > { %p7149_p1 = pmov %p7139_p0 }
 0x28b   : > { %5754 = dma.done.wait (%p7148_p4), [#allocation21], 2080  }
 0x28c   : > { %5756 = vsyncadd (%p7149_p1), [#allocation21], 4294965216  ;;  %p7150_p3 = pmov %p7139_p0 }
 0x28d   : > { %p7151_p9 = pmov %p7139_p0 }
 0x28e   : > { %5758 = dma.done.wait (%p7150_p3), [#allocation24], 64  }
 0x28f   : > { %5760 = vsyncadd (%p7151_p9), [#allocation24], 4294967232  ;;  %p7152_p6 = pmov %p7139_p0 }
 0x291   : > { %5762 = dma.done.wait (%p7152_p6), [#allocation27], 48  }
 0x292   : > { %5764 = vsyncadd (%p7139_p0), [#allocation27], 4294967248  ;;  %p7153_p2 = pmov %p7139_p0 }
 0x293   : > { %p7154_p8 = pmov %p7139_p0 }
 0x294   : > { %5766 = dma.done.wait (%p7153_p2), [#allocation30], 272  }
 0x295   : > { %5768 = vsyncadd (%p7154_p8), [#allocation30], 4294967024  ;;  %p7155_p10 = pmov %p7139_p0 }
 0x296   : > { %p7156_p12 = pmov %p7139_p0 }
 0x297   : > { %5770 = dma.done.wait (%p7155_p10), [#allocation33], 144  }
 0x298   : > { %5772 = vsyncadd (%p7156_p12), [#allocation33], 4294967152  ;;  %p7157_p11 = pmov %p7139_p0 }
 0x299   : > { %p7158_p13 = pmov %p7139_p0 }
 0x29a   : > { %5774 = dma.done.wait (%p7157_p11), [#allocation36], 16  }
 0x29b   : > { %5776 = vsyncadd (%p7158_p13), [#allocation36], 4294967280  ;;  %v5823_v0 = vmov 0.0   ;;  %vm5824_vm0 = vmmov 0   ;;  %v4993_v1 = vld [vmem:[#allocation7] sm:$0xff]   ;;  %v992_v2 = vld [vmem:[%s6510_s0] sm:$0xff]  ;;  %v1139_v27 = vlaneseq }
 0x29c   : > { %4516 = vmatprep.subr.bf16.mxu0 %v5823_v0  ;;  %4518 = vmatprep.mubr.msk.bf16.mxu0 %vm5824_vm0, %v5823_v0  ;;  %vm1009_vm1 = vcmask 130048   ;;  %v995_v3 = vpack.c.bf16 %v992_v2, %v992_v2  ;;  %v4994_v4 = vld [vmem:[#allocation10] sm:$0xff]   ;;  %v4995_v5 = vld [vmem:[#allocation10 + $0x8] sm:$0xff]   ;;  %v4348_v6 = vld [vmem:[#allocation8] ss:$0 sm:$0xff]  ;;  %vm1079_vm2 = vcmask 261120  }
 0x29d   : > { %4536 = vmatprep.subr.bf16.mxu1 %v5823_v0  ;;  %4538 = vmatprep.mubr.msk.bf16.mxu1 %vm5824_vm0, %v5823_v0  ;;  %v1053_v8 = vld [vmem:[#allocation5] sm:$0xff]  ;;  %v4351_v15 = vld [vmem:[#allocation11] ss:$0 sm:$0xff]  ;;  %s5825_s1 = smov 104   ;;  %s5826_s6 = smov 120   ;;  %v1140_v31 = vshrl.u32 %v1139_v27, 7 }
 0x29e   : > { %4517 = vmatpush3.bf16.msra.mxu0 %v4993_v1  ;;  %s5827_s29 = smov 96   ;;  %s5828_s24 = smov 112   ;;  %v5829_v25 = vmov 1983009808   ;;  %v5830_v28 = vmov 1934713408  }
 0x29f   : > { %4522 = vmatprep.subr.bf16.mxu0 %v5823_v0  ;;  %v1137_v26 = vunpack.c.l.s4 %v5829_v25  ;;  %v1169_v29 = vunpack.c.l.s4 %v5830_v28  ;;  %vm1585_vm3 = vcmask 64512   ;;  %s5831_s5 = smov 64   ;;  %vm1821_vm4 = vcmask 1043456   ;;  %s5832_s7 = smov 16  }
 0x2a0   : > { %s5833_s30 = smov 8   ;;  %s5834_s23 = smov 24   ;;  %vm2153_vm5 = vcmask 195584  }
 0x2a1   : > { %4519 = vmatmul.mubr.msk.bf16.vlgmr.msra.gmra.mrb[0].mxu0 %vm1009_vm1, %v995_v3  ;;  %v1138_v30 = vunpack.c.0.s8 %v1137_v26  ;;  %v1170_v34 = vunpack.c.0.s8 %v1169_v29  ;;  %s4438_s2 = sshll.u32 %s7137_s3, 4  ;;  %s990_s0 = scalar_lea.vmem [#allocation37], %s6506_s9 }
 0x2a2   : > { %4526 = vmatprep.mubr.msk.bf16.mxu0 %vm5824_vm0, %v5823_v0  ;;  %4523 = vmatpush3.bf16.msra.mxu0 %v4994_v4  ;;  %p7160_p7 = scmp.ne.s32.totalorder %s7130_s4, 0 }
 0x2a3   : > { %4524 = vmatprep.subr.bf16.mxu0 %v5823_v0  ;;  %v6606_v35 = vsub.s32 %v1138_v30, %v1140_v31  ;;  %v6608_v42 = vsub.s32 %v1170_v34, %v1140_v31 }
 0x2a6   : > { %4525 = vmatpush3.bf16.msra.mxu0 %v4995_v5 }
 0x2a7   : > { %4530 = vmatprep.subr.bf16.mxu0 %v5823_v0 }
 0x374   : > { %v1047_v7 = vpop.f32.mrb[0].mxu0 }
 0x375   : > { %v1048_v9 = vadd.f32 %v4348_v6, %v1047_v7  ;;  %v4520_v10 = vpop.f32.mrb[1].mxu0 }
 0x376   : > { %v1050_v11 = vpop.f32.mrb[2].mxu0 }
 0x377   : > { %v6573_v12 = vadd.f32 %v1053_v8, %v1048_v9  ;;  %v4521_v13 = vpop.f32.mrb[3].mxu0 }
 0x379   : > { %v1059_v14 = vpack.c.bf16 %v6573_v12, %v6573_v12 }
 0x37b   : > { %4527 = vmatmul.mubr.msk.bf16.vlgmr.msra.gmra.mrb[4].mxu0 %vm1079_vm2, %v1059_v14 }
 0x37c   : > { %4532 = vmatprep.mubr.msk.bf16.mxu0 %vm5824_vm0, %v5823_v0 }
 0x44e   : > { %v1117_v16 = vpop.f32.mrb[4].mxu0 }
 0x44f   : > { %v6580_v17 = vadd.f32 %v4351_v15, %v1117_v16  ;;  %v4528_v18 = vpop.f32.mrb[5].mxu0 }
 0x450   : > { %v1120_v19 = vpop.f32.mrb[6].mxu0 }
 0x451   : > { %1207 = vrot.lane.b32.xlu1 %v6580_v17, %s5825_s1  ;;  %1203 = vrot.lane.b32.xlu0 %v6580_v17, %s5826_s6  ;;  %v4529_v20 = vpop.f32.mrb[7].mxu0  ;;  %v1123_v24 = vmul.f32 0.35355338, %v6580_v17 }
 0x455   : > { %1209 = vrot.lane.b32.xlu1 %v6580_v17, %s5827_s29  ;;  %1205 = vrot.lane.b32.xlu0 %v6580_v17, %s5828_s24 }
 0x4c3   : > { %v6590_v21 = vpop.permute.xlu0 %1203  ;;  %v6594_v22 = vpop.permute.xlu1 %1207 }
 0x4c4   : > { %1211 = vrot.lane.b32.xlu0 %v6590_v21, %s5827_s29 }
 0x4c7   : > { %v6596_v23 = vpop.permute.xlu0 %1205  ;;  %v1210_v32 = vpop.permute.xlu1 %1209 }
 0x4c8   : > { %1215 = vrot.lane.b32.xlu0 %v6594_v22, %s5827_s29  ;;  %1213 = vrot.lane.b32.xlu1 %v6596_v23, %s5827_s29 }
 0x4cc   : > { %1128 = vrot.lane.b32.xlu0 %v1123_v24, %s5828_s24  ;;  %1125 = vrot.lane.b32.xlu1 %v1123_v24, %s5826_s6 }
 0x4d0   : > { %1131 = vrot.lane.b32.xlu1 %v1123_v24, %s5825_s1 }
 0x536   : > { %v1212_v33 = vpop.permute.xlu0 %1211 }
 0x53a   : > { %v1214_v36 = vpop.permute.xlu1 %1213  ;;  %v1216_v37 = vpop.permute.xlu0 %1215 }
 0x53b   : > { %v1221_v38 = vcombine.low %v1210_v32, %v1214_v36  ;;  %v1222_v39 = vcombine.high %v1210_v32, %v1214_v36  ;;  %v1237_v40 = vcombine.low %v1212_v33, %v1216_v37  ;;  %v1238_v41 = vcombine.high %v1212_v33, %v1216_v37 }
 0x53d   : > { %v1229_v43 = vrot.slane %v1221_v38, %v6606_v35  ;;  %v1236_v44 = vrot.slane %v1222_v39, %v6606_v35  ;;  %v1245_v45 = vrot.slane %v1237_v40, %v6606_v35  ;;  %v1252_v46 = vrot.slane %v1238_v41, %v6606_v35 }
 0x53e   : > { %v1126_v47 = vpop.permute.xlu1 %1125  ;;  %v1129_v52 = vpop.permute.xlu0 %1128 }
 0x53f   : > { %v1253_v48 = vcombine.low %v1229_v43, %v1245_v45  ;;  %v1254_v49 = vcombine.high %v1229_v43, %v1245_v45  ;;  %v1269_v50 = vcombine.low %v1236_v44, %v1252_v46  ;;  %v1270_v51 = vcombine.high %v1236_v44, %v1252_v46 }
 0x540   : > { %v1134_v57 = vcombine.low %v1123_v24, %v1129_v52  ;;  %v1135_v58 = vcombine.high %v1123_v24, %v1129_v52 }
 0x541   : > { %v1261_v53 = vrot.slane %v1253_v48, %v6608_v42  ;;  %v1268_v54 = vrot.slane %v1254_v49, %v6608_v42  ;;  %v1277_v55 = vrot.slane %v1269_v50, %v6608_v42  ;;  %v1284_v56 = vrot.slane %v1270_v51, %v6608_v42 }
 0x542   : > { %v1132_v59 = vpop.permute.xlu1 %1131  ;;  %v1142_v7 = vrot.slane %v1134_v57, %v6606_v35  ;;  %v1149_v8 = vrot.slane %v1135_v58, %v6606_v35 }
 0x543   : > { %v1441_v60 = vcombine.low %v1261_v53, %v1268_v54  ;;  %v4357_v61 = vcombine.high %v1261_v53, %v1268_v54  ;;  %v1457_v62 = vcombine.low %v1277_v55, %v1284_v56  ;;  %v4358_v63 = vcombine.high %v1277_v55, %v1284_v56 }
 0x544   : > { %v1150_v1 = vcombine.low %v1126_v47, %v1132_v59  ;;  %v1151_v2 = vcombine.high %v1126_v47, %v1132_v59 }
 0x545   : > { %v1448_v3 = vrot.slane %v1441_v60, %v6606_v35  ;;  %v1456_v4 = vrot.slane %v4357_v61, %v6606_v35  ;;  %v1464_v5 = vrot.slane %v1457_v62, %v6606_v35  ;;  %v1472_v6 = vrot.slane %v4358_v63, %v6606_v35 }
 0x546   : > { %v1158_v9 = vrot.slane %v1150_v1, %v6606_v35  ;;  %v1165_v10 = vrot.slane %v1151_v2, %v6606_v35 }
 0x547   : > { %v1473_v11 = vcombine.low %v1448_v3, %v1456_v4  ;;  %v1489_v13 = vcombine.low %v1464_v5, %v1472_v6  ;;  %v1474_v14 = vcombine.high %v1448_v3, %v1456_v4  ;;  %v1490_v15 = vcombine.high %v1464_v5, %v1472_v6 }
 0x548   : > { %v1166_v16 = vcombine.low %v1142_v7, %v1158_v9  ;;  %v1167_v18 = vcombine.high %v1142_v7, %v1158_v9  ;;  %v1182_v19 = vcombine.low %v1149_v8, %v1165_v10  ;;  %v1183_v20 = vcombine.high %v1149_v8, %v1165_v10 }
 0x549   : > { %v1481_v24 = vrot.slane %v1473_v11, %v6608_v42  ;;  %v1497_v25 = vrot.slane %v1489_v13, %v6608_v42  ;;  %v1488_v32 = vrot.slane %v1474_v14, %v6608_v42  ;;  %v1504_v33 = vrot.slane %v1490_v15, %v6608_v42 }
 0x54a   : > { %v1174_v26 = vrot.slane %v1166_v16, %v6608_v42  ;;  %v1181_v27 = vrot.slane %v1167_v18, %v6608_v42  ;;  %v1190_v28 = vrot.slane %v1182_v19, %v6608_v42  ;;  %v1197_v29 = vrot.slane %v1183_v20, %v6608_v42 }
 0x54b   : > { %v1505_v30 = vcombine.low %v1481_v24, %v1497_v25  ;;  %v1506_v31 = vcombine.high %v1481_v24, %v1497_v25  ;;  %v1507_v50 = vcombine.low %v1488_v32, %v1504_v33  ;;  %v1508_v51 = vcombine.high %v1488_v32, %v1504_v33 }
 0x54c   : > { %v1369_v34 = vcombine.low %v1174_v26, %v1181_v27  ;;  %v4355_v36 = vcombine.high %v1174_v26, %v1181_v27  ;;  %v1385_v37 = vcombine.low %v1190_v28, %v1197_v29  ;;  %v4356_v38 = vcombine.high %v1190_v28, %v1197_v29 }
 0x54d   : > { %v1509_v39 = vpack.c.bf16 %v1505_v30, %v1505_v30  ;;  %v1510_v40 = vpack.c.bf16 %v1506_v31, %v1506_v31  ;;  %v1511_v58 = vpack.c.bf16 %v1507_v50, %v1507_v50  ;;  %v1512_v59 = vpack.c.bf16 %v1508_v51, %v1508_v51 }
 0x54e   : > { %v1376_v41 = vrot.slane %v1369_v34, %v6606_v35  ;;  %v1384_v43 = vrot.slane %v4355_v36, %v6606_v35  ;;  %v1392_v44 = vrot.slane %v1385_v37, %v6606_v35  ;;  %v1400_v45 = vrot.slane %v4356_v38, %v6606_v35 }
 0x54f   : > { %v1590_v46 = vsel %vm1585_vm3, %v1509_v39, 0  ;;  %v1636_v47 = vsel %vm1585_vm3, %v1510_v40, 0  ;;  %v1682_v1 = vsel %vm1585_vm3, %v1511_v58, 0  ;;  %v1728_v2 = vsel %vm1585_vm3, %v1512_v59, 0 }
 0x550   : > { %v1401_v48 = vcombine.low %v1376_v41, %v1384_v43  ;;  %v1417_v49 = vcombine.low %v1392_v44, %v1400_v45  ;;  %4531 = vmatpush3.bf16.xpose.msra.mxu0 %v1590_v46  ;;  %4537 = vmatpush3.bf16.xpose.msra.mxu1 %v1636_v47  ;;  %v1402_v52 = vcombine.high %v1376_v41, %v1384_v43 }
 0x551   : > { %4542 = vmatprep.subr.bf16.mxu0 %v5823_v0  ;;  %v1418_v53 = vcombine.high %v1392_v44, %v1400_v45  ;;  %4548 = vmatprep.subr.bf16.mxu1 %v5823_v0 }
 0x552   : > { %v1409_v54 = vrot.slane %v1401_v48, %v6608_v42  ;;  %v1425_v55 = vrot.slane %v1417_v49, %v6608_v42  ;;  %v1416_v62 = vrot.slane %v1402_v52, %v6608_v42 }
 0x553   : > { %v1432_v63 = vrot.slane %v1418_v53, %v6608_v42 }
 0x554   : > { %v1433_v56 = vcombine.low %v1409_v54, %v1425_v55  ;;  %v1434_v57 = vcombine.high %v1409_v54, %v1425_v55 }
 0x555   : > { %v1435_v3 = vcombine.low %v1416_v62, %v1432_v63  ;;  %v1436_v4 = vcombine.high %v1416_v62, %v1432_v63 }
 0x556   : > { %v1437_v60 = vpack.c.bf16 %v1433_v56, %v1433_v56  ;;  %v1438_v61 = vpack.c.bf16 %v1434_v57, %v1434_v57 }
 0x557   : > { %v1439_v5 = vpack.c.bf16 %v1435_v3, %v1435_v3  ;;  %v1440_v6 = vpack.c.bf16 %v1436_v4, %v1436_v4 }
 0x558   : > { %4533 = vmatmul.mubr.msk.bf16.vlgmr.msra.gmra.mrb[8].mxu0 %vm1585_vm3, %v1437_v60  ;;  %4539 = vmatmul.mubr.msk.bf16.vlgmr.msra.gmra.mrb[0].mxu1 %vm1585_vm3, %v1438_v61 }
 0x559   : > { %4543 = vmatpush3.bf16.xpose.msra.mxu0 %v1682_v1  ;;  %4549 = vmatpush3.bf16.xpose.msra.mxu1 %v1728_v2 }
 0x55a   : > { %4544 = vmatprep.mubr.msk.bf16.mxu0 %vm5824_vm0, %v5823_v0  ;;  %4550 = vmatprep.mubr.msk.bf16.mxu1 %vm5824_vm0, %v5823_v0 }
 0x55b   : > { %4554 = vmatprep.subr.bf16.mxu0 %v5823_v0  ;;  %4560 = vmatprep.subr.bf16.mxu1 %v5823_v0 }
 0x560   : > { %4545 = vmatmul.mubr.msk.bf16.vlgmr.msra.gmra.mrb[12].mxu0 %vm1585_vm3, %v1439_v5  ;;  %4551 = vmatmul.mubr.msk.bf16.vlgmr.msra.gmra.mrb[4].mxu1 %vm1585_vm3, %v1440_v6 }
 0x561   : > { %4556 = vmatprep.mubr.msk.bf16.mxu0 %vm5824_vm0, %v5823_v0  ;;  %4562 = vmatprep.mubr.msk.bf16.mxu1 %vm5824_vm0, %v5823_v0 }
 0x62b   : > { %v1626_v7 = vpop.f32.mrb[8].mxu0  ;;  %v1672_v8 = vpop.f32.mrb[0].mxu1 }
 0x62c   : > { %v4534_v9 = vpop.f32.mrb[9].mxu0  ;;  %v4540_v10 = vpop.f32.mrb[1].mxu1  ;;  %v1773_v11 = vsel %vm1585_vm3, %v1672_v8, -inf  ;;  %v1770_v13 = vsel %vm1585_vm3, %v1626_v7, -inf }
 0x62d   : > { %1774 = vmax.xlane.f32.xlu1 %v1773_v11  ;;  %v1675_v14 = vpop.f32.mrb[2].mxu1  ;;  %1771 = vmax.xlane.f32.xlu0 %v1770_v13  ;;  %v1629_v15 = vpop.f32.mrb[10].mxu0 }
 0x62e   : > { %v4535_v16 = vpop.f32.mrb[11].mxu0  ;;  %v4541_v18 = vpop.f32.mrb[3].mxu1 }
 0x633   : > { %v1718_v19 = vpop.f32.mrb[12].mxu0  ;;  %v1764_v20 = vpop.f32.mrb[4].mxu1 }
 0x634   : > { %v4546_v24 = vpop.f32.mrb[13].mxu0  ;;  %v4552_v25 = vpop.f32.mrb[5].mxu1  ;;  %v1776_v26 = vsel %vm1585_vm3, %v1718_v19, -inf  ;;  %v1779_v31 = vsel %vm1585_vm3, %v1764_v20, -inf }
 0x635   : > { %v1767_v27 = vpop.f32.mrb[6].mxu1  ;;  %1777 = vmax.xlane.f32.xlu0 %v1776_v26  ;;  %v1721_v28 = vpop.f32.mrb[14].mxu0 }
 0x636   : > { %v4547_v29 = vpop.f32.mrb[15].mxu0  ;;  %v4553_v30 = vpop.f32.mrb[7].mxu1 }
 0x639   : > { %1780 = vmax.xlane.f32.xlu0 %v1779_v31 }
 0x63e   : > { %1289 = vrot.lane.b32.xlu1 %v6580_v17, %s5831_s5 }
 0x6ba   : > { %v1775_v32 = vpop.xlane.xlu1 %1774  ;;  %v1772_v33 = vpop.xlane.xlu0 %1771 }
 0x6bb   : > { %v1783_v34 = vsub.f32 %v1672_v8, %v1775_v32  ;;  %v1782_v36 = vsub.f32 %v1626_v7, %v1772_v33 }
 0x6bd   : > { %v1788_v37 = vmul.f32 1.442695, %v1783_v34  ;;  %v1786_v38 = vmul.f32 1.442695, %v1782_v36 }
 0x6bf   : > { %5025 = vpow2.f32 %v1788_v37 }
 0x6c0   : > { %5027 = vpow2.f32 %v1786_v38 }
 0x6c2   : > { %v1778_v17 = vpop.xlane.xlu0 %1777 }
 0x6c3   : > { %v1784_v44 = vsub.f32 %v1718_v19, %v1778_v17 }
 0x6c5   : > { %v1790_v46 = vmul.f32 1.442695, %v1784_v44 }
 0x6c6   : > { %v1781_v45 = vpop.xlane.xlu0 %1780 }
 0x6c7   : > { %v1785_v47 = vsub.f32 %v1764_v20, %v1781_v45  ;;  %5029 = vpow2.f32 %v1790_v46 }
 0x6c9   : > { %v6668_v39 = vpop.eup %5025  ;;  %v1792_v48 = vmul.f32 1.442695, %v1785_v47 }
 0x6ca   : > { %v6670_v40 = vpop.eup %5027  ;;  %v1797_v41 = vsel %vm1585_vm3, %v6668_v39, 0.0 }
 0x6cb   : > { %v1794_v43 = vsel %vm1585_vm3, %v6670_v40, 0.0  ;;  %1798 = vadd.xlane.f32.xlu0 %v1797_v41  ;;  %5031 = vpow2.f32 %v1792_v48 }
 0x6cc   : > { %1795 = vadd.xlane.f32.xlu1 %v1794_v43 }
 0x6d1   : > { %v6682_v49 = vpop.eup %5029 }
 0x6d2   : > { %v1800_v50 = vsel %vm1585_vm3, %v6682_v49, 0.0 }
 0x6dd   : > { %1293 = vrot.lane.b32.xlu1 %v6596_v23, %s5831_s5  ;;  %v6686_v23 = vpop.eup %5031 }
 0x6e1   : > { %1295 = vrot.lane.b32.xlu1 %v6594_v22, %s5831_s5  ;;  %1291 = vrot.lane.b32.xlu0 %v6590_v21, %s5831_s5  ;;  %v1803_v22 = vsel %vm1585_vm3, %v6686_v23, 0.0  ;;  %v1290_v21 = vpop.permute.xlu1 %1289 }
 0x700   : > { %1801 = vadd.xlane.f32.xlu0 %v1800_v50 }
 0x705   : > { %1804 = vadd.xlane.f32.xlu1 %v1803_v22 }
 0x758   : > { %v1799_v52 = vpop.xlane.xlu0 %1798 }
 0x759   : > { %v1796_v51 = vpop.xlane.xlu1 %1795  ;;  %5033 = vrcp.f32 %v1799_v52 }
 0x75a   : > { %5035 = vrcp.f32 %v1796_v51 }
 0x75c   : > { %v1292_v56 = vpop.permute.xlu0 %1291 }
 0x75d   : > { %v1294_v53 = vpop.permute.xlu1 %1293 }
 0x75e   : > { %v1301_v54 = vcombine.low %v1290_v21, %v1294_v53  ;;  %v1302_v55 = vcombine.high %v1290_v21, %v1294_v53 }
 0x760   : > { %v1309_v60 = vrot.slane %v1301_v54, %v6606_v35  ;;  %v1316_v61 = vrot.slane %v1302_v55, %v6606_v35 }
 0x761   : > { %v1296_v57 = vpop.permute.xlu1 %1295 }
 0x762   : > { %v1317_v58 = vcombine.low %v1292_v56, %v1296_v57  ;;  %v1318_v59 = vcombine.high %v1292_v56, %v1296_v57 }
 0x763   : > { %v5034_v26 = vpop.eup %5033 }
 0x764   : > { %v1325_v62 = vrot.slane %v1317_v58, %v6606_v35  ;;  %v1332_v63 = vrot.slane %v1318_v59, %v6606_v35  ;;  %v5036_v31 = vpop.eup %5035  ;;  %v1811_v38 = vmul.f32 %v5034_v26, %v6668_v39 }
 0x765   : > { %v1810_v37 = vmul.f32 %v5036_v31, %v6670_v40 }
 0x766   : > { %v1333_v1 = vcombine.low %v1309_v60, %v1325_v62  ;;  %v1334_v2 = vcombine.high %v1309_v60, %v1325_v62  ;;  %v1349_v3 = vcombine.low %v1316_v61, %v1332_v63  ;;  %v1350_v4 = vcombine.high %v1316_v61, %v1332_v63 }
 0x767   : > { %v1814_v47 = vpack.c.bf16 %v1810_v37, %v1810_v37  ;;  %v1815_v48 = vpack.c.bf16 %v1811_v38, %v1811_v38 }
 0x768   : > { %v1341_v5 = vrot.slane %v1333_v1, %v6608_v42  ;;  %v1348_v6 = vrot.slane %v1334_v2, %v6608_v42  ;;  %v1357_v7 = vrot.slane %v1349_v3, %v6608_v42  ;;  %v1364_v8 = vrot.slane %v1350_v4, %v6608_v42 }
 0x76a   : > { %v1513_v9 = vcombine.low %v1341_v5, %v1348_v6  ;;  %v4359_v10 = vcombine.high %v1341_v5, %v1348_v6  ;;  %v1529_v11 = vcombine.low %v1357_v7, %v1364_v8  ;;  %v4360_v13 = vcombine.high %v1357_v7, %v1364_v8 }
 0x76c   : > { %v1520_v14 = vrot.slane %v1513_v9, %v6606_v35  ;;  %v1528_v15 = vrot.slane %v4359_v10, %v6606_v35  ;;  %v1536_v16 = vrot.slane %v1529_v11, %v6606_v35  ;;  %v1544_v18 = vrot.slane %v4360_v13, %v6606_v35 }
 0x76e   : > { %v1545_v19 = vcombine.low %v1520_v14, %v1528_v15  ;;  %v1561_v20 = vcombine.low %v1536_v16, %v1544_v18  ;;  %v1546_v24 = vcombine.high %v1520_v14, %v1528_v15  ;;  %v1562_v25 = vcombine.high %v1536_v16, %v1544_v18  ;;  %v4996_v16 = vld [vmem:[#allocation13] sm:$0xff]  }
 0x770   : > { %v1553_v27 = vrot.slane %v1545_v19, %v6608_v42  ;;  %v1569_v28 = vrot.slane %v1561_v20, %v6608_v42  ;;  %v1560_v29 = vrot.slane %v1546_v24, %v6608_v42  ;;  %v1576_v30 = vrot.slane %v1562_v25, %v6608_v42 }
 0x772   : > { %v1577_v32 = vcombine.low %v1553_v27, %v1569_v28  ;;  %v1578_v33 = vcombine.high %v1553_v27, %v1569_v28  ;;  %v1579_v34 = vcombine.low %v1560_v29, %v1576_v30  ;;  %v1580_v36 = vcombine.high %v1560_v29, %v1576_v30  ;;  %v4997_v29 = vld [vmem:[#allocation13 + $0x8] sm:$0xff]  }
 0x774   : > { %v1581_v41 = vpack.c.bf16 %v1577_v32, %v1577_v32  ;;  %v1582_v43 = vpack.c.bf16 %v1578_v33, %v1578_v33  ;;  %v1583_v45 = vpack.c.bf16 %v1579_v34, %v1579_v34  ;;  %v1584_v46 = vpack.c.bf16 %v1580_v36, %v1580_v36 }
 0x776   : > { %v1823_v17 = vsel %vm1821_vm4, %v1581_v41, 0  ;;  %v1869_v44 = vsel %vm1821_vm4, %v1582_v43, 0  ;;  %v1915_v39 = vsel %vm1821_vm4, %v1583_v45, 0  ;;  %v1961_v40 = vsel %vm1821_vm4, %v1584_v46, 0 }
 0x777   : > { %4555 = vmatpush3.bf16.msra.mxu0 %v1823_v17  ;;  %4561 = vmatpush3.bf16.msra.mxu1 %v1869_v44 }
 0x778   : > { %4566 = vmatprep.subr.bf16.mxu0 %v5823_v0  ;;  %4572 = vmatprep.subr.bf16.mxu1 %v5823_v0 }
 0x77a   : > { %4557 = vmatmul.mubr.msk.bf16.vlgmr.msra.gmra.mrb[16].mxu0 %vm1585_vm3, %v1814_v47  ;;  %4563 = vmatmul.mubr.msk.bf16.vlgmr.msra.gmra.mrb[8].mxu1 %vm1585_vm3, %v1815_v48 }
 0x77b   : > { %4567 = vmatpush3.bf16.msra.mxu0 %v1915_v39  ;;  %4573 = vmatpush3.bf16.msra.mxu1 %v1961_v40 }
 0x77c   : > { %4568 = vmatprep.mubr.msk.bf16.mxu0 %vm5824_vm0, %v5823_v0  ;;  %4574 = vmatprep.mubr.msk.bf16.mxu1 %vm5824_vm0, %v5823_v0 }
 0x77d   : > { %4578 = vmatprep.subr.bf16.mxu0 %v5823_v0  ;;  %4586 = vmatprep.subr.bf16.mxu1 %v5823_v0 }
 0x78d   : > { %v1802_v50 = vpop.xlane.xlu0 %1801 }
 0x78e   : > { %5037 = vrcp.f32 %v1802_v50 }
 0x792   : > { %v1805_v22 = vpop.xlane.xlu1 %1804 }
 0x793   : > { %5039 = vrcp.f32 %v1805_v22 }
 0x798   : > { %v5038_v21 = vpop.eup %5037 }
 0x799   : > { %v1812_v51 = vmul.f32 %v5038_v21, %v6682_v49 }
 0x79b   : > { %v1816_v52 = vpack.c.bf16 %v1812_v51, %v1812_v51 }
 0x79d   : > { %v5040_v53 = vpop.eup %5039  ;;  %4569 = vmatmul.mubr.msk.bf16.vlgmr.msra.gmra.mrb[20].mxu0 %vm1585_vm3, %v1816_v52 }
 0x79e   : > { %v1813_v54 = vmul.f32 %v5040_v53, %v6686_v23  ;;  %4582 = vmatprep.mubr.msk.bf16.mxu0 %vm5824_vm0, %v5823_v0  ;;  %4579 = vmatpush3.bf16.msra.mxu0 %v4996_v16 }
 0x79f   : > { %4580 = vmatprep.subr.bf16.mxu0 %v5823_v0 }
 0x7a0   : > { %v1817_v55 = vpack.c.bf16 %v1813_v54, %v1813_v54 }
 0x7a2   : > { %4575 = vmatmul.mubr.msk.bf16.vlgmr.msra.gmra.mrb[12].mxu1 %vm1585_vm3, %v1817_v55  ;;  %4581 = vmatpush3.bf16.msra.mxu0 %v4997_v29  ;;  %v4377_v29 = vld [vmem:[#allocation20] ss:$0 sm:$0xff] }
 0x7a3   : > { %4590 = vmatprep.mubr.msk.bf16.mxu1 %vm5824_vm0, %v5823_v0  ;;  %4594 = vmatprep.subr.bf16.mxu0 %v5823_v0 }
 0x84d   : > { %v1859_v56 = vpop.f32.mrb[16].mxu0  ;;  %v1905_v57 = vpop.f32.mrb[8].mxu1 }
 0x84e   : > { %v4558_v58 = vpop.f32.mrb[17].mxu0  ;;  %v4564_v59 = vpop.f32.mrb[9].mxu1 }
 0x84f   : > { %v1862_v49 = vpop.f32.mrb[18].mxu0  ;;  %v1908_v60 = vpop.f32.mrb[10].mxu1 }
 0x850   : > { %v4559_v61 = vpop.f32.mrb[19].mxu0  ;;  %v4565_v62 = vpop.f32.mrb[11].mxu1 }
 0x870   : > { %v1951_v63 = vpop.f32.mrb[20].mxu0 }
 0x871   : > { %v2003_v1 = vcombine.low %v1859_v56, %v1951_v63  ;;  %v2004_v23 = vcombine.high %v1859_v56, %v1951_v63  ;;  %v4570_v2 = vpop.f32.mrb[21].mxu0 }
 0x872   : > { %v1954_v3 = vpop.f32.mrb[22].mxu0 }
 0x873   : > { %v4571_v4 = vpop.f32.mrb[23].mxu0  ;;  %v2011_v10 = vrot.slane %v2003_v1, %v6606_v35  ;;  %v2018_v11 = vrot.slane %v2004_v23, %v6606_v35 }
 0x875   : > { %v1997_v5 = vpop.f32.mrb[12].mxu1 }
 0x876   : > { %v2019_v6 = vcombine.low %v1905_v57, %v1997_v5  ;;  %v2020_v7 = vcombine.high %v1905_v57, %v1997_v5  ;;  %v4576_v8 = vpop.f32.mrb[13].mxu1  ;;  %v4371_v57 = vld [vmem:[#allocation14] ss:$0 sm:$0xff]  ;;  %v4998_v5 = vld [vmem:[#allocation19] sm:$0xff]  }
 0x877   : > { %v2000_v9 = vpop.f32.mrb[14].mxu1  ;;  %4587 = vmatpush3.bf16.msra.mxu1 %v4998_v5  ;;  %v5002_v8 = vld [vmem:[#allocation22 + $0x10] sm:$0xff]  }
 0x878   : > { %v2027_v13 = vrot.slane %v2019_v6, %v6606_v35  ;;  %v2034_v14 = vrot.slane %v2020_v7, %v6606_v35  ;;  %v4577_v15 = vpop.f32.mrb[15].mxu1  ;;  %4588 = vmatprep.subr.bf16.mxu1 %v5823_v0  ;;  %v4999_v6 = vld [vmem:[#allocation19 + $0x8] sm:$0xff]   ;;  %v5003_v9 = vld [vmem:[#allocation22 + $0x18] sm:$0xff]  }
 0x879   : > { %v5000_v7 = vld [vmem:[#allocation22] sm:$0xff]  }
 0x87a   : > { %v2035_v18 = vcombine.low %v2011_v10, %v2027_v13  ;;  %v2036_v19 = vcombine.high %v2011_v10, %v2027_v13  ;;  %v2051_v20 = vcombine.low %v2018_v11, %v2034_v14  ;;  %v2052_v24 = vcombine.high %v2018_v11, %v2034_v14  ;;  %v5004_v10 = vld [vmem:[#allocation22 + $0x20] sm:$0xff]   ;;  %v5005_v11 = vld [vmem:[#allocation22 + $0x28] sm:$0xff]  }
 0x87b   : > { %4589 = vmatpush3.bf16.msra.mxu1 %v4999_v6 }
 0x87c   : > { %v2043_v25 = vrot.slane %v2035_v18, %v6608_v42  ;;  %v2050_v26 = vrot.slane %v2036_v19, %v6608_v42  ;;  %v2059_v27 = vrot.slane %v2051_v20, %v6608_v42  ;;  %v2066_v28 = vrot.slane %v2052_v24, %v6608_v42  ;;  %4614 = vmatprep.subr.bf16.mxu1 %v5823_v0  ;;  %v4375_v18 = vld [vmem:[#allocation16] ss:$0 sm:$0xff]  ;;  %v4376_v20 = vld [vmem:[#allocation17] ss:$0 sm:$0xff] }
 0x87e   : > { %v2071_v30 = vcombine.low %v2043_v25, %v2050_v26  ;;  %v4369_v31 = vcombine.high %v2043_v25, %v2050_v26  ;;  %v2087_v32 = vcombine.low %v2059_v27, %v2066_v28  ;;  %v4370_v33 = vcombine.high %v2059_v27, %v2066_v28  ;;  %v5006_v27 = vld [vmem:[#allocation22 + $0x30] sm:$0xff]   ;;  %v5007_v28 = vld [vmem:[#allocation22 + $0x38] sm:$0xff]  }
 0x880   : > { %v2078_v34 = vrot.slane %v2071_v30, %v6606_v35  ;;  %v2086_v36 = vrot.slane %v4369_v31, %v6606_v35  ;;  %v2094_v37 = vrot.slane %v2087_v32, %v6606_v35  ;;  %v2102_v38 = vrot.slane %v4370_v33, %v6606_v35 }
 0x882   : > { %v2104_v41 = vcombine.high %v2078_v34, %v2086_v36  ;;  %v2120_v43 = vcombine.high %v2094_v37, %v2102_v38  ;;  %v2103_v17 = vcombine.low %v2078_v34, %v2086_v36  ;;  %v2119_v44 = vcombine.low %v2094_v37, %v2102_v38  ;;  %v4381_v38 = vld [vmem:[#allocation23] ss:$0 sm:$0xff] }
 0x884   : > { %v2118_v45 = vrot.slane %v2104_v41, %v6608_v42  ;;  %v2134_v46 = vrot.slane %v2120_v43, %v6608_v42  ;;  %v2111_v47 = vrot.slane %v2103_v17, %v6608_v42  ;;  %v2127_v48 = vrot.slane %v2119_v44, %v6608_v42 }
 0x886   : > { %v2137_v39 = vcombine.low %v2118_v45, %v2134_v46  ;;  %v2136_v40 = vcombine.high %v2111_v47, %v2127_v48  ;;  %v2138_v50 = vcombine.high %v2118_v45, %v2134_v46  ;;  %v2135_v22 = vcombine.low %v2111_v47, %v2127_v48 }
 0x888   : > { %2144 = vrot.lane.b32.xlu1 %v2137_v39, %s5832_s7  ;;  %2140 = vrot.lane.b32.xlu0 %v2136_v40, %s5833_s30 }
 0x88c   : > { %2148 = vrot.lane.b32.xlu0 %v2138_v50, %s5834_s23 }
 0x8fa   : > { %v2141_v21 = vpop.permute.xlu0 %2140  ;;  %v2145_v51 = vpop.permute.xlu1 %2144 }
 0x8fb   : > { %v2151_v52 = vsel %vm1585_vm3, %v2135_v22, %v2141_v21  ;;  %v5008_v21 = vld [vmem:[#allocation10 + $0x10] sm:$0xff]  }
 0x8fc   : > { %v2152_v54 = vsel %vm1009_vm1, %v2151_v52, %v2145_v51  ;;  %v5009_v51 = vld [vmem:[#allocation10 + $0x18] sm:$0xff]  }
 0x8fe   : > { %v2149_v53 = vpop.permute.xlu0 %2148 }
 0x8ff   : > { %v2154_v55 = vsel %vm2153_vm5, %v2152_v54, %v2149_v53 }
 0x900   : > { %v2159_v56 = vpack.c.bf16 %v2154_v55, %v2154_v55 }
 0x902   : > { %4583 = vmatmul.mubr.msk.bf16.vlgmr.msra.gmra.mrb[24].mxu0 %vm1079_vm2, %v2159_v56  ;;  %v4390_v56 = vld [vmem:[#allocation25] ss:$0 sm:$0xff] }
 0x903   : > { %4610 = vmatprep.mubr.msk.bf16.mxu0 %vm5824_vm0, %v5823_v0  ;;  %4595 = vmatpush3.bf16.msra.mxu0 %v5000_v7 }
 0x904   : > { %4596 = vmatprep.subr.bf16.mxu0 %v5823_v0 }
 0x9d5   : > { %v2216_v58 = vpop.f32.mrb[24].mxu0 }
 0x9d6   : > { %v2217_v59 = vadd.f32 %v4371_v57, %v2216_v58  ;;  %v4584_v49 = vpop.f32.mrb[25].mxu0  ;;  %v4391_v58 = vld [vmem:[#allocation26] ss:$0 sm:$0xff] }
 0x9d7   : > { %v2219_v60 = vpop.f32.mrb[26].mxu0 }
 0x9d8   : > { %v4585_v61 = vpop.f32.mrb[27].mxu0  ;;  %v2222_v62 = vadd.f32 %v2217_v59, %v6573_v12  ;;  %v5001_v12 = vld [vmem:[#allocation22 + $0x8] sm:$0xff]  }
 0x9d9   : > { %4597 = vmatpush3.bf16.msra.mxu0 %v5001_v12  ;;  %v4392_v61 = vld [vmem:[#allocation11 + $0x1] ss:$0 sm:$0xff] }
 0x9da   : > { %v2225_v63 = vsel %vm1079_vm2, %v2222_v62, 0.0  ;;  %4598 = vmatprep.subr.bf16.mxu0 %v5823_v0 }
 0x9db   : > { %2226 = vadd.xlane.f32.xlu1 %v2225_v63 }
 0x9dd   : > { %4599 = vmatpush3.bf16.msra.mxu0 %v5002_v8 }
 0x9de   : > { %4600 = vmatprep.subr.bf16.mxu0 %v5823_v0 }
 0x9e1   : > { %4601 = vmatpush3.bf16.msra.mxu0 %v5003_v9 }
 0x9e2   : > { %4602 = vmatprep.subr.bf16.mxu0 %v5823_v0 }
 0x9e5   : > { %4603 = vmatpush3.bf16.msra.mxu0 %v5004_v10 }
 0x9e6   : > { %4604 = vmatprep.subr.bf16.mxu0 %v5823_v0 }
 0x9e9   : > { %4605 = vmatpush3.bf16.msra.mxu0 %v5005_v11 }
 0x9ea   : > { %4606 = vmatprep.subr.bf16.mxu0 %v5823_v0 }
 0x9ed   : > { %4607 = vmatpush3.bf16.msra.mxu0 %v5006_v27 }
 0x9ee   : > { %4608 = vmatprep.subr.bf16.mxu0 %v5823_v0 }
 0x9f1   : > { %4609 = vmatpush3.bf16.msra.mxu0 %v5007_v28 }
 0x9f2   : > { %4640 = vmatprep.subr.bf16.mxu0 %v5823_v0 }
 0xa68   : > { %v2227_v1 = vpop.xlane.xlu1 %2226 }
 0xa69   : > { %v2229_v23 = vmul.f32 0.03125, %v2227_v1 }
 0xa6b   : > { %v2230_v2 = vsub.f32 %v2222_v62, %v2229_v23 }
 0xa6d   : > { %v2231_v3 = vmul.f32 %v2230_v2, %v2230_v2 }
 0xa6f   : > { %v2232_v4 = vsel %vm1079_vm2, %v2231_v3, 0.0 }
 0xa70   : > { %2233 = vadd.xlane.f32.xlu0 %v2232_v4 }
 0xafd   : > { %v2234_v13 = vpop.xlane.xlu0 %2233 }
 0xafe   : > { %v2235_v14 = vmul.f32 0.03125, %v2234_v13 }
 0xb00   : > { %v2236_v15 = vadd.f32 1e-05, %v2235_v14 }
 0xb02   : > { %5041 = vrsqrt.f32 %v2236_v15 }
 0xb0c   : > { %v5042_v16 = vpop.eup %5041 }
 0xb0d   : > { %v2238_v19 = vmul.f32 %v5042_v16, %v2230_v2 }
 0xb0f   : > { %v2245_v24 = vmul.f32 %v4375_v18, %v2238_v19 }
 0xb11   : > { %v2252_v25 = vadd.f32 %v4376_v20, %v2245_v24 }
 0xb13   : > { %v2257_v26 = vpack.c.bf16 %v2252_v25, %v2252_v25 }
 0xb15   : > { %4591 = vmatmul.mubr.msk.bf16.vlgmr.msra.gmra.mrb[16].mxu1 %vm1079_vm2, %v2257_v26 }
 0xb16   : > { %4618 = vmatprep.mubr.msk.bf16.mxu1 %vm5824_vm0, %v5823_v0  ;;  %4615 = vmatpush3.bf16.msra.mxu1 %v5008_v21 }
 0xb17   : > { %4616 = vmatprep.subr.bf16.mxu1 %v5823_v0 }
 0xb1a   : > { %4617 = vmatpush3.bf16.msra.mxu1 %v5009_v51 }
 0xb1b   : > { %4622 = vmatprep.subr.bf16.mxu1 %v5823_v0 }
 0xbe8   : > { %v2314_v30 = vpop.f32.mrb[16].mxu1 }
 0xbe9   : > { %v2315_v31 = vadd.f32 %v4377_v29, %v2314_v30  ;;  %v4592_v32 = vpop.f32.mrb[17].mxu1 }
 0xbea   : > { %v2317_v33 = vpop.f32.mrb[18].mxu1 }
 0xbeb   : > { %v2320_v34 = vmax.f32 %v2315_v31, 0.0  ;;  %v4593_v36 = vpop.f32.mrb[19].mxu1 }
 0xbed   : > { %v2337_v37 = vpack.c.bf16 %v2320_v34, %v2320_v34 }
 0xbef   : > { %4611 = vmatmul.mubr.bf16.vlgmr.msra.gmra.mrb[28].mxu0 %v2337_v37 }
 0xbf0   : > { %4642 = vmatprep.mubr.msk.bf16.mxu0 %vm5824_vm0, %v5823_v0 }
 0xcc2   : > { %v2427_v41 = vpop.f32.mrb[28].mxu0 }
 0xcc3   : > { %v2428_v43 = vadd.f32 %v4381_v38, %v2427_v41  ;;  %v4612_v17 = vpop.f32.mrb[29].mxu0 }
 0xcc4   : > { %v2430_v44 = vpop.f32.mrb[30].mxu0 }
 0xcc5   : > { %v4613_v45 = vpop.f32.mrb[31].mxu0  ;;  %v2433_v46 = vadd.f32 %v2428_v43, %v2252_v25 }
 0xcc7   : > { %v2436_v47 = vsel %vm1079_vm2, %v2433_v46, 0.0 }
 0xcc8   : > { %2437 = vadd.xlane.f32.xlu0 %v2436_v47 }
 0xd55   : > { %v2438_v48 = vpop.xlane.xlu0 %2437 }
 0xd56   : > { %v2439_v39 = vmul.f32 0.03125, %v2438_v48 }
 0xd58   : > { %v2440_v40 = vsub.f32 %v2433_v46, %v2439_v39 }
 0xd5a   : > { %v2441_v50 = vmul.f32 %v2440_v40, %v2440_v40 }
 0xd5c   : > { %v2442_v22 = vsel %vm1079_vm2, %v2441_v50, 0.0 }
 0xd5d   : > { %2443 = vadd.xlane.f32.xlu1 %v2442_v22 }
 0xdea   : > { %v2444_v52 = vpop.xlane.xlu1 %2443 }
 0xdeb   : > { %v2445_v53 = vmul.f32 0.03125, %v2444_v52 }
 0xded   : > { %v2446_v54 = vadd.f32 1e-05, %v2445_v53 }
 0xdef   : > { %5043 = vrsqrt.f32 %v2446_v54 }
 0xdf9   : > { %v5044_v55 = vpop.eup %5043 }
 0xdfa   : > { %v2448_v57 = vmul.f32 %v5044_v55, %v2440_v40 }
 0xdfc   : > { %v2455_v59 = vmul.f32 %v4390_v56, %v2448_v57 }
 0xdfe   : > { %v6779_v49 = vadd.f32 %v4391_v58, %v2455_v59 }
 0xe00   : > { %v2468_v60 = vpack.c.bf16 %v6779_v49, %v6779_v49 }
 0xe02   : > { %4619 = vmatmul.mubr.msk.bf16.vlgmr.msra.gmra.mrb[20].mxu1 %vm1079_vm2, %v2468_v60 }
 0xe03   : > { %4624 = vmatprep.mubr.msk.bf16.mxu1 %vm5824_vm0, %v5823_v0 }
 0xed5   : > { %v2526_v62 = vpop.f32.mrb[20].mxu1 }
 0xed6   : > { %v6786_v63 = vadd.f32 %v4392_v61, %v2526_v62  ;;  %v4620_v1 = vpop.f32.mrb[21].mxu1 }
 0xed7   : > { %v2529_v23 = vpop.f32.mrb[22].mxu1 }
 0xed8   : > { %2614 = vrot.lane.b32.xlu1 %v6786_v63, %s5828_s24  ;;  %2612 = vrot.lane.b32.xlu0 %v6786_v63, %s5826_s6  ;;  %v4621_v2 = vpop.f32.mrb[23].mxu1  ;;  %v2532_v5 = vmul.f32 0.35355338, %v6786_v63 }
 0xedc   : > { %2616 = vrot.lane.b32.xlu1 %v6786_v63, %s5825_s1  ;;  %2618 = vrot.lane.b32.xlu0 %v6786_v63, %s5827_s29 }
 0xf4a   : > { %v6796_v3 = vpop.permute.xlu1 %2614  ;;  %v6798_v4 = vpop.permute.xlu0 %2612 }
 0xf4b   : > { %2622 = vrot.lane.b32.xlu0 %v6796_v3, %s5827_s29  ;;  %2620 = vrot.lane.b32.xlu1 %v6798_v4, %s5827_s29 }
 0xf4e   : > { %v6805_v6 = vpop.permute.xlu1 %2616  ;;  %v2619_v7 = vpop.permute.xlu0 %2618 }
 0xf4f   : > { %2624 = vrot.lane.b32.xlu1 %v6805_v6, %s5827_s29  ;;  %2534 = vrot.lane.b32.xlu0 %v2532_v5, %s5826_s6 }
 0xf53   : > { %2537 = vrot.lane.b32.xlu1 %v2532_v5, %s5828_s24  ;;  %2540 = vrot.lane.b32.xlu0 %v2532_v5, %s5825_s1  ;;  %s4033_s1 = sshll.u32 %s990_s0, 4  ;;  %s7159_s24 = sld [smem:[#allocation69_spill]]  ;;  %s6992_s1 = int_to_ptr.vmem [resolvable:$true] %s4033_s1 }
 0xf54   : > { %s5685_s3 = scalar_lea.vmem %s6992_s1, 16 }
 0xf55   : > { %p5686_p5 = scmp.ne.s32.totalorder %s6992_s1, %s5685_s3 }
 0xf57   : > { %p5687_p4 = pnand %p5686_p5, %p7160_p7 }
 0xf59   : > { %p5688_p1 = pneg %p5687_p4 }
 0xfbd   : > { %v2621_v12 = vpop.permute.xlu1 %2620  ;;  %v2623_v8 = vpop.permute.xlu0 %2622 }
 0xfbe   : > { %v2630_v9 = vcombine.low %v2619_v7, %v2623_v8  ;;  %v2631_v10 = vcombine.high %v2619_v7, %v2623_v8 }
 0xfc0   : > { %v2638_v16 = vrot.slane %v2630_v9, %v6606_v35  ;;  %v2645_v18 = vrot.slane %v2631_v10, %v6606_v35 }
 0xfc1   : > { %v2625_v11 = vpop.permute.xlu1 %2624  ;;  %v2535_v13 = vpop.permute.xlu0 %2534 }
 0xfc2   : > { %v2646_v14 = vcombine.low %v2621_v12, %v2625_v11  ;;  %v2647_v15 = vcombine.high %v2621_v12, %v2625_v11 }
 0xfc4   : > { %v2654_v19 = vrot.slane %v2646_v14, %v6606_v35  ;;  %v2661_v20 = vrot.slane %v2647_v15, %v6606_v35 }
 0xfc5   : > { %v2538_v24 = vpop.permute.xlu1 %2537  ;;  %v2541_v25 = vpop.permute.xlu0 %2540 }
 0xfc6   : > { %v2662_v26 = vcombine.low %v2638_v16, %v2654_v19  ;;  %v2663_v27 = vcombine.high %v2638_v16, %v2654_v19  ;;  %v2678_v28 = vcombine.low %v2645_v18, %v2661_v20  ;;  %v2679_v29 = vcombine.high %v2645_v18, %v2661_v20 }
 0xfc7   : > { %v2543_v30 = vcombine.low %v2532_v5, %v2538_v24  ;;  %v2544_v31 = vcombine.high %v2532_v5, %v2538_v24  ;;  %v2559_v32 = vcombine.low %v2535_v13, %v2541_v25  ;;  %v2560_v33 = vcombine.high %v2535_v13, %v2541_v25 }
 0xfc8   : > { %v2670_v34 = vrot.slane %v2662_v26, %v6608_v42  ;;  %v2677_v36 = vrot.slane %v2663_v27, %v6608_v42  ;;  %v2686_v37 = vrot.slane %v2678_v28, %v6608_v42  ;;  %v2693_v38 = vrot.slane %v2679_v29, %v6608_v42 }
 0xfc9   : > { %v2551_v41 = vrot.slane %v2543_v30, %v6606_v35  ;;  %v2558_v43 = vrot.slane %v2544_v31, %v6606_v35  ;;  %v2567_v17 = vrot.slane %v2559_v32, %v6606_v35  ;;  %v2574_v44 = vrot.slane %v2560_v33, %v6606_v35 }
 0xfca   : > { %v2850_v45 = vcombine.low %v2670_v34, %v2677_v36  ;;  %v4398_v46 = vcombine.high %v2670_v34, %v2677_v36  ;;  %v2866_v47 = vcombine.low %v2686_v37, %v2693_v38  ;;  %v4399_v48 = vcombine.high %v2686_v37, %v2693_v38 }
 0xfcb   : > { %v2575_v39 = vcombine.low %v2551_v41, %v2567_v17  ;;  %v2576_v40 = vcombine.high %v2551_v41, %v2567_v17  ;;  %v2591_v50 = vcombine.low %v2558_v43, %v2574_v44  ;;  %v2592_v22 = vcombine.high %v2558_v43, %v2574_v44 }
 0xfcc   : > { %v2857_v21 = vrot.slane %v2850_v45, %v6606_v35  ;;  %v2865_v51 = vrot.slane %v4398_v46, %v6606_v35  ;;  %v2873_v52 = vrot.slane %v2866_v47, %v6606_v35  ;;  %v2881_v53 = vrot.slane %v4399_v48, %v6606_v35 }
 0xfcd   : > { %v2583_v54 = vrot.slane %v2575_v39, %v6608_v42  ;;  %v2590_v55 = vrot.slane %v2576_v40, %v6608_v42  ;;  %v2599_v56 = vrot.slane %v2591_v50, %v6608_v42  ;;  %v2606_v57 = vrot.slane %v2592_v22, %v6608_v42 }
 0xfce   : > { %v2882_v58 = vcombine.low %v2857_v21, %v2865_v51  ;;  %v2898_v59 = vcombine.low %v2873_v52, %v2881_v53  ;;  %v2883_v60 = vcombine.high %v2857_v21, %v2865_v51  ;;  %v2899_v61 = vcombine.high %v2873_v52, %v2881_v53 }
 0xfcf   : > { %v2778_v62 = vcombine.low %v2583_v54, %v2590_v55  ;;  %v4396_v1 = vcombine.high %v2583_v54, %v2590_v55  ;;  %v2794_v23 = vcombine.low %v2599_v56, %v2606_v57  ;;  %v4397_v2 = vcombine.high %v2599_v56, %v2606_v57 }
 0xfd0   : > { %v2890_v5 = vrot.slane %v2882_v58, %v6608_v42  ;;  %v2906_v7 = vrot.slane %v2898_v59, %v6608_v42  ;;  %v2897_v12 = vrot.slane %v2883_v60, %v6608_v42  ;;  %v2913_v8 = vrot.slane %v2899_v61, %v6608_v42 }
 0xfd1   : > { %v2785_v9 = vrot.slane %v2778_v62, %v6606_v35  ;;  %v2793_v10 = vrot.slane %v4396_v1, %v6606_v35  ;;  %v2801_v11 = vrot.slane %v2794_v23, %v6606_v35  ;;  %v2809_v13 = vrot.slane %v4397_v2, %v6606_v35 }
 0xfd2   : > { %v2914_v14 = vcombine.low %v2890_v5, %v2906_v7  ;;  %v2917_v15 = vcombine.high %v2897_v12, %v2913_v8  ;;  %v2915_v32 = vcombine.high %v2890_v5, %v2906_v7  ;;  %v2916_v43 = vcombine.low %v2897_v12, %v2913_v8 }
 0xfd3   : > { %v2810_v16 = vcombine.low %v2785_v9, %v2793_v10  ;;  %v2811_v18 = vcombine.high %v2785_v9, %v2793_v10  ;;  %v2826_v19 = vcombine.low %v2801_v11, %v2809_v13  ;;  %v2827_v20 = vcombine.high %v2801_v11, %v2809_v13 }
 0xfd4   : > { %v2918_v24 = vpack.c.bf16 %v2914_v14, %v2914_v14  ;;  %v2921_v25 = vpack.c.bf16 %v2917_v15, %v2917_v15  ;;  %v2919_v36 = vpack.c.bf16 %v2915_v32, %v2915_v32  ;;  %v2920_v44 = vpack.c.bf16 %v2916_v43, %v2916_v43 }
 0xfd5   : > { %v2818_v26 = vrot.slane %v2810_v16, %v6608_v42  ;;  %v2834_v27 = vrot.slane %v2826_v19, %v6608_v42  ;;  %v2825_v28 = vrot.slane %v2811_v18, %v6608_v42  ;;  %v2841_v29 = vrot.slane %v2827_v20, %v6608_v42 }
 0xfd6   : > { %v2998_v30 = vsel %vm1585_vm3, %v2918_v24, 0  ;;  %v3136_v31 = vsel %vm1585_vm3, %v2921_v25, 0  ;;  %v3044_v41 = vsel %vm1585_vm3, %v2919_v36, 0  ;;  %v3090_v46 = vsel %vm1585_vm3, %v2920_v44, 0 }
 0xfd7   : > { %4623 = vmatpush3.bf16.xpose.msra.mxu1 %v2998_v30  ;;  %4641 = vmatpush3.bf16.xpose.msra.mxu0 %v3136_v31  ;;  %v2842_v33 = vcombine.low %v2818_v26, %v2834_v27  ;;  %v2845_v34 = vcombine.high %v2825_v28, %v2841_v29  ;;  %v2843_v17 = vcombine.high %v2818_v26, %v2834_v27 }
 0xfd8   : > { %4628 = vmatprep.subr.bf16.mxu1 %v5823_v0  ;;  %4652 = vmatprep.subr.bf16.mxu0 %v5823_v0  ;;  %v2844_v47 = vcombine.low %v2825_v28, %v2841_v29 }
 0xfd9   : > { %v2846_v37 = vpack.c.bf16 %v2842_v33, %v2842_v33  ;;  %v2849_v38 = vpack.c.bf16 %v2845_v34, %v2845_v34  ;;  %v2847_v45 = vpack.c.bf16 %v2843_v17, %v2843_v17 }
 0xfda   : > { %v2848_v48 = vpack.c.bf16 %v2844_v47, %v2844_v47 }
 0xfde   : > { %4625 = vmatmul.mubr.msk.bf16.vlgmr.msra.gmra.mrb[24].mxu1 %vm1585_vm3, %v2846_v37  ;;  %4643 = vmatmul.mubr.msk.bf16.vlgmr.msra.gmra.mrb[32].mxu0 %vm1585_vm3, %v2849_v38 }
 0xfdf   : > { %4629 = vmatpush3.bf16.xpose.msra.mxu1 %v3044_v41  ;;  %4630 = vmatprep.mubr.msk.bf16.mxu1 %vm5824_vm0, %v5823_v0 }
 0xfe0   : > { %4634 = vmatprep.subr.bf16.mxu1 %v5823_v0  ;;  %4654 = vmatprep.mubr.msk.bf16.mxu0 %vm5824_vm0, %v5823_v0 }
 0xfe6   : > { %4631 = vmatmul.mubr.msk.bf16.vlgmr.msra.gmra.mrb[28].mxu1 %vm1585_vm3, %v2847_v45 }
 0xfe7   : > { %4635 = vmatpush3.bf16.xpose.msra.mxu1 %v3090_v46  ;;  %4636 = vmatprep.mubr.msk.bf16.mxu1 %vm5824_vm0, %v5823_v0 }
 0xfe8   : > { %4646 = vmatprep.subr.bf16.mxu1 %v5823_v0 }
 0xfee   : > { %4637 = vmatmul.mubr.msk.bf16.vlgmr.msra.gmra.mrb[32].mxu1 %vm1585_vm3, %v2848_v48 }
 0xfef   : > { %4648 = vmatprep.mubr.msk.bf16.mxu1 %vm5824_vm0, %v5823_v0 }
0x10b1   : > { %v3034_v39 = vpop.f32.mrb[24].mxu1  ;;  %v3172_v40 = vpop.f32.mrb[32].mxu0 }
0x10b2   : > { %v4626_v50 = vpop.f32.mrb[25].mxu1  ;;  %v4644_v22 = vpop.f32.mrb[33].mxu0  ;;  %v3178_v21 = vsel %vm1585_vm3, %v3034_v39, -inf  ;;  %v3187_v55 = vsel %vm1585_vm3, %v3172_v40, -inf }
0x10b3   : > { %3179 = vmax.xlane.f32.xlu1 %v3178_v21  ;;  %v3037_v51 = vpop.f32.mrb[26].mxu1  ;;  %v3175_v52 = vpop.f32.mrb[34].mxu0 }
0x10b4   : > { %v4627_v53 = vpop.f32.mrb[27].mxu1  ;;  %v4645_v54 = vpop.f32.mrb[35].mxu0 }
0x10b7   : > { %3188 = vmax.xlane.f32.xlu1 %v3187_v55 }
0x10b9   : > { %v3080_v56 = vpop.f32.mrb[28].mxu1 }
0x10ba   : > { %v4632_v57 = vpop.f32.mrb[29].mxu1  ;;  %v3181_v58 = vsel %vm1585_vm3, %v3080_v56, -inf }
0x10bb   : > { %3182 = vmax.xlane.f32.xlu0 %v3181_v58  ;;  %v3083_v59 = vpop.f32.mrb[30].mxu1 }
0x10bc   : > { %v4633_v60 = vpop.f32.mrb[31].mxu1 }
0x10c1   : > { %v3126_v61 = vpop.f32.mrb[32].mxu1 }
0x10c2   : > { %v4638_v62 = vpop.f32.mrb[33].mxu1  ;;  %v3184_v1 = vsel %vm1585_vm3, %v3126_v61, -inf }
0x10c3   : > { %3185 = vmax.xlane.f32.xlu0 %v3184_v1  ;;  %v3129_v23 = vpop.f32.mrb[34].mxu1 }
0x10c4   : > { %v4639_v2 = vpop.f32.mrb[35].mxu1 }
0x10c8   : > { %2700 = vrot.lane.b32.xlu1 %v6798_v4, %s5831_s5 }
0x10d9   : > { %2698 = vrot.lane.b32.xlu0 %v6786_v63, %s5831_s5 }
0x1140   : > { %v3180_v5 = vpop.xlane.xlu1 %3179 }
0x1141   : > { %v3190_v7 = vsub.f32 %v3034_v39, %v3180_v5 }
0x1143   : > { %v3194_v12 = vmul.f32 1.442695, %v3190_v7 }
0x1144   : > { %v3189_v63 = vpop.xlane.xlu1 %3188 }
0x1145   : > { %5045 = vpow2.f32 %v3194_v12  ;;  %v3193_v15 = vsub.f32 %v3172_v40, %v3189_v63 }
0x1147   : > { %v3200_v16 = vmul.f32 1.442695, %v3193_v15 }
0x1148   : > { %v3183_v8 = vpop.xlane.xlu0 %3182  ;;  %v2701_v28 = vpop.permute.xlu1 %2700 }
0x1149   : > { %v3191_v9 = vsub.f32 %v3080_v56, %v3183_v8 }
0x114b   : > { %v3196_v10 = vmul.f32 1.442695, %v3191_v9 }
0x114d   : > { %5047 = vpow2.f32 %v3196_v10 }
0x114e   : > { %5049 = vpow2.f32 %v3200_v16 }
0x114f   : > { %v6872_v11 = vpop.eup %5045 }
0x1150   : > { %v3202_v13 = vsel %vm1585_vm3, %v6872_v11, 0.0  ;;  %v3186_v18 = vpop.xlane.xlu0 %3185 }
0x1151   : > { %3203 = vadd.xlane.f32.xlu0 %v3202_v13  ;;  %v3192_v19 = vsub.f32 %v3126_v61, %v3186_v18 }
0x1153   : > { %v3198_v20 = vmul.f32 1.442695, %v3192_v19 }
0x1155   : > { %5051 = vpow2.f32 %v3198_v20 }
0x1157   : > { %v6876_v14 = vpop.eup %5047 }
0x1158   : > { %v3205_v4 = vsel %vm1585_vm3, %v6876_v14, 0.0  ;;  %v6884_v24 = vpop.eup %5049 }
0x1159   : > { %3206 = vadd.xlane.f32.xlu1 %v3205_v4  ;;  %v3211_v25 = vsel %vm1585_vm3, %v6884_v24, 0.0 }
0x115f   : > { %v6888_v26 = vpop.eup %5051 }
0x1167   : > { %2704 = vrot.lane.b32.xlu0 %v6805_v6, %s5831_s5  ;;  %v3208_v6 = vsel %vm1585_vm3, %v6888_v26, 0.0 }
0x116a   : > { %2702 = vrot.lane.b32.xlu1 %v6796_v3, %s5831_s5  ;;  %v2699_v3 = vpop.permute.xlu0 %2698  ;;  %s6990_s5 = scalar_lea.hbm %s7159_s24, %s4438_s2 }
0x1186   : > { %3212 = vadd.xlane.f32.xlu0 %v3211_v25 }
0x118e   : > { %3209 = vadd.xlane.f32.xlu1 %v3208_v6 }
0x11de   : > { %v3204_v27 = vpop.xlane.xlu0 %3203 }
0x11df   : > { %5053 = vrcp.f32 %v3204_v27 }
0x11e2   : > { %v2705_v29 = vpop.permute.xlu0 %2704 }
0x11e3   : > { %v2726_v31 = vcombine.low %v2701_v28, %v2705_v29  ;;  %v2727_v32 = vcombine.high %v2701_v28, %v2705_v29 }
0x11e5   : > { %v2734_v37 = vrot.slane %v2726_v31, %v6606_v35  ;;  %v2741_v38 = vrot.slane %v2727_v32, %v6606_v35 }
0x11e6   : > { %v3207_v30 = vpop.xlane.xlu1 %3206 }
0x11e7   : > { %5055 = vrcp.f32 %v3207_v30 }
0x11e9   : > { %v5054_v60 = vpop.eup %5053 }
0x11ea   : > { %v2703_v33 = vpop.permute.xlu1 %2702  ;;  %v3218_v9 = vmul.f32 %v5054_v60, %v6872_v11 }
0x11eb   : > { %v2710_v34 = vcombine.low %v2699_v3, %v2703_v33  ;;  %v2711_v36 = vcombine.high %v2699_v3, %v2703_v33 }
0x11ec   : > { %v3222_v19 = vpack.c.bf16 %v3218_v9, %v3218_v9 }
0x11ed   : > { %v2718_v41 = vrot.slane %v2710_v34, %v6606_v35  ;;  %v2725_v43 = vrot.slane %v2711_v36, %v6606_v35 }
0x11ef   : > { %v2742_v17 = vcombine.low %v2718_v41, %v2734_v37  ;;  %v2743_v44 = vcombine.high %v2718_v41, %v2734_v37  ;;  %v2758_v45 = vcombine.low %v2725_v43, %v2741_v38  ;;  %v2759_v46 = vcombine.high %v2725_v43, %v2741_v38 }
0x11f1   : > { %v2750_v47 = vrot.slane %v2742_v17, %v6608_v42  ;;  %v2757_v48 = vrot.slane %v2743_v44, %v6608_v42  ;;  %v2766_v39 = vrot.slane %v2758_v45, %v6608_v42  ;;  %v2773_v40 = vrot.slane %v2759_v46, %v6608_v42  ;;  %v5056_v2 = vpop.eup %5055 }
0x11f2   : > { %v3219_v10 = vmul.f32 %v5056_v2, %v6876_v14 }
0x11f3   : > { %v2922_v50 = vcombine.low %v2750_v47, %v2757_v48  ;;  %v4400_v22 = vcombine.high %v2750_v47, %v2757_v48  ;;  %v2938_v21 = vcombine.low %v2766_v39, %v2773_v40  ;;  %v4401_v51 = vcombine.high %v2766_v39, %v2773_v40 }
0x11f4   : > { %v3223_v20 = vpack.c.bf16 %v3219_v10, %v3219_v10 }
0x11f5   : > { %v2929_v52 = vrot.slane %v2922_v50, %v6606_v35  ;;  %v2937_v53 = vrot.slane %v4400_v22, %v6606_v35  ;;  %v2945_v54 = vrot.slane %v2938_v21, %v6606_v35  ;;  %v2953_v55 = vrot.slane %v4401_v51, %v6606_v35 }
0x11f7   : > { %v2954_v56 = vcombine.low %v2929_v52, %v2937_v53  ;;  %v2970_v57 = vcombine.low %v2945_v54, %v2953_v55  ;;  %v2955_v58 = vcombine.high %v2929_v52, %v2937_v53  ;;  %v2971_v59 = vcombine.high %v2945_v54, %v2953_v55 }
0x11f9   : > { %v2962_v61 = vrot.slane %v2954_v56, %v6608_v42  ;;  %v2978_v62 = vrot.slane %v2970_v57, %v6608_v42  ;;  %v2969_v1 = vrot.slane %v2955_v58, %v6608_v42  ;;  %v2985_v23 = vrot.slane %v2971_v59, %v6608_v42  ;;  %v5010_v58 = vld [vmem:[#allocation13 + $0x10] sm:$0xff]  }
0x11fb   : > { %v2986_v5 = vcombine.low %v2962_v61, %v2978_v62  ;;  %v2987_v7 = vcombine.high %v2962_v61, %v2978_v62  ;;  %v2988_v12 = vcombine.low %v2969_v1, %v2985_v23  ;;  %v2989_v8 = vcombine.high %v2969_v1, %v2985_v23 }
0x11fd   : > { %v2990_v13 = vpack.c.bf16 %v2986_v5, %v2986_v5  ;;  %v2991_v4 = vpack.c.bf16 %v2987_v7, %v2987_v7  ;;  %v2992_v16 = vpack.c.bf16 %v2988_v12, %v2988_v12  ;;  %v2993_v18 = vpack.c.bf16 %v2989_v8, %v2989_v8  ;;  %v5011_v7 = vld [vmem:[#allocation13 + $0x18] sm:$0xff]  }
0x11ff   : > { %v3230_v63 = vsel %vm1821_vm4, %v2990_v13, 0  ;;  %v3276_v15 = vsel %vm1821_vm4, %v2991_v4, 0  ;;  %v3322_v11 = vsel %vm1821_vm4, %v2992_v16, 0  ;;  %v3368_v14 = vsel %vm1821_vm4, %v2993_v18, 0 }
0x1200   : > { %4647 = vmatpush3.bf16.msra.mxu1 %v3230_v63  ;;  %4653 = vmatpush3.bf16.msra.mxu0 %v3276_v15 }
0x1201   : > { %4658 = vmatprep.subr.bf16.mxu1 %v5823_v0  ;;  %4664 = vmatprep.subr.bf16.mxu0 %v5823_v0 }
0x1203   : > { %4649 = vmatmul.mubr.msk.bf16.vlgmr.msra.gmra.mrb[36].mxu1 %vm1585_vm3, %v3222_v19  ;;  %4655 = vmatmul.mubr.msk.bf16.vlgmr.msra.gmra.mrb[36].mxu0 %vm1585_vm3, %v3223_v20 }
0x1204   : > { %4659 = vmatpush3.bf16.msra.mxu1 %v3322_v11  ;;  %4665 = vmatpush3.bf16.msra.mxu0 %v3368_v14 }
0x1205   : > { %4666 = vmatprep.mubr.msk.bf16.mxu0 %vm5824_vm0, %v5823_v0  ;;  %4660 = vmatprep.mubr.msk.bf16.mxu1 %vm5824_vm0, %v5823_v0 }
0x1206   : > { %4670 = vmatprep.subr.bf16.mxu1 %v5823_v0  ;;  %4678 = vmatprep.subr.bf16.mxu0 %v5823_v0 }
0x1213   : > { %v3213_v25 = vpop.xlane.xlu0 %3212 }
0x1214   : > { %5057 = vrcp.f32 %v3213_v25 }
0x121b   : > { %v3210_v6 = vpop.xlane.xlu1 %3209 }
0x121c   : > { %5059 = vrcp.f32 %v3210_v6 }
0x121e   : > { %v5058_v3 = vpop.eup %5057 }
0x121f   : > { %v3221_v27 = vmul.f32 %v5058_v3, %v6884_v24 }
0x1221   : > { %v3225_v28 = vpack.c.bf16 %v3221_v27, %v3221_v27 }
0x1223   : > { %4667 = vmatmul.mubr.msk.bf16.vlgmr.msra.gmra.mrb[40].mxu0 %vm1585_vm3, %v3225_v28 }
0x1224   : > { %4682 = vmatprep.mubr.msk.bf16.mxu0 %vm5824_vm0, %v5823_v0 }
0x1226   : > { %v5060_v29 = vpop.eup %5059 }
0x1227   : > { %v3220_v30 = vmul.f32 %v5060_v29, %v6888_v26 }
0x1229   : > { %v3224_v31 = vpack.c.bf16 %v3220_v30, %v3220_v30 }
0x122b   : > { %4661 = vmatmul.mubr.msk.bf16.vlgmr.msra.gmra.mrb[40].mxu1 %vm1585_vm3, %v3224_v31  ;;  %v4412_v31 = vld [vmem:[#allocation14 + $0x1] ss:$0 sm:$0xff] }
0x122c   : > { %4674 = vmatprep.mubr.msk.bf16.mxu1 %vm5824_vm0, %v5823_v0  ;;  %4671 = vmatpush3.bf16.msra.mxu1 %v5010_v58 }
0x122d   : > { %4672 = vmatprep.subr.bf16.mxu1 %v5823_v0 }
0x1230   : > { %4673 = vmatpush3.bf16.msra.mxu1 %v5011_v7 }
0x1231   : > { %4686 = vmatprep.subr.bf16.mxu1 %v5823_v0 }
0x12d6   : > { %v3266_v32 = vpop.f32.mrb[36].mxu1  ;;  %v3312_v33 = vpop.f32.mrb[36].mxu0 }
0x12d7   : > { %v4650_v34 = vpop.f32.mrb[37].mxu1  ;;  %v4656_v36 = vpop.f32.mrb[37].mxu0 }
0x12d8   : > { %v3269_v24 = vpop.f32.mrb[38].mxu1  ;;  %v3315_v37 = vpop.f32.mrb[38].mxu0 }
0x12d9   : > { %v4651_v38 = vpop.f32.mrb[39].mxu1  ;;  %v4657_v41 = vpop.f32.mrb[39].mxu0 }
0x12f6   : > { %v3404_v43 = vpop.f32.mrb[40].mxu0 }
0x12f7   : > { %v3426_v17 = vcombine.low %v3312_v33, %v3404_v43  ;;  %v3427_v44 = vcombine.high %v3312_v33, %v3404_v43  ;;  %v4668_v45 = vpop.f32.mrb[41].mxu0 }
0x12f8   : > { %v3407_v46 = vpop.f32.mrb[42].mxu0 }
0x12f9   : > { %v4669_v26 = vpop.f32.mrb[43].mxu0  ;;  %v3434_v22 = vrot.slane %v3426_v17, %v6606_v35  ;;  %v3441_v21 = vrot.slane %v3427_v44, %v6606_v35  ;;  %v5012_v46 = vld [vmem:[#allocation19 + $0x10] sm:$0xff]  }
0x12fa   : > { %4679 = vmatpush3.bf16.msra.mxu0 %v5012_v46  ;;  %v5013_v26 = vld [vmem:[#allocation19 + $0x18] sm:$0xff]  }
0x12fb   : > { %4680 = vmatprep.subr.bf16.mxu0 %v5823_v0 }
0x12fe   : > { %v3358_v47 = vpop.f32.mrb[40].mxu1  ;;  %4681 = vmatpush3.bf16.msra.mxu0 %v5013_v26  ;;  %v5022_v26 = vld [vmem:[#allocation31] sm:$0xff]  }
0x12ff   : > { %v3410_v48 = vcombine.low %v3266_v32, %v3358_v47  ;;  %v3411_v39 = vcombine.high %v3266_v32, %v3358_v47  ;;  %v4662_v40 = vpop.f32.mrb[41].mxu1  ;;  %v5014_v47 = vld [vmem:[#allocation22 + $0x40] sm:$0xff]   ;;  %4706 = vmatprep.subr.bf16.mxu0 %v5823_v0 }
0x1300   : > { %v3361_v50 = vpop.f32.mrb[42].mxu1  ;;  %v5018_v40 = vld [vmem:[#allocation22 + $0x60] sm:$0xff]  }
0x1301   : > { %v3418_v51 = vrot.slane %v3410_v48, %v6606_v35  ;;  %v3425_v52 = vrot.slane %v3411_v39, %v6606_v35  ;;  %v4663_v53 = vpop.f32.mrb[43].mxu1  ;;  %v5016_v48 = vld [vmem:[#allocation22 + $0x50] sm:$0xff]   ;;  %v5017_v39 = vld [vmem:[#allocation22 + $0x58] sm:$0xff]   ;;  %v5019_v50 = vld [vmem:[#allocation22 + $0x68] sm:$0xff]  }
0x1302   : > { %v4416_v53 = vld [vmem:[#allocation16 + $0x1] ss:$0 sm:$0xff] }
0x1303   : > { %v3442_v54 = vcombine.low %v3418_v51, %v3434_v22  ;;  %v3443_v55 = vcombine.high %v3418_v51, %v3434_v22  ;;  %v3458_v56 = vcombine.low %v3425_v52, %v3441_v21  ;;  %v3459_v57 = vcombine.high %v3425_v52, %v3441_v21 }
0x1305   : > { %v3450_v59 = vrot.slane %v3442_v54, %v6608_v42  ;;  %v3457_v60 = vrot.slane %v3443_v55, %v6608_v42  ;;  %v3466_v61 = vrot.slane %v3458_v56, %v6608_v42  ;;  %v3473_v62 = vrot.slane %v3459_v57, %v6608_v42  ;;  %v4417_v55 = vld [vmem:[#allocation17 + $0x1] ss:$0 sm:$0xff] }
0x1307   : > { %v3478_v1 = vcombine.low %v3450_v59, %v3457_v60  ;;  %v4410_v23 = vcombine.high %v3450_v59, %v3457_v60  ;;  %v3494_v2 = vcombine.low %v3466_v61, %v3473_v62  ;;  %v4411_v5 = vcombine.high %v3466_v61, %v3473_v62  ;;  %v5020_v59 = vld [vmem:[#allocation22 + $0x70] sm:$0xff]   ;;  %v5021_v60 = vld [vmem:[#allocation22 + $0x78] sm:$0xff]  }
0x1308   : > { %v4418_v61 = vld [vmem:[#allocation20 + $0x1] ss:$0 sm:$0xff] }
0x1309   : > { %v3485_v12 = vrot.slane %v3478_v1, %v6606_v35  ;;  %v3493_v8 = vrot.slane %v4410_v23, %v6606_v35  ;;  %v3501_v9 = vrot.slane %v3494_v2, %v6606_v35  ;;  %v3509_v10 = vrot.slane %v4411_v5, %v6606_v35 }
0x130b   : > { %v3511_v13 = vcombine.high %v3485_v12, %v3493_v8  ;;  %v3527_v4 = vcombine.high %v3501_v9, %v3509_v10  ;;  %v3510_v63 = vcombine.low %v3485_v12, %v3493_v8  ;;  %v3526_v15 = vcombine.low %v3501_v9, %v3509_v10  ;;  %v4422_v8 = vld [vmem:[#allocation23 + $0x1] ss:$0 sm:$0xff] }
0x130d   : > { %v3525_v16 = vrot.slane %v3511_v13, %v6608_v42  ;;  %v3541_v18 = vrot.slane %v3527_v4, %v6608_v42  ;;  %v3518_v19 = vrot.slane %v3510_v63, %v6608_v42  ;;  %v3534_v20 = vrot.slane %v3526_v15, %v6608_v42 }
0x130f   : > { %v3544_v11 = vcombine.low %v3525_v16, %v3541_v18  ;;  %v3543_v14 = vcombine.high %v3518_v19, %v3534_v20  ;;  %v3545_v25 = vcombine.high %v3525_v16, %v3541_v18  ;;  %v3542_v6 = vcombine.low %v3518_v19, %v3534_v20 }
0x1311   : > { %3551 = vrot.lane.b32.xlu1 %v3544_v11, %s5832_s7  ;;  %3547 = vrot.lane.b32.xlu0 %v3543_v14, %s5833_s30  ;;  %s4021_s7 = scalar_lea.sflag [#allocation4], %s6506_s9  ;;  %s5835_s30 = smov [#allocation37]  }
0x1315   : > { %3555 = vrot.lane.b32.xlu1 %v3545_v25, %s5834_s23  ;;  %s5689_s23 = sshll.u32 %s5835_s30, 4  ;;  %s5690_s23 = int_to_ptr.vmem [resolvable:$false] %s5689_s23 }
0x1316   : > { %s5691_s6 = scalar_lea.vmem %s5690_s23, 32  ;;  %p5692_p3 = scmp.lt.s32.totalorder %s6992_s1, %s5690_s23 }
0x1317   : > { %p5693_p9 = scmp.lt.s32.totalorder %s5691_s6, %s5685_s3 }
0x1319   : > { %p5694_p6 = por %p5693_p9, %p5692_p3 }
0x131b   : > { %p5695_p0 = pnand %p5694_p6, %p5688_p1 }
0x1383   : > { %v3552_v35 = vpop.permute.xlu1 %3551  ;;  %v3548_v3 = vpop.permute.xlu0 %3547 }
0x1384   : > { %v3558_v27 = vsel %vm1585_vm3, %v3542_v6, %v3548_v3 }
0x1385   : > { %v3559_v29 = vsel %vm1009_vm1, %v3558_v27, %v3552_v35  ;;  %v4431_v27 = vld [vmem:[#allocation25 + $0x1] ss:$0 sm:$0xff] }
0x1387   : > { %v3556_v28 = vpop.permute.xlu1 %3555 }
0x1388   : > { %v3560_v30 = vsel %vm2153_vm5, %v3559_v29, %v3556_v28  ;;  %v4432_v29 = vld [vmem:[#allocation26 + $0x1] ss:$0 sm:$0xff] }
0x1389   : > { %v3566_v42 = vpack.c.bf16 %v3560_v30, %v3560_v30 }
0x138b   : > { %4675 = vmatmul.mubr.msk.bf16.vlgmr.msra.gmra.mrb[44].mxu1 %vm1079_vm2, %v3566_v42 }
0x138c   : > { %4702 = vmatprep.mubr.msk.bf16.mxu1 %vm5824_vm0, %v5823_v0  ;;  %4687 = vmatpush3.bf16.msra.mxu1 %v5014_v47  ;;  %v5023_v47 = vld [vmem:[#allocation31 + $0x8] sm:$0xff]  }
0x138d   : > { %4688 = vmatprep.subr.bf16.mxu1 %v5823_v0 }
0x145e   : > { %v3624_v32 = vpop.f32.mrb[44].mxu1 }
0x145f   : > { %v3625_v33 = vadd.f32 %v4412_v31, %v3624_v32  ;;  %v4676_v34 = vpop.f32.mrb[45].mxu1 }
0x1460   : > { %v3627_v36 = vpop.f32.mrb[46].mxu1 }
0x1461   : > { %v4677_v24 = vpop.f32.mrb[47].mxu1  ;;  %v3630_v37 = vadd.f32 %v3625_v33, %v6779_v49  ;;  %v5015_v49 = vld [vmem:[#allocation22 + $0x48] sm:$0xff]  }
0x1462   : > { %4689 = vmatpush3.bf16.msra.mxu1 %v5015_v49 }
0x1463   : > { %v3635_v38 = vsel %vm1079_vm2, %v3630_v37, 0.0  ;;  %4690 = vmatprep.subr.bf16.mxu1 %v5823_v0 }
0x1464   : > { %3636 = vadd.xlane.f32.xlu0 %v3635_v38 }
0x1466   : > { %4691 = vmatpush3.bf16.msra.mxu1 %v5016_v48 }
0x1467   : > { %4692 = vmatprep.subr.bf16.mxu1 %v5823_v0 }
0x146a   : > { %4693 = vmatpush3.bf16.msra.mxu1 %v5017_v39 }
0x146b   : > { %4694 = vmatprep.subr.bf16.mxu1 %v5823_v0 }
0x146e   : > { %4695 = vmatpush3.bf16.msra.mxu1 %v5018_v40 }
0x146f   : > { %4696 = vmatprep.subr.bf16.mxu1 %v5823_v0 }
0x1472   : > { %4697 = vmatpush3.bf16.msra.mxu1 %v5019_v50  ;;  %v3887_v50 = vld [vmem:[#allocation28] sm:$0x1] }
0x1473   : > { %4698 = vmatprep.subr.bf16.mxu1 %v5823_v0 }
0x1476   : > { %4699 = vmatpush3.bf16.msra.mxu1 %v5020_v59 }
0x1477   : > { %4700 = vmatprep.subr.bf16.mxu1 %v5823_v0 }
0x147a   : > { %4701 = vmatpush3.bf16.msra.mxu1 %v5021_v60 }
0x14f1   : > { %v3637_v41 = vpop.xlane.xlu0 %3636 }
0x14f2   : > { %v3638_v43 = vmul.f32 0.03125, %v3637_v41 }
0x14f4   : > { %v3639_v17 = vsub.f32 %v3630_v37, %v3638_v43 }
0x14f6   : > { %v3640_v44 = vmul.f32 %v3639_v17, %v3639_v17 }
0x14f8   : > { %v3641_v45 = vsel %vm1079_vm2, %v3640_v44, 0.0 }
0x14f9   : > { %3642 = vadd.xlane.f32.xlu1 %v3641_v45 }
0x1586   : > { %v3643_v22 = vpop.xlane.xlu1 %3642 }
0x1587   : > { %v3644_v21 = vmul.f32 0.03125, %v3643_v22 }
0x1589   : > { %v3645_v51 = vadd.f32 1e-05, %v3644_v21  ;;  %v3888_v21 = vld [vmem:[#allocation29] sm:$0x1] }
0x158b   : > { %5061 = vrsqrt.f32 %v3645_v51 }
0x1595   : > { %v5062_v52 = vpop.eup %5061 }
0x1596   : > { %v3647_v54 = vmul.f32 %v5062_v52, %v3639_v17 }
0x1598   : > { %v3654_v56 = vmul.f32 %v4416_v53, %v3647_v54  ;;  %v5024_v54 = vld [vmem:[#allocation34] sm:$0xff]  }
0x159a   : > { %v3661_v57 = vadd.f32 %v4417_v55, %v3654_v56  ;;  %v3909_v55 = vld [vmem:[#allocation32] sm:$0x1] }
0x159c   : > { %v3667_v58 = vpack.c.bf16 %v3661_v57, %v3661_v57 }
0x159e   : > { %4683 = vmatmul.mubr.msk.bf16.vlgmr.msra.gmra.mrb[44].mxu0 %vm1079_vm2, %v3667_v58 }
0x159f   : > { %4710 = vmatprep.mubr.msk.bf16.mxu0 %vm5824_vm0, %v5823_v0  ;;  %4707 = vmatpush3.bf16.msra.mxu0 %v5022_v26 }
0x15a0   : > { %4708 = vmatprep.subr.bf16.mxu0 %v5823_v0 }
0x15a3   : > { %4709 = vmatpush3.bf16.msra.mxu0 %v5023_v47 }
0x15a4   : > { %4714 = vmatprep.subr.bf16.mxu0 %v5823_v0 }
0x1671   : > { %v3725_v62 = vpop.f32.mrb[44].mxu0 }
0x1672   : > { %v3726_v1 = vadd.f32 %v4418_v61, %v3725_v62  ;;  %v4684_v23 = vpop.f32.mrb[45].mxu0 }
0x1673   : > { %v3728_v2 = vpop.f32.mrb[46].mxu0 }
0x1674   : > { %v3731_v5 = vmax.f32 %v3726_v1, 0.0  ;;  %v4685_v7 = vpop.f32.mrb[47].mxu0  ;;  %v3969_v1 = vld [vmem:[#allocation35] sm:$0x1] }
0x1676   : > { %v3749_v12 = vpack.c.bf16 %v3731_v5, %v3731_v5 }
0x1678   : > { %4703 = vmatmul.mubr.bf16.vlgmr.msra.gmra.mrb[48].mxu1 %v3749_v12 }
0x174b   : > { %v3840_v9 = vpop.f32.mrb[48].mxu1 }
0x174c   : > { %v3841_v10 = vadd.f32 %v4422_v8, %v3840_v9  ;;  %v4704_v13 = vpop.f32.mrb[49].mxu1 }
0x174d   : > { %v3843_v4 = vpop.f32.mrb[50].mxu1 }
0x174e   : > { %v4705_v63 = vpop.f32.mrb[51].mxu1  ;;  %v3846_v15 = vadd.f32 %v3841_v10, %v3661_v57 }
0x1750   : > { %v3851_v16 = vsel %vm1079_vm2, %v3846_v15, 0.0 }
0x1751   : > { %3852 = vadd.xlane.f32.xlu0 %v3851_v16 }
0x17de   : > { %v3853_v18 = vpop.xlane.xlu0 %3852 }
0x17df   : > { %v3854_v19 = vmul.f32 0.03125, %v3853_v18 }
0x17e1   : > { %v3855_v20 = vsub.f32 %v3846_v15, %v3854_v19 }
0x17e3   : > { %v3856_v11 = vmul.f32 %v3855_v20, %v3855_v20 }
0x17e5   : > { %v3857_v14 = vsel %vm1079_vm2, %v3856_v11, 0.0 }
0x17e6   : > { %3858 = vadd.xlane.f32.xlu0 %v3857_v14 }
0x1873   : > { %v3859_v25 = vpop.xlane.xlu0 %3858 }
0x1874   : > { %v3860_v6 = vmul.f32 0.03125, %v3859_v25 }
0x1876   : > { %v3861_v35 = vadd.f32 1e-05, %v3860_v6 }
0x1878   : > { %5063 = vrsqrt.f32 %v3861_v35 }
0x1882   : > { %v5064_v3 = vpop.eup %5063 }
0x1883   : > { %v3863_v28 = vmul.f32 %v5064_v3, %v3855_v20 }
0x1885   : > { %v3870_v30 = vmul.f32 %v4431_v27, %v3863_v28 }
0x1887   : > { %v3877_v42 = vadd.f32 %v4432_v29, %v3870_v30 }
0x1889   : > { %v3878_v31 = vsel %vm1079_vm2, %v3877_v42, 0.0 }
0x188a   : > { %v3879_v32 = vrot.slane %v3878_v31, 4 }
0x188c   : > { %v3880_v33 = vadd.f32 %v3879_v32, %v3878_v31 }
0x188e   : > { %v3881_v34 = vrot.slane %v3880_v33, 2 }
0x1890   : > { %v3882_v36 = vadd.f32 %v3881_v34, %v3880_v33 }
0x1892   : > { %v3883_v24 = vrot.slane %v3882_v36, 1 }
0x1894   : > { %v3884_v37 = vadd.f32 %v3883_v24, %v3882_v36 }
0x1896   : > { %v3886_v38 = vmul.f32 0.125, %v3884_v37 }
0x1898   : > { %v3889_v41 = vsel %vm1079_vm2, %v3886_v38, 0.0 }
0x1899   : > { %3890 = vadd.xlane.f32.xlu1 %v3889_v41 }
0x1926   : > { %v3891_v43 = vpop.xlane.xlu1 %3890 }
0x1927   : > { %v3892_v17 = vmul.f32 0.03125, %v3891_v43 }
0x1929   : > { %v3893_v44 = vsub.f32 %v3886_v38, %v3892_v17 }
0x192b   : > { %v3894_v45 = vmul.f32 %v3893_v44, %v3893_v44 }
0x192d   : > { %v3895_v46 = vsel %vm1079_vm2, %v3894_v45, 0.0 }
0x192e   : > { %3896 = vadd.xlane.f32.xlu0 %v3895_v46 }
0x19bb   : > { %v3897_v49 = vpop.xlane.xlu0 %3896 }
0x19bc   : > { %v3898_v48 = vmul.f32 0.03125, %v3897_v49 }
0x19be   : > { %v3899_v39 = vadd.f32 1e-05, %v3898_v48 }
0x19c0   : > { %5065 = vrsqrt.f32 %v3899_v39 }
0x19ca   : > { %v5066_v40 = vpop.eup %5065 }
0x19cb   : > { %v3901_v22 = vmul.f32 %v5066_v40, %v3893_v44 }
0x19cd   : > { %v3902_v51 = vmul.f32 %v3901_v22, %v3887_v50 }
0x19cf   : > { %v3903_v52 = vadd.f32 %v3902_v51, %v3888_v21 }
0x19d1   : > { %v3908_v53 = vpack.c.bf16 %v3903_v52, %v3903_v52 }
0x19d3   : > { %4711 = vmatmul.mubr.msk.bf16.vlgmr.msra.gmra.mrb[48].mxu0 %vm1079_vm2, %v3908_v53 }
0x19d4   : > { %4716 = vmatprep.mubr.msk.bf16.mxu0 %vm5824_vm0, %v5823_v0  ;;  %4715 = vmatpush3.bf16.msra.mxu0 %v5024_v54 }
0x1aa6   : > { %v3959_v56 = vpop.f32.mrb[48].mxu0 }
0x1aa7   : > { %v3960_v57 = vadd.f32 %v3959_v56, %v3909_v55  ;;  %v4712_v58 = vpop.f32.mrb[49].mxu0 }
0x1aa8   : > { %v3962_v59 = vpop.f32.mrb[50].mxu0 }
0x1aa9   : > { %v3965_v60 = vmax.f32 %v3960_v57, 0.0  ;;  %v4713_v61 = vpop.f32.mrb[51].mxu0 }
0x1aab   : > { %v3968_v62 = vpack.c.bf16 %v3965_v60, %v3965_v60 }
0x1aad   : > { %4717 = vmatmul.mubr.msk.bf16.vlgmr.msra.gmra.mrb[52].mxu0 %vm1009_vm1, %v3968_v62 }
0x1b80   : > { %v4013_v23 = vpop.f32.mrb[52].mxu0 }
0x1b81   : > { %v4014_v0 = vadd.f32 %v4013_v23, %v3969_v1  ;;  %v4718_v2 = vpop.f32.mrb[53].mxu0 }
0x1b82   : > { %v4016_v5 = vpop.f32.mrb[54].mxu0 }
0x1b83   : > { %4019 = vst [vmem:[%s990_s0] sm:$0x1] %v4014_v0  ;;  %v4719_v7 = vpop.f32.mrb[55].mxu0 }
0x1b84   : > { %5698 = shalt.err (!%p5695_p0)
}
0x1b85   : > { %s5699_s9 = scalar_lea.hbm %s6990_s5, 16  ;;  %s5703_s29 = scalar_lea.hbm %s7159_s24, 32 }
0x1b86   : > { %p5700_p2 = scmp.ne.s32.totalorder %s6990_s5, %s5699_s9  ;;  %p5704_p12 = scmp.lt.u32.totalorder %s6990_s5, %s7159_s24 }
0x1b87   : > { %p5705_p11 = scmp.lt.u32.totalorder %s5703_s29, %s5699_s9  ;;  %p5707_p5 = scmp.lt.u32.totalorder %s5699_s9, %s6990_s5 }
0x1b88   : > { %p5701_p8 = pnand %p5700_p2, %p7160_p7 }
0x1b89   : > { %p5706_p13 = por %p5705_p11, %p5704_p12 }
0x1b8a   : > { %p5702_p10 = pneg %p5701_p8 }
0x1b8b   : > { %p5708_p4 = por %p5707_p5, %p5706_p13 }
0x1b8d   : > { %p5709_p1 = pnand %p5708_p4, %p5702_p10 }
0x1b8f   : > { %5712 = shalt.err (!%p5709_p1)
}
0x1b90   : > { %4806 = dma.vmem_to_hbm [thread:$0]  (%p7160_p7), %s6992_s1, 16, %s6990_s5, %s4021_s7  }
0x1b91 PF: > { %s7161_s3 = sld [smem:[#allocation51_spill]]  ;;  %s7162_s6 = sld [smem:[#allocation54_spill]] }
0x1b92   : > { %p7163_p3 = scmp.ne.s32.totalorder %s7131_s28, 0 }
0x1b97   : > { %s4045_s2 = sand.u32 1, %s7161_s3   ;;  %p7164_p9 = scmp.ge.s32.totalorder %s7162_s6, 2 }
0x1b98   : > { %s4046_s0 = scalar_lea.sflag [#allocation4], %s4045_s2 }
0x1b99   : > { %p4877_p6 = pnand %p7164_p9, %p7163_p3 }
0x1b9b   : > { %5778 = dma.done.wait (!%p4877_p6), %s4046_s0, 16  }
0x1b9c   : > { %5780 = vsyncadd (!%p4877_p6), %s4046_s0, 4294967280  ;;  %s7165_s3 = sld [smem:[#allocation52_spill]]  ;;  %s7166_s28 = sld [smem:[#allocation53_spill]] }
0x1b9d   : > { %p46_p0 = scmp.ge.s32.totalorder %s6436_s26, 4   ;;  %s7167_s29 = smov %s6448_s27 }
0x1b9e   : > { %s7168_s30 = smov %s6436_s26 }
0x1b9f   :  { %48 = sbr.rel (!%p46_p0) target bundleno = 30 (0x1e), region = 249 }
0x1ba6   :  { %4050 = vsyncpa [#allocation3], 1 }
0x1ba7   :  { %4052 = vsyncpa [#allocation3 + $0x1], 1 }
0x1ba8   :  { %4053 = vsyncpa [#allocation6], 1 }
0x1ba9   :  { %4054 = vsyncpa [#allocation9], 1 }
0x1baa   :  { %4055 = vsyncpa [#allocation12], 1 }
0x1bab   :  { %4056 = vsyncpa [#allocation15], 1 }
0x1bac   :  { %4057 = vsyncpa [#allocation18], 1 }
0x1bad   :  { %4058 = vsyncpa [#allocation21], 1 }
0x1bae   :  { %4059 = vsyncpa [#allocation24], 1 }
0x1baf   :  { %4060 = vsyncpa [#allocation27], 1 }
0x1bb0   :  { %4061 = vsyncpa [#allocation30], 1 }
0x1bb1   :  { %4062 = vsyncpa [#allocation33], 1 }
0x1bb2   :  { %4063 = vsyncpa [#allocation36], 1 }
0x1bb3   :  { %4064 = vsyncpa [#allocation4], 1 }
0x1bb4   :  { %4066 = vsyncpa [#allocation4 + $0x1], 1 }

</bundles_post_ra>
